<compile_context>
chip_gen: v7x
topology: tpu7x:2x2x1
jax: 0.10.0
libtpu: 0.0.40
codegen_flags: <defaults>
</compile_context>

<pallas_src>
import jax
import jax.numpy as jnp
from jax.experimental import pallas as pl
from jax.experimental.pallas import tpu as pltpu

NEG_SLOPE = 0.01   # F.leaky_relu default
LN_EPS = 1e-5      # nn.LayerNorm default
H = 64             # hidden width forced by the shared nn.LayerNorm(64)
E_PAD = 8          # e has 1 feature, padded to 8 (sublane multiple)

# rows of the packed bias / LayerNorm-affine table ([16, 64] VMEM tile, single DMA)
(ROW_SE1, ROW_SE2, ROW_SP1, ROW_SP2,
 ROW_C1, ROW_C2, ROW_C3, ROW_C5, ROW_C6, ROW_C7, ROW_C8,
 ROW_DEC1, ROW_DEC2, ROW_LN_G, ROW_LN_B) = range(15)

# conv-weight slab row offsets ([F, 128] blocks stacked along contraction rows)
CONV_NAMES = ("conv1", "conv2", "conv3", "conv5", "conv6", "conv7", "conv8")
CONV_F = (64, 192, 384, 64, 192, 384, 640)
OFF_C1, OFF_C2, OFF_C3, OFF_C5, OFF_C6, OFF_C7, OFF_C8 = (
    0, 64, 256, 640, 704, 896, 1280)

VMEM = pl.BlockSpec(memory_space=pltpu.MemorySpace.VMEM)


# ---------------------------------------------------------------------------
# Single fused Pallas kernel: entire spec_ln forward pass
# ---------------------------------------------------------------------------
def _make_kernel(in_pad):
    # enc/dec slab row offsets (all multiples of 8 -> free static slices)
    off_se1 = 0
    off_se2 = off_se1 + E_PAD
    off_sp1 = off_se2 + H
    off_sp2 = off_sp1 + in_pad
    off_d1 = off_sp2 + H
    off_d2 = off_d1 + 960

    def kernel(node_ref, spec_ref, bias_ref, convw_ref, encw_ref, out_ref,
               xcat, scat):
        n = node_ref.shape[0]
        k = spec_ref.shape[0]

        bp = bias_ref[...]                       # [16, 64] biases + LN affine
        # hoisted LayerNorm affine broadcasts (JAX does not CSE broadcast_in_dim;
        # 13 layernorms would otherwise re-emit these on the critical chain)
        gamma = {r: jnp.broadcast_to(bp[ROW_LN_G:ROW_LN_G + 1, :], (r, H))
                 for r in {n, k}}
        beta = {r: jnp.broadcast_to(bp[ROW_LN_B:ROW_LN_B + 1, :], (r, H))
                for r in {n, k}}

        def bias(row):
            return bp[row:row + 1, :]

        def leaky(h):
            return jnp.maximum(h, NEG_SLOPE * h)

        def layernorm(h):
            # two-pass (mean, then centered variance) - matches nn.LayerNorm
            inv = jnp.float32(1.0 / h.shape[-1])
            mean = jnp.sum(h, axis=-1, keepdims=True) * inv
            c = h - mean
            var = jnp.sum(c * c, axis=-1, keepdims=True) * inv
            r = h.shape[0]
            return c * jax.lax.rsqrt(var + LN_EPS) * gamma[r] + beta[r]

        def mm(a, b):
            # TODO(synk): optionally cast operands to bf16 (keep f32 accum) for
            # extra MXU headroom; kept f32 here to stay bit-close to the ref.
            return jnp.dot(a, b, preferred_element_type=jnp.float32)

        def enc(x, off, rows, brow):
            # Linear -> leaky_relu -> LayerNorm, weight sliced from the 64-wide slab
            return layernorm(leaky(mm(x, encw_ref[off:off + rows, :]) + bias(brow)))

        def econv(xin, off, f, brow, madd):
            # EdgeConv (max aggregation) fused with leaky_relu + LayerNorm:
            #   out_i = x_i @ (Ws - Wd)^T + b + max_{j in N(i)} x_j @ Wd^T
            # packed weight [F, 2H] = [Wd^T | (Ws-Wd)^T] -> one lane-dense dot,
            # neighbour term lands at lane offset 0 (feeds the big broadcast).
            z = mm(xin, convw_ref[off:off + f, :])          # [rows, 128]
            y = z[:, :H]                                    # neighbour term
            c = z[:, H:] + bias(brow)                       # self term
            # TODO(synk): O(rows^2*H) f32 temp; tile into a running max over
            # source-row blocks before graphs exceed a few hundred nodes
            # (relevant first on v7x's 64 MiB VMEM).
            agg = jnp.max(y[None, :, :] + madd[:, :, None], axis=1)
            return layernorm(leaky(c + agg))

        # unpack per-graph inputs (static lane slices of the two packed DMAs)
        x_in = node_ref[:, 0:in_pad]
        u = node_ref[:, in_pad:in_pad + k]
        mx = node_ref[:, in_pad + k:in_pad + k + n]
        e = spec_ref[:, 0:E_PAD]
        ut = spec_ref[:, E_PAD:E_PAD + n]
        ms = spec_ref[:, E_PAD + n:E_PAD + n + k]

        # encoders
        s0 = enc(enc(e, off_se1, E_PAD, ROW_SE1), off_se2, H, ROW_SE2)
        x0 = enc(enc(x_in, off_sp1, in_pad, ROW_SP1), off_sp2, H, ROW_SP2)
        scat[:, 0:64] = s0
        xcat[:, 0:64] = x0

        # round 1
        scat[:, 64:128] = econv(s0, OFF_C1, 64, ROW_C1, ms)
        scat[:, 128:192] = mm(ut, x0)
        xcat[:, 64:128] = econv(x0, OFF_C5, 64, ROW_C5, mx)
        xcat[:, 128:192] = mm(u, s0)

        # round 2 (single K=192 dots on the contiguous slabs)
        scat[:, 192:256] = econv(scat[:, 0:192], OFF_C2, 192, ROW_C2, ms)
        scat[:, 256:384] = mm(ut, xcat[:, 64:192])
        xcat[:, 192:256] = econv(xcat[:, 0:192], OFF_C6, 192, ROW_C6, mx)
        xcat[:, 256:384] = mm(u, scat[:, 64:192])

        # round 3 (K=384)
        scat[:, 384:448] = econv(scat[:, 0:384], OFF_C3, 384, ROW_C3, ms)
        scat[:, 448:640] = mm(ut, xcat[:, 192:384])
        xcat[:, 384:448] = econv(xcat[:, 0:384], OFF_C7, 384, ROW_C7, mx)
        xcat[:, 448:640] = mm(u, scat[:, 192:384])

        # round 4 (spatial only, K=640)
        xcat[:, 640:704] = econv(xcat[:, 0:640], OFF_C8, 640, ROW_C8, mx)
        xcat[:, 704:960] = mm(u, scat[:, 384:640])

        # decoder: one K=960 dot (MXU accumulates; no chained VPU adds)
        # TODO(synk): Dropout(p=0.5) is stochastic in training; identity here.
        out = layernorm(leaky(mm(xcat[:, 0:960],
                                 encw_ref[off_d1:off_d1 + 960, :]) + bias(ROW_DEC1)))
        out_ref[...] = mm(out, encw_ref[off_d2:off_d2 + H, :]) + bias(ROW_DEC2)

    return kernel


# ---------------------------------------------------------------------------
# Parameters (PyTorch-Linear-style uniform init) + one-time layout preparation
# ---------------------------------------------------------------------------
def init_params(key, in_channels, hidden_channels=(64, 64, 64, 64)):
    # shared nn.LayerNorm(64) after every conv forces hidden_channels == (64,)*4
    assert all(h == H for h in hidden_channels)
    layers = [
        ("se1", 64, 1), ("se2", 64, 64),
        ("sp1", 64, in_channels), ("sp2", 64, 64),
        ("conv1", 64, 2 * 64), ("conv2", 64, 2 * 192), ("conv3", 64, 2 * 384),
        ("conv5", 64, 2 * 64), ("conv6", 64, 2 * 192), ("conv7", 64, 2 * 384),
        ("conv8", 64, 2 * 640),
        ("dec1", 64, 960), ("dec2", 32, 64),
    ]
    keys = jax.random.split(key, len(layers))
    p = {}
    for k_, (name, out_f, in_f) in zip(keys, layers):
        kw, kb = jax.random.split(k_)
        scale = 1.0 / (in_f ** 0.5)
        p[name + "_w"] = jax.random.uniform(kw, (out_f, in_f), jnp.float32, -scale, scale)
        p[name + "_b"] = jax.random.uniform(kb, (out_f,), jnp.float32, -scale, scale)
    p["ln_g"] = jnp.ones((64,), jnp.float32)    # LayerNorm default affine params
    p["ln_b"] = jnp.zeros((64,), jnp.float32)
    return p


def prepare_params(p):
    """One-time layout plumbing: pack ALL weights into 2 slabs + 1 bias table."""
    def pad_rows(wt, mult=8):
        pad = (-wt.shape[0]) % mult
        return jnp.pad(wt, ((0, pad), (0, 0))) if pad else wt

    # conv slab [1920, 128]: each EdgeConv Linear(2F,64) repacked as [F,128] = [Wd^T | (Ws-Wd)^T]
    conv_blocks = []
    for name, f in zip(CONV_NAMES, CONV_F):
        w = p[name + "_w"]                                   # [64, 2F]
        ws, wd = w[:, :f], w[:, f:]
        conv_blocks.append(jnp.concatenate([wd.T, (ws - wd).T], axis=1))
    conv_slab = jnp.concatenate(conv_blocks, axis=0)

    # enc/dec slab [*, 64]: se1 | se2 | sp1 | sp2 | dec1 | dec2 stacked along rows
    encdec_slab = jnp.concatenate([
        pad_rows(p["se1_w"].T),                              # [8, 64]
        p["se2_w"].T,                                        # [64, 64]
        pad_rows(p["sp1_w"].T),                              # [in_pad, 64]
        p["sp2_w"].T,                                        # [64, 64]
        p["dec1_w"].T,                                       # [960, 64]
        jnp.pad(p["dec2_w"].T, ((0, 0), (0, H - p["dec2_w"].shape[0]))),  # [64, 64]
    ], axis=0)

    rows = [p[n + "_b"] for n in ("se1", "se2", "sp1", "sp2",
                                  "conv1", "conv2", "conv3",
                                  "conv5", "conv6", "conv7", "conv8", "dec1")]
    rows.append(jnp.pad(p["dec2_b"], (0, H - p["dec2_b"].shape[0])))
    rows.append(p["ln_g"])
    rows.append(p["ln_b"])
    rows.append(jnp.zeros((H,), jnp.float32))                # pad to 16 sublanes
    return {"conv_slab": conv_slab, "encdec_slab": encdec_slab,
            "bias_pack": jnp.stack(rows, axis=0)}            # [16, 64]


def build_forward(in_channels):
    in_pad = ((in_channels + 7) // 8) * 8
    pad_c = in_pad - in_channels
    kernel = _make_kernel(in_pad)

    @jax.jit
    def forward(prep, x_raw, adj_x, u_raw, e_raw, adj_s):
        n = adj_x.shape[0]
        k = adj_s.shape[0]
        x0 = jnp.pad(x_raw[:, :in_channels], ((0, 0), (0, pad_c)))
        e = e_raw[:k]
        e = jnp.pad(e, ((0, 0), (0, E_PAD - e.shape[1])))
        u = u_raw[:, :k]
        # additive neighbour masks: 0 where edge j -> i exists, -1e30 otherwise
        mx = (adj_x - 1.0) * jnp.float32(1e30)
        ms = (adj_s - 1.0) * jnp.float32(1e30)
        # per-graph inputs packed into two DMAs (plus 3 weight/bias slabs = 5 total)
        node_pack = jnp.concatenate([x0, u, mx], axis=1)     # [n, in_pad + k + n]
        spec_pack = jnp.concatenate([e, u.T, ms], axis=1)    # [k, E_PAD + n + k]

        # Whole-array VMEM blocks: total footprint < 2 MiB -> fits every
        # generation (incl. v7x's 64 MiB) with no vmem_limit bump.
        # TODO(synk): for multi-graph workloads add a grid axis over graphs with
        # dimension_semantics=("parallel",) so v7x's second TensorCore does work
        # and the MXU M-dimension fills up (dominant throughput lever).
        out = pl.pallas_call(
            kernel,
            out_shape=jax.ShapeDtypeStruct((n, 64), jnp.float32),
            in_specs=[VMEM] * 5,
            out_specs=VMEM,
            scratch_shapes=[pltpu.VMEM((n, 960), jnp.float32),   # xcat slab
                            pltpu.VMEM((k, 640), jnp.float32)],  # scat slab
        )(node_pack, spec_pack, prep["bias_pack"],
          prep["conv_slab"], prep["encdec_slab"])
        return out[:, :32]                                   # drop lane padding

    return forward


# ---------------------------------------------------------------------------
# Pure-JAX reference (mirrors spec_ln.forward, inference mode) for a sanity check
# ---------------------------------------------------------------------------
def ref_forward(p, x_raw, adj_x, u_raw, e_raw, adj_s, in_channels):
    def leaky(h):
        return jnp.where(h >= 0, h, NEG_SLOPE * h)

    def ln(h):
        mean = h.mean(-1, keepdims=True)
        var = ((h - mean) ** 2).mean(-1, keepdims=True)
        return (h - mean) / jnp.sqrt(var + LN_EPS) * p["ln_g"] + p["ln_b"]

    def lin(x, name):
        return x @ p[name + "_w"].T + p[name + "_b"]

    def econv(x, adj, name):
        w, b = p[name + "_w"], p[name + "_b"]
        f = x.shape[1]
        ws, wd = w[:, :f], w[:, f:]
        y = x @ wd.T
        c = x @ (ws - wd).T + b
        agg = jnp.where(adj[:, :, None] > 0.5, y[None, :, :], jnp.float32(-1e30)).max(axis=1)
        return c + agg

    k = adj_s.shape[0]
    x0 = x_raw[:, :in_channels]
    u, e = u_raw[:, :k], e_raw[:k]
    cat = lambda ts: jnp.concatenate(ts, axis=1)

    s0 = ln(leaky(lin(ln(leaky(lin(e, "se1"))), "se2")))
    x0 = ln(leaky(lin(ln(leaky(lin(x0, "sp1"))), "sp2")))
    s1 = ln(leaky(econv(s0, adj_s, "conv1")))
    x1 = ln(leaky(econv(x0, adj_x, "conv5")))
    s1 = cat([s1, u.T @ x0])
    x1 = cat([x1, u @ s0])
    s2 = ln(leaky(econv(cat([s0, s1]), adj_s, "conv2")))
    x2 = ln(leaky(econv(cat([x0, x1]), adj_x, "conv6")))
    s2 = cat([s2, u.T @ x1])
    x2 = cat([x2, u @ s1])
    s3 = ln(leaky(econv(cat([s0, s1, s2]), adj_s, "conv3")))
    x3 = ln(leaky(econv(cat([x0, x1, x2]), adj_x, "conv7")))
    s3 = cat([s3, u.T @ x2])
    x3 = cat([x3, u @ s2])
    x4 = ln(leaky(econv(cat([x0, x1, x2, x3]), adj_x, "conv8")))
    x4 = cat([x4, u @ s3])
    x4 = cat([x0, x1, x2, x3, x4])
    out = ln(leaky(lin(x4, "dec1")))
    return lin(out, "dec2")


# ---------------------------------------------------------------------------
if __name__ == "__main__":
    key = jax.random.PRNGKey(0)
    N, K, in_channels = 16, 8, 4

    k_p, k_x, k_u, k_e = jax.random.split(key, 4)
    params = init_params(k_p, in_channels)
    prep = prepare_params(params)

    # data.x, data.u, data.e (extra cols/rows exercise the slicing in forward())
    x_raw = jax.random.normal(k_x, (N, 6), jnp.float32)
    u_raw = jax.random.normal(k_u, (N, K), jnp.float32)
    e_raw = jax.random.normal(k_e, (K + 2, 1), jnp.float32)

    # deterministic graphs; every node has >=1 incoming edge so max-aggregation is defined
    i = jnp.arange(N)
    edge_index = jnp.concatenate(
        [jnp.stack([i, (i + 1) % N]), jnp.stack([i, (i + 5) % N])], axis=1)   # [2, 2N]
    j = jnp.arange(K)
    spec_edge = jnp.concatenate(
        [jnp.stack([j, (j + 1) % K]), jnp.stack([j, (j + 3) % K])], axis=1)   # [2, 2K]

    # dense adjacency: adj[target, source] = 1
    adj_x = jnp.zeros((N, N), jnp.float32).at[edge_index[1], edge_index[0]].set(1.0)
    adj_s = jnp.zeros((K, K), jnp.float32).at[spec_edge[1], spec_edge[0]].set(1.0)

    forward = build_forward(in_channels)
    out = jax.block_until_ready(forward(prep, x_raw, adj_x, u_raw, e_raw, adj_s))

    ref = ref_forward(params, x_raw, adj_x, u_raw, e_raw, adj_s, in_channels)

    assert out.shape == (N, 32), out.shape
    assert bool(jnp.all(jnp.isfinite(out)))
    err = float(jnp.max(jnp.abs(out - ref)))
    assert bool(jnp.allclose(out, ref, rtol=5e-2, atol=5e-2)), err
    print("KERNEL_OK")
</pallas_src>

<mosaic_0001>
module attributes {stable_mosaic.version = 11 : i64} {
  func.func @kernel(%arg0: memref<16x32xf32, #tpu.memory_space<vmem>>, %arg1: memref<8x32xf32, #tpu.memory_space<vmem>>, %arg2: memref<16x64xf32, #tpu.memory_space<vmem>>, %arg3: memref<1920x128xf32, #tpu.memory_space<vmem>>, %arg4: memref<1168x64xf32, #tpu.memory_space<vmem>>, %arg5: memref<16x64xf32, #tpu.memory_space<vmem>>, %arg6: memref<16x960xf32, #tpu.memory_space<vmem>>, %arg7: memref<8x640xf32, #tpu.memory_space<vmem>>) attributes {dimension_semantics = [], scalar_prefetch = 0 : i64, scratch_operands = 2 : i64, tpu.core_type = #tpu.core_type<tc>} {
    %c0 = arith.constant 0 : index
    %c0_0 = arith.constant 0 : index
    %0 = vector.load %arg2[%c0, %c0_0] : memref<16x64xf32, #tpu.memory_space<vmem>>, vector<16x64xf32>
    %1 = vector.extract_strided_slice %0 {offsets = [13, 0], sizes = [1, 64], strides = [1, 1]} : vector<16x64xf32> to vector<1x64xf32>
    %2 = vector.shape_cast %1 : vector<1x64xf32> to vector<1x64xf32>
    %3 = vector.broadcast %2 : vector<1x64xf32> to vector<16x64xf32>
    %4 = vector.extract_strided_slice %0 {offsets = [13, 0], sizes = [1, 64], strides = [1, 1]} : vector<16x64xf32> to vector<1x64xf32>
    %5 = vector.shape_cast %4 : vector<1x64xf32> to vector<1x64xf32>
    %6 = vector.broadcast %5 : vector<1x64xf32> to vector<8x64xf32>
    %7 = vector.extract_strided_slice %0 {offsets = [14, 0], sizes = [1, 64], strides = [1, 1]} : vector<16x64xf32> to vector<1x64xf32>
    %8 = vector.shape_cast %7 : vector<1x64xf32> to vector<1x64xf32>
    %9 = vector.broadcast %8 : vector<1x64xf32> to vector<16x64xf32>
    %10 = vector.extract_strided_slice %0 {offsets = [14, 0], sizes = [1, 64], strides = [1, 1]} : vector<16x64xf32> to vector<1x64xf32>
    %11 = vector.shape_cast %10 : vector<1x64xf32> to vector<1x64xf32>
    %12 = vector.broadcast %11 : vector<1x64xf32> to vector<8x64xf32>
    %c0_1 = arith.constant 0 : index
    %c0_2 = arith.constant 0 : index
    %13 = vector.load %arg0[%c0_1, %c0_2] : memref<16x32xf32, #tpu.memory_space<vmem>>, vector<16x8xf32>
    %c0_3 = arith.constant 0 : index
    %c8 = arith.constant 8 : index
    %14 = vector.load %arg0[%c0_3, %c8] : memref<16x32xf32, #tpu.memory_space<vmem>>, vector<16x8xf32>
    %c0_4 = arith.constant 0 : index
    %c16 = arith.constant 16 : index
    %15 = vector.load %arg0[%c0_4, %c16] : memref<16x32xf32, #tpu.memory_space<vmem>>, vector<16x16xf32>
    %c0_5 = arith.constant 0 : index
    %c0_6 = arith.constant 0 : index
    %16 = vector.load %arg1[%c0_5, %c0_6] : memref<8x32xf32, #tpu.memory_space<vmem>>, vector<8x8xf32>
    %c0_7 = arith.constant 0 : index
    %c8_8 = arith.constant 8 : index
    %17 = vector.load %arg1[%c0_7, %c8_8] : memref<8x32xf32, #tpu.memory_space<vmem>>, vector<8x16xf32>
    %c0_9 = arith.constant 0 : index
    %c24 = arith.constant 24 : index
    %18 = vector.load %arg1[%c0_9, %c24] : memref<8x32xf32, #tpu.memory_space<vmem>>, vector<8x8xf32>
    %c0_10 = arith.constant 0 : index
    %c0_11 = arith.constant 0 : index
    %19 = vector.load %arg4[%c0_10, %c0_11] : memref<1168x64xf32, #tpu.memory_space<vmem>>, vector<8x64xf32>
    %cst = arith.constant dense<0.000000e+00> : vector<8x64xf32>
    %20 = tpu.matmul %16, %19, %cst {dimension_numbers = #tpu.dot_dimension_numbers<[1], [0], [0], [1], [0, 0, 1, 1], [], []>} : vector<8x8xf32>, vector<8x64xf32>, vector<8x64xf32> -> vector<8x64xf32>
    %21 = vector.extract_strided_slice %0 {offsets = [0, 0], sizes = [1, 64], strides = [1, 1]} : vector<16x64xf32> to vector<1x64xf32>
    %22 = vector.broadcast %21 : vector<1x64xf32> to vector<8x64xf32>
    %23 = arith.addf %20, %22 : vector<8x64xf32>
    %cst_12 = arith.constant 0.00999999977 : f32
    %24 = vector.broadcast %cst_12 : f32 to vector<8x64xf32>
    %25 = arith.mulf %24, %23 : vector<8x64xf32>
    %26 = arith.maximumf %23, %25 : vector<8x64xf32>
    %cst_13 = arith.constant dense<0.000000e+00> : vector<8xf32>
    %27 = vector.multi_reduction <add>, %26, %cst_13 [1] : vector<8x64xf32> to vector<8xf32>
    %28 = vector.shape_cast %27 : vector<8xf32> to vector<8x1xf32>
    %cst_14 = arith.constant 1.562500e-02 : f32
    %29 = vector.broadcast %cst_14 : f32 to vector<8x1xf32>
    %30 = arith.mulf %28, %29 : vector<8x1xf32>
    %31 = vector.broadcast %30 : vector<8x1xf32> to vector<8x64xf32>
    %32 = arith.subf %26, %31 : vector<8x64xf32>
    %33 = arith.mulf %32, %32 : vector<8x64xf32>
    %cst_15 = arith.constant dense<0.000000e+00> : vector<8xf32>
    %34 = vector.multi_reduction <add>, %33, %cst_15 [1] : vector<8x64xf32> to vector<8xf32>
    %35 = vector.shape_cast %34 : vector<8xf32> to vector<8x1xf32>
    %cst_16 = arith.constant 1.562500e-02 : f32
    %36 = vector.broadcast %cst_16 : f32 to vector<8x1xf32>
    %37 = arith.mulf %35, %36 : vector<8x1xf32>
    %cst_17 = arith.constant 9.99999974E-6 : f32
    %38 = vector.broadcast %cst_17 : f32 to vector<8x1xf32>
    %39 = arith.addf %37, %38 : vector<8x1xf32>
    %40 = math.rsqrt %39 : vector<8x1xf32>
    %41 = vector.broadcast %40 : vector<8x1xf32> to vector<8x64xf32>
    %42 = arith.mulf %32, %41 : vector<8x64xf32>
    %43 = arith.mulf %42, %6 : vector<8x64xf32>
    %44 = arith.addf %43, %12 : vector<8x64xf32>
    %c8_18 = arith.constant 8 : index
    %c0_19 = arith.constant 0 : index
    %45 = vector.load %arg4[%c8_18, %c0_19] : memref<1168x64xf32, #tpu.memory_space<vmem>>, vector<64x64xf32>
    %cst_20 = arith.constant dense<0.000000e+00> : vector<8x64xf32>
    %46 = tpu.matmul %44, %45, %cst_20 {dimension_numbers = #tpu.dot_dimension_numbers<[1], [0], [0], [1], [0, 0, 1, 1], [], []>} : vector<8x64xf32>, vector<64x64xf32>, vector<8x64xf32> -> vector<8x64xf32>
    %47 = vector.extract_strided_slice %0 {offsets = [1, 0], sizes = [1, 64], strides = [1, 1]} : vector<16x64xf32> to vector<1x64xf32>
    %48 = vector.broadcast %47 : vector<1x64xf32> to vector<8x64xf32>
    %49 = arith.addf %46, %48 : vector<8x64xf32>
    %cst_21 = arith.constant 0.00999999977 : f32
    %50 = vector.broadcast %cst_21 : f32 to vector<8x64xf32>
    %51 = arith.mulf %50, %49 : vector<8x64xf32>
    %52 = arith.maximumf %49, %51 : vector<8x64xf32>
    %cst_22 = arith.constant dense<0.000000e+00> : vector<8xf32>
    %53 = vector.multi_reduction <add>, %52, %cst_22 [1] : vector<8x64xf32> to vector<8xf32>
    %54 = vector.shape_cast %53 : vector<8xf32> to vector<8x1xf32>
    %cst_23 = arith.constant 1.562500e-02 : f32
    %55 = vector.broadcast %cst_23 : f32 to vector<8x1xf32>
    %56 = arith.mulf %54, %55 : vector<8x1xf32>
    %57 = vector.broadcast %56 : vector<8x1xf32> to vector<8x64xf32>
    %58 = arith.subf %52, %57 : vector<8x64xf32>
    %59 = arith.mulf %58, %58 : vector<8x64xf32>
    %cst_24 = arith.constant dense<0.000000e+00> : vector<8xf32>
    %60 = vector.multi_reduction <add>, %59, %cst_24 [1] : vector<8x64xf32> to vector<8xf32>
    %61 = vector.shape_cast %60 : vector<8xf32> to vector<8x1xf32>
    %cst_25 = arith.constant 1.562500e-02 : f32
    %62 = vector.broadcast %cst_25 : f32 to vector<8x1xf32>
    %63 = arith.mulf %61, %62 : vector<8x1xf32>
    %cst_26 = arith.constant 9.99999974E-6 : f32
    %64 = vector.broadcast %cst_26 : f32 to vector<8x1xf32>
    %65 = arith.addf %63, %64 : vector<8x1xf32>
    %66 = math.rsqrt %65 : vector<8x1xf32>
    %67 = vector.broadcast %66 : vector<8x1xf32> to vector<8x64xf32>
    %68 = arith.mulf %58, %67 : vector<8x64xf32>
    %69 = arith.mulf %68, %6 : vector<8x64xf32>
    %70 = arith.addf %69, %12 : vector<8x64xf32>
    %c72 = arith.constant 72 : index
    %c0_27 = arith.constant 0 : index
    %71 = vector.load %arg4[%c72, %c0_27] : memref<1168x64xf32, #tpu.memory_space<vmem>>, vector<8x64xf32>
    %cst_28 = arith.constant dense<0.000000e+00> : vector<16x64xf32>
    %72 = tpu.matmul %13, %71, %cst_28 {dimension_numbers = #tpu.dot_dimension_numbers<[1], [0], [0], [1], [0, 0, 1, 1], [], []>} : vector<16x8xf32>, vector<8x64xf32>, vector<16x64xf32> -> vector<16x64xf32>
    %73 = vector.extract_strided_slice %0 {offsets = [2, 0], sizes = [1, 64], strides = [1, 1]} : vector<16x64xf32> to vector<1x64xf32>
    %74 = vector.broadcast %73 : vector<1x64xf32> to vector<16x64xf32>
    %75 = arith.addf %72, %74 : vector<16x64xf32>
    %cst_29 = arith.constant 0.00999999977 : f32
    %76 = vector.broadcast %cst_29 : f32 to vector<16x64xf32>
    %77 = arith.mulf %76, %75 : vector<16x64xf32>
    %78 = arith.maximumf %75, %77 : vector<16x64xf32>
    %cst_30 = arith.constant dense<0.000000e+00> : vector<16xf32>
    %79 = vector.multi_reduction <add>, %78, %cst_30 [1] : vector<16x64xf32> to vector<16xf32>
    %80 = vector.shape_cast %79 : vector<16xf32> to vector<16x1xf32>
    %cst_31 = arith.constant 1.562500e-02 : f32
    %81 = vector.broadcast %cst_31 : f32 to vector<16x1xf32>
    %82 = arith.mulf %80, %81 : vector<16x1xf32>
    %83 = vector.broadcast %82 : vector<16x1xf32> to vector<16x64xf32>
    %84 = arith.subf %78, %83 : vector<16x64xf32>
    %85 = arith.mulf %84, %84 : vector<16x64xf32>
    %cst_32 = arith.constant dense<0.000000e+00> : vector<16xf32>
    %86 = vector.multi_reduction <add>, %85, %cst_32 [1] : vector<16x64xf32> to vector<16xf32>
    %87 = vector.shape_cast %86 : vector<16xf32> to vector<16x1xf32>
    %cst_33 = arith.constant 1.562500e-02 : f32
    %88 = vector.broadcast %cst_33 : f32 to vector<16x1xf32>
    %89 = arith.mulf %87, %88 : vector<16x1xf32>
    %cst_34 = arith.constant 9.99999974E-6 : f32
    %90 = vector.broadcast %cst_34 : f32 to vector<16x1xf32>
    %91 = arith.addf %89, %90 : vector<16x1xf32>
    %92 = math.rsqrt %91 : vector<16x1xf32>
    %93 = vector.broadcast %92 : vector<16x1xf32> to vector<16x64xf32>
    %94 = arith.mulf %84, %93 : vector<16x64xf32>
    %95 = arith.mulf %94, %3 : vector<16x64xf32>
    %96 = arith.addf %95, %9 : vector<16x64xf32>
    %c80 = arith.constant 80 : index
    %c0_35 = arith.constant 0 : index
    %97 = vector.load %arg4[%c80, %c0_35] : memref<1168x64xf32, #tpu.memory_space<vmem>>, vector<64x64xf32>
    %cst_36 = arith.constant dense<0.000000e+00> : vector<16x64xf32>
    %98 = tpu.matmul %96, %97, %cst_36 {dimension_numbers = #tpu.dot_dimension_numbers<[1], [0], [0], [1], [0, 0, 1, 1], [], []>} : vector<16x64xf32>, vector<64x64xf32>, vector<16x64xf32> -> vector<16x64xf32>
    %99 = vector.extract_strided_slice %0 {offsets = [3, 0], sizes = [1, 64], strides = [1, 1]} : vector<16x64xf32> to vector<1x64xf32>
    %100 = vector.broadcast %99 : vector<1x64xf32> to vector<16x64xf32>
    %101 = arith.addf %98, %100 : vector<16x64xf32>
    %cst_37 = arith.constant 0.00999999977 : f32
    %102 = vector.broadcast %cst_37 : f32 to vector<16x64xf32>
    %103 = arith.mulf %102, %101 : vector<16x64xf32>
    %104 = arith.maximumf %101, %103 : vector<16x64xf32>
    %cst_38 = arith.constant dense<0.000000e+00> : vector<16xf32>
    %105 = vector.multi_reduction <add>, %104, %cst_38 [1] : vector<16x64xf32> to vector<16xf32>
    %106 = vector.shape_cast %105 : vector<16xf32> to vector<16x1xf32>
    %cst_39 = arith.constant 1.562500e-02 : f32
    %107 = vector.broadcast %cst_39 : f32 to vector<16x1xf32>
    %108 = arith.mulf %106, %107 : vector<16x1xf32>
    %109 = vector.broadcast %108 : vector<16x1xf32> to vector<16x64xf32>
    %110 = arith.subf %104, %109 : vector<16x64xf32>
    %111 = arith.mulf %110, %110 : vector<16x64xf32>
    %cst_40 = arith.constant dense<0.000000e+00> : vector<16xf32>
    %112 = vector.multi_reduction <add>, %111, %cst_40 [1] : vector<16x64xf32> to vector<16xf32>
    %113 = vector.shape_cast %112 : vector<16xf32> to vector<16x1xf32>
    %cst_41 = arith.constant 1.562500e-02 : f32
    %114 = vector.broadcast %cst_41 : f32 to vector<16x1xf32>
    %115 = arith.mulf %113, %114 : vector<16x1xf32>
    %cst_42 = arith.constant 9.99999974E-6 : f32
    %116 = vector.broadcast %cst_42 : f32 to vector<16x1xf32>
    %117 = arith.addf %115, %116 : vector<16x1xf32>
    %118 = math.rsqrt %117 : vector<16x1xf32>
    %119 = vector.broadcast %118 : vector<16x1xf32> to vector<16x64xf32>
    %120 = arith.mulf %110, %119 : vector<16x64xf32>
    %121 = arith.mulf %120, %3 : vector<16x64xf32>
    %122 = arith.addf %121, %9 : vector<16x64xf32>
    %c0_43 = arith.constant 0 : index
    %c0_44 = arith.constant 0 : index
    %123 = vector.load %arg7[%c0_43, %c0_44] : memref<8x640xf32, #tpu.memory_space<vmem>>, vector<8x64xf32>
    tpu.vector_store %arg7[%c0_43, %c0_44], %70 {strides = array<i32>} : memref<8x640xf32, #tpu.memory_space<vmem>>, vector<8x64xf32>,
    %c0_45 = arith.constant 0 : index
    %c0_46 = arith.constant 0 : index
    %124 = vector.load %arg6[%c0_45, %c0_46] : memref<16x960xf32, #tpu.memory_space<vmem>>, vector<16x64xf32>
    tpu.vector_store %arg6[%c0_45, %c0_46], %122 {strides = array<i32>} : memref<16x960xf32, #tpu.memory_space<vmem>>, vector<16x64xf32>,
    %c0_47 = arith.constant 0 : index
    %c0_48 = arith.constant 0 : index
    %125 = vector.load %arg3[%c0_47, %c0_48] : memref<1920x128xf32, #tpu.memory_space<vmem>>, vector<64x128xf32>
    %cst_49 = arith.constant dense<0.000000e+00> : vector<8x128xf32>
    %126 = tpu.matmul %70, %125, %cst_49 {dimension_numbers = #tpu.dot_dimension_numbers<[1], [0], [0], [1], [0, 0, 1, 1], [], []>} : vector<8x64xf32>, vector<64x128xf32>, vector<8x128xf32> -> vector<8x128xf32>
    %127 = vector.extract_strided_slice %126 {offsets = [0, 0], sizes = [8, 64], strides = [1, 1]} : vector<8x128xf32> to vector<8x64xf32>
    %128 = vector.extract_strided_slice %126 {offsets = [0, 64], sizes = [8, 64], strides = [1, 1]} : vector<8x128xf32> to vector<8x64xf32>
    %129 = vector.extract_strided_slice %0 {offsets = [4, 0], sizes = [1, 64], strides = [1, 1]} : vector<16x64xf32> to vector<1x64xf32>
    %130 = vector.broadcast %129 : vector<1x64xf32> to vector<8x64xf32>
    %131 = arith.addf %128, %130 : vector<8x64xf32>
    %132 = vector.shape_cast %127 : vector<8x64xf32> to vector<1x8x64xf32>
    %133 = vector.shape_cast %18 : vector<8x8xf32> to vector<8x8x1xf32>
    %134 = vector.broadcast %132 : vector<1x8x64xf32> to vector<8x8x64xf32>
    %135 = vector.broadcast %133 : vector<8x8x1xf32> to vector<8x8x64xf32>
    %136 = arith.addf %134, %135 : vector<8x8x64xf32>
    %cst_50 = arith.constant dense<0xFF800000> : vector<8x64xf32>
    %137 = vector.multi_reduction <maximumf>, %136, %cst_50 [1] : vector<8x8x64xf32> to vector<8x64xf32>
    %138 = arith.addf %131, %137 : vector<8x64xf32>
    %cst_51 = arith.constant 0.00999999977 : f32
    %139 = vector.broadcast %cst_51 : f32 to vector<8x64xf32>
    %140 = arith.mulf %139, %138 : vector<8x64xf32>
    %141 = arith.maximumf %138, %140 : vector<8x64xf32>
    %cst_52 = arith.constant dense<0.000000e+00> : vector<8xf32>
    %142 = vector.multi_reduction <add>, %141, %cst_52 [1] : vector<8x64xf32> to vector<8xf32>
    %143 = vector.shape_cast %142 : vector<8xf32> to vector<8x1xf32>
    %cst_53 = arith.constant 1.562500e-02 : f32
    %144 = vector.broadcast %cst_53 : f32 to vector<8x1xf32>
    %145 = arith.mulf %143, %144 : vector<8x1xf32>
    %146 = vector.broadcast %145 : vector<8x1xf32> to vector<8x64xf32>
    %147 = arith.subf %141, %146 : vector<8x64xf32>
    %148 = arith.mulf %147, %147 : vector<8x64xf32>
    %cst_54 = arith.constant dense<0.000000e+00> : vector<8xf32>
    %149 = vector.multi_reduction <add>, %148, %cst_54 [1] : vector<8x64xf32> to vector<8xf32>
    %150 = vector.shape_cast %149 : vector<8xf32> to vector<8x1xf32>
    %cst_55 = arith.constant 1.562500e-02 : f32
    %151 = vector.broadcast %cst_55 : f32 to vector<8x1xf32>
    %152 = arith.mulf %150, %151 : vector<8x1xf32>
    %cst_56 = arith.constant 9.99999974E-6 : f32
    %153 = vector.broadcast %cst_56 : f32 to vector<8x1xf32>
    %154 = arith.addf %152, %153 : vector<8x1xf32>
    %155 = math.rsqrt %154 : vector<8x1xf32>
    %156 = vector.broadcast %155 : vector<8x1xf32> to vector<8x64xf32>
    %157 = arith.mulf %147, %156 : vector<8x64xf32>
    %158 = arith.mulf %157, %6 : vector<8x64xf32>
    %159 = arith.addf %158, %12 : vector<8x64xf32>
    %c0_57 = arith.constant 0 : index
    %c64 = arith.constant 64 : index
    %160 = vector.load %arg7[%c0_57, %c64] : memref<8x640xf32, #tpu.memory_space<vmem>>, vector<8x64xf32>
    tpu.vector_store %arg7[%c0_57, %c64], %159 {strides = array<i32>} : memref<8x640xf32, #tpu.memory_space<vmem>>, vector<8x64xf32>,
    %cst_58 = arith.constant dense<0.000000e+00> : vector<8x64xf32>
    %161 = tpu.matmul %17, %122, %cst_58 {dimension_numbers = #tpu.dot_dimension_numbers<[1], [0], [0], [1], [0, 0, 1, 1], [], []>} : vector<8x16xf32>, vector<16x64xf32>, vector<8x64xf32> -> vector<8x64xf32>
    %c0_59 = arith.constant 0 : index
    %c128 = arith.constant 128 : index
    %162 = vector.load %arg7[%c0_59, %c128] : memref<8x640xf32, #tpu.memory_space<vmem>>, vector<8x64xf32>
    tpu.vector_store %arg7[%c0_59, %c128], %161 {strides = array<i32>} : memref<8x640xf32, #tpu.memory_space<vmem>>, vector<8x64xf32>,
    %c640 = arith.constant 640 : index
    %c0_60 = arith.constant 0 : index
    %163 = vector.load %arg3[%c640, %c0_60] : memref<1920x128xf32, #tpu.memory_space<vmem>>, vector<64x128xf32>
    %cst_61 = arith.constant dense<0.000000e+00> : vector<16x128xf32>
    %164 = tpu.matmul %122, %163, %cst_61 {dimension_numbers = #tpu.dot_dimension_numbers<[1], [0], [0], [1], [0, 0, 1, 1], [], []>} : vector<16x64xf32>, vector<64x128xf32>, vector<16x128xf32> -> vector<16x128xf32>
    %165 = vector.extract_strided_slice %164 {offsets = [0, 0], sizes = [16, 64], strides = [1, 1]} : vector<16x128xf32> to vector<16x64xf32>
    %166 = vector.extract_strided_slice %164 {offsets = [0, 64], sizes = [16, 64], strides = [1, 1]} : vector<16x128xf32> to vector<16x64xf32>
    %167 = vector.extract_strided_slice %0 {offsets = [7, 0], sizes = [1, 64], strides = [1, 1]} : vector<16x64xf32> to vector<1x64xf32>
    %168 = vector.broadcast %167 : vector<1x64xf32> to vector<16x64xf32>
    %169 = arith.addf %166, %168 : vector<16x64xf32>
    %170 = vector.shape_cast %165 : vector<16x64xf32> to vector<1x16x64xf32>
    %171 = vector.shape_cast %15 : vector<16x16xf32> to vector<16x16x1xf32>
    %172 = vector.broadcast %170 : vector<1x16x64xf32> to vector<16x16x64xf32>
    %173 = vector.broadcast %171 : vector<16x16x1xf32> to vector<16x16x64xf32>
    %174 = arith.addf %172, %173 : vector<16x16x64xf32>
    %cst_62 = arith.constant dense<0xFF800000> : vector<16x64xf32>
    %175 = vector.multi_reduction <maximumf>, %174, %cst_62 [1] : vector<16x16x64xf32> to vector<16x64xf32>
    %176 = arith.addf %169, %175 : vector<16x64xf32>
    %cst_63 = arith.constant 0.00999999977 : f32
    %177 = vector.broadcast %cst_63 : f32 to vector<16x64xf32>
    %178 = arith.mulf %177, %176 : vector<16x64xf32>
    %179 = arith.maximumf %176, %178 : vector<16x64xf32>
    %cst_64 = arith.constant dense<0.000000e+00> : vector<16xf32>
    %180 = vector.multi_reduction <add>, %179, %cst_64 [1] : vector<16x64xf32> to vector<16xf32>
    %181 = vector.shape_cast %180 : vector<16xf32> to vector<16x1xf32>
    %cst_65 = arith.constant 1.562500e-02 : f32
    %182 = vector.broadcast %cst_65 : f32 to vector<16x1xf32>
    %183 = arith.mulf %181, %182 : vector<16x1xf32>
    %184 = vector.broadcast %183 : vector<16x1xf32> to vector<16x64xf32>
    %185 = arith.subf %179, %184 : vector<16x64xf32>
    %186 = arith.mulf %185, %185 : vector<16x64xf32>
    %cst_66 = arith.constant dense<0.000000e+00> : vector<16xf32>
    %187 = vector.multi_reduction <add>, %186, %cst_66 [1] : vector<16x64xf32> to vector<16xf32>
    %188 = vector.shape_cast %187 : vector<16xf32> to vector<16x1xf32>
    %cst_67 = arith.constant 1.562500e-02 : f32
    %189 = vector.broadcast %cst_67 : f32 to vector<16x1xf32>
    %190 = arith.mulf %188, %189 : vector<16x1xf32>
    %cst_68 = arith.constant 9.99999974E-6 : f32
    %191 = vector.broadcast %cst_68 : f32 to vector<16x1xf32>
    %192 = arith.addf %190, %191 : vector<16x1xf32>
    %193 = math.rsqrt %192 : vector<16x1xf32>
    %194 = vector.broadcast %193 : vector<16x1xf32> to vector<16x64xf32>
    %195 = arith.mulf %185, %194 : vector<16x64xf32>
    %196 = arith.mulf %195, %3 : vector<16x64xf32>
    %197 = arith.addf %196, %9 : vector<16x64xf32>
    %c0_69 = arith.constant 0 : index
    %c64_70 = arith.constant 64 : index
    %198 = vector.load %arg6[%c0_69, %c64_70] : memref<16x960xf32, #tpu.memory_space<vmem>>, vector<16x64xf32>
    tpu.vector_store %arg6[%c0_69, %c64_70], %197 {strides = array<i32>} : memref<16x960xf32, #tpu.memory_space<vmem>>, vector<16x64xf32>,
    %cst_71 = arith.constant dense<0.000000e+00> : vector<16x64xf32>
    %199 = tpu.matmul %14, %70, %cst_71 {dimension_numbers = #tpu.dot_dimension_numbers<[1], [0], [0], [1], [0, 0, 1, 1], [], []>} : vector<16x8xf32>, vector<8x64xf32>, vector<16x64xf32> -> vector<16x64xf32>
    %c0_72 = arith.constant 0 : index
    %c128_73 = arith.constant 128 : index
    %200 = vector.load %arg6[%c0_72, %c128_73] : memref<16x960xf32, #tpu.memory_space<vmem>>, vector<16x64xf32>
    tpu.vector_store %arg6[%c0_72, %c128_73], %199 {strides = array<i32>} : memref<16x960xf32, #tpu.memory_space<vmem>>, vector<16x64xf32>,
    %c0_74 = arith.constant 0 : index
    %c0_75 = arith.constant 0 : index
    %201 = vector.load %arg7[%c0_74, %c0_75] : memref<8x640xf32, #tpu.memory_space<vmem>>, vector<8x192xf32>
    %c64_76 = arith.constant 64 : index
    %c0_77 = arith.constant 0 : index
    %202 = vector.load %arg3[%c64_76, %c0_77] : memref<1920x128xf32, #tpu.memory_space<vmem>>, vector<192x128xf32>
    %cst_78 = arith.constant dense<0.000000e+00> : vector<8x128xf32>
    %203 = tpu.matmul %201, %202, %cst_78 {dimension_numbers = #tpu.dot_dimension_numbers<[1], [0], [0], [1], [0, 0, 1, 1], [], []>} : vector<8x192xf32>, vector<192x128xf32>, vector<8x128xf32> -> vector<8x128xf32>
    %204 = vector.extract_strided_slice %203 {offsets = [0, 0], sizes = [8, 64], strides = [1, 1]} : vector<8x128xf32> to vector<8x64xf32>
    %205 = vector.extract_strided_slice %203 {offsets = [0, 64], sizes = [8, 64], strides = [1, 1]} : vector<8x128xf32> to vector<8x64xf32>
    %206 = vector.extract_strided_slice %0 {offsets = [5, 0], sizes = [1, 64], strides = [1, 1]} : vector<16x64xf32> to vector<1x64xf32>
    %207 = vector.broadcast %206 : vector<1x64xf32> to vector<8x64xf32>
    %208 = arith.addf %205, %207 : vector<8x64xf32>
    %209 = vector.shape_cast %204 : vector<8x64xf32> to vector<1x8x64xf32>
    %210 = vector.shape_cast %18 : vector<8x8xf32> to vector<8x8x1xf32>
    %211 = vector.broadcast %209 : vector<1x8x64xf32> to vector<8x8x64xf32>
    %212 = vector.broadcast %210 : vector<8x8x1xf32> to vector<8x8x64xf32>
    %213 = arith.addf %211, %212 : vector<8x8x64xf32>
    %cst_79 = arith.constant dense<0xFF800000> : vector<8x64xf32>
    %214 = vector.multi_reduction <maximumf>, %213, %cst_79 [1] : vector<8x8x64xf32> to vector<8x64xf32>
    %215 = arith.addf %208, %214 : vector<8x64xf32>
    %cst_80 = arith.constant 0.00999999977 : f32
    %216 = vector.broadcast %cst_80 : f32 to vector<8x64xf32>
    %217 = arith.mulf %216, %215 : vector<8x64xf32>
    %218 = arith.maximumf %215, %217 : vector<8x64xf32>
    %cst_81 = arith.constant dense<0.000000e+00> : vector<8xf32>
    %219 = vector.multi_reduction <add>, %218, %cst_81 [1] : vector<8x64xf32> to vector<8xf32>
    %220 = vector.shape_cast %219 : vector<8xf32> to vector<8x1xf32>
    %cst_82 = arith.constant 1.562500e-02 : f32
    %221 = vector.broadcast %cst_82 : f32 to vector<8x1xf32>
    %222 = arith.mulf %220, %221 : vector<8x1xf32>
    %223 = vector.broadcast %222 : vector<8x1xf32> to vector<8x64xf32>
    %224 = arith.subf %218, %223 : vector<8x64xf32>
    %225 = arith.mulf %224, %224 : vector<8x64xf32>
    %cst_83 = arith.constant dense<0.000000e+00> : vector<8xf32>
    %226 = vector.multi_reduction <add>, %225, %cst_83 [1] : vector<8x64xf32> to vector<8xf32>
    %227 = vector.shape_cast %226 : vector<8xf32> to vector<8x1xf32>
    %cst_84 = arith.constant 1.562500e-02 : f32
    %228 = vector.broadcast %cst_84 : f32 to vector<8x1xf32>
    %229 = arith.mulf %227, %228 : vector<8x1xf32>
    %cst_85 = arith.constant 9.99999974E-6 : f32
    %230 = vector.broadcast %cst_85 : f32 to vector<8x1xf32>
    %231 = arith.addf %229, %230 : vector<8x1xf32>
    %232 = math.rsqrt %231 : vector<8x1xf32>
    %233 = vector.broadcast %232 : vector<8x1xf32> to vector<8x64xf32>
    %234 = arith.mulf %224, %233 : vector<8x64xf32>
    %235 = arith.mulf %234, %6 : vector<8x64xf32>
    %236 = arith.addf %235, %12 : vector<8x64xf32>
    %c0_86 = arith.constant 0 : index
    %c192 = arith.constant 192 : index
    %237 = vector.load %arg7[%c0_86, %c192] : memref<8x640xf32, #tpu.memory_space<vmem>>, vector<8x64xf32>
    tpu.vector_store %arg7[%c0_86, %c192], %236 {strides = array<i32>} : memref<8x640xf32, #tpu.memory_space<vmem>>, vector<8x64xf32>,
    %c0_87 = arith.constant 0 : index
    %c64_88 = arith.constant 64 : index
    %238 = vector.load %arg6[%c0_87, %c64_88] : memref<16x960xf32, #tpu.memory_space<vmem>>, vector<16x128xf32>
    %cst_89 = arith.constant dense<0.000000e+00> : vector<8x128xf32>
    %239 = tpu.matmul %17, %238, %cst_89 {dimension_numbers = #tpu.dot_dimension_numbers<[1], [0], [0], [1], [0, 0, 1, 1], [], []>} : vector<8x16xf32>, vector<16x128xf32>, vector<8x128xf32> -> vector<8x128xf32>
    %c0_90 = arith.constant 0 : index
    %c256 = arith.constant 256 : index
    %240 = vector.load %arg7[%c0_90, %c256] : memref<8x640xf32, #tpu.memory_space<vmem>>, vector<8x128xf32>
    tpu.vector_store %arg7[%c0_90, %c256], %239 {strides = array<i32>} : memref<8x640xf32, #tpu.memory_space<vmem>>, vector<8x128xf32>,
    %c0_91 = arith.constant 0 : index
    %c0_92 = arith.constant 0 : index
    %241 = vector.load %arg6[%c0_91, %c0_92] : memref<16x960xf32, #tpu.memory_space<vmem>>, vector<16x192xf32>
    %c704 = arith.constant 704 : index
    %c0_93 = arith.constant 0 : index
    %242 = vector.load %arg3[%c704, %c0_93] : memref<1920x128xf32, #tpu.memory_space<vmem>>, vector<192x128xf32>
    %cst_94 = arith.constant dense<0.000000e+00> : vector<16x128xf32>
    %243 = tpu.matmul %241, %242, %cst_94 {dimension_numbers = #tpu.dot_dimension_numbers<[1], [0], [0], [1], [0, 0, 1, 1], [], []>} : vector<16x192xf32>, vector<192x128xf32>, vector<16x128xf32> -> vector<16x128xf32>
    %244 = vector.extract_strided_slice %243 {offsets = [0, 0], sizes = [16, 64], strides = [1, 1]} : vector<16x128xf32> to vector<16x64xf32>
    %245 = vector.extract_strided_slice %243 {offsets = [0, 64], sizes = [16, 64], strides = [1, 1]} : vector<16x128xf32> to vector<16x64xf32>
    %246 = vector.extract_strided_slice %0 {offsets = [8, 0], sizes = [1, 64], strides = [1, 1]} : vector<16x64xf32> to vector<1x64xf32>
    %247 = vector.broadcast %246 : vector<1x64xf32> to vector<16x64xf32>
    %248 = arith.addf %245, %247 : vector<16x64xf32>
    %249 = vector.shape_cast %244 : vector<16x64xf32> to vector<1x16x64xf32>
    %250 = vector.shape_cast %15 : vector<16x16xf32> to vector<16x16x1xf32>
    %251 = vector.broadcast %249 : vector<1x16x64xf32> to vector<16x16x64xf32>
    %252 = vector.broadcast %250 : vector<16x16x1xf32> to vector<16x16x64xf32>
    %253 = arith.addf %251, %252 : vector<16x16x64xf32>
    %cst_95 = arith.constant dense<0xFF800000> : vector<16x64xf32>
    %254 = vector.multi_reduction <maximumf>, %253, %cst_95 [1] : vector<16x16x64xf32> to vector<16x64xf32>
    %255 = arith.addf %248, %254 : vector<16x64xf32>
    %cst_96 = arith.constant 0.00999999977 : f32
    %256 = vector.broadcast %cst_96 : f32 to vector<16x64xf32>
    %257 = arith.mulf %256, %255 : vector<16x64xf32>
    %258 = arith.maximumf %255, %257 : vector<16x64xf32>
    %cst_97 = arith.constant dense<0.000000e+00> : vector<16xf32>
    %259 = vector.multi_reduction <add>, %258, %cst_97 [1] : vector<16x64xf32> to vector<16xf32>
    %260 = vector.shape_cast %259 : vector<16xf32> to vector<16x1xf32>
    %cst_98 = arith.constant 1.562500e-02 : f32
    %261 = vector.broadcast %cst_98 : f32 to vector<16x1xf32>
    %262 = arith.mulf %260, %261 : vector<16x1xf32>
    %263 = vector.broadcast %262 : vector<16x1xf32> to vector<16x64xf32>
    %264 = arith.subf %258, %263 : vector<16x64xf32>
    %265 = arith.mulf %264, %264 : vector<16x64xf32>
    %cst_99 = arith.constant dense<0.000000e+00> : vector<16xf32>
    %266 = vector.multi_reduction <add>, %265, %cst_99 [1] : vector<16x64xf32> to vector<16xf32>
    %267 = vector.shape_cast %266 : vector<16xf32> to vector<16x1xf32>
    %cst_100 = arith.constant 1.562500e-02 : f32
    %268 = vector.broadcast %cst_100 : f32 to vector<16x1xf32>
    %269 = arith.mulf %267, %268 : vector<16x1xf32>
    %cst_101 = arith.constant 9.99999974E-6 : f32
    %270 = vector.broadcast %cst_101 : f32 to vector<16x1xf32>
    %271 = arith.addf %269, %270 : vector<16x1xf32>
    %272 = math.rsqrt %271 : vector<16x1xf32>
    %273 = vector.broadcast %272 : vector<16x1xf32> to vector<16x64xf32>
    %274 = arith.mulf %264, %273 : vector<16x64xf32>
    %275 = arith.mulf %274, %3 : vector<16x64xf32>
    %276 = arith.addf %275, %9 : vector<16x64xf32>
    %c0_102 = arith.constant 0 : index
    %c192_103 = arith.constant 192 : index
    %277 = vector.load %arg6[%c0_102, %c192_103] : memref<16x960xf32, #tpu.memory_space<vmem>>, vector<16x64xf32>
    tpu.vector_store %arg6[%c0_102, %c192_103], %276 {strides = array<i32>} : memref<16x960xf32, #tpu.memory_space<vmem>>, vector<16x64xf32>,
    %c0_104 = arith.constant 0 : index
    %c64_105 = arith.constant 64 : index
    %278 = vector.load %arg7[%c0_104, %c64_105] : memref<8x640xf32, #tpu.memory_space<vmem>>, vector<8x128xf32>
    %cst_106 = arith.constant dense<0.000000e+00> : vector<16x128xf32>
    %279 = tpu.matmul %14, %278, %cst_106 {dimension_numbers = #tpu.dot_dimension_numbers<[1], [0], [0], [1], [0, 0, 1, 1], [], []>} : vector<16x8xf32>, vector<8x128xf32>, vector<16x128xf32> -> vector<16x128xf32>
    %c0_107 = arith.constant 0 : index
    %c256_108 = arith.constant 256 : index
    %280 = vector.load %arg6[%c0_107, %c256_108] : memref<16x960xf32, #tpu.memory_space<vmem>>, vector<16x128xf32>
    tpu.vector_store %arg6[%c0_107, %c256_108], %279 {strides = array<i32>} : memref<16x960xf32, #tpu.memory_space<vmem>>, vector<16x128xf32>,
    %c0_109 = arith.constant 0 : index
    %c0_110 = arith.constant 0 : index
    %281 = vector.load %arg7[%c0_109, %c0_110] : memref<8x640xf32, #tpu.memory_space<vmem>>, vector<8x384xf32>
    %c256_111 = arith.constant 256 : index
    %c0_112 = arith.constant 0 : index
    %282 = vector.load %arg3[%c256_111, %c0_112] : memref<1920x128xf32, #tpu.memory_space<vmem>>, vector<384x128xf32>
    %cst_113 = arith.constant dense<0.000000e+00> : vector<8x128xf32>
    %283 = tpu.matmul %281, %282, %cst_113 {dimension_numbers = #tpu.dot_dimension_numbers<[1], [0], [0], [1], [0, 0, 1, 1], [], []>} : vector<8x384xf32>, vector<384x128xf32>, vector<8x128xf32> -> vector<8x128xf32>
    %284 = vector.extract_strided_slice %283 {offsets = [0, 0], sizes = [8, 64], strides = [1, 1]} : vector<8x128xf32> to vector<8x64xf32>
    %285 = vector.extract_strided_slice %283 {offsets = [0, 64], sizes = [8, 64], strides = [1, 1]} : vector<8x128xf32> to vector<8x64xf32>
    %286 = vector.extract_strided_slice %0 {offsets = [6, 0], sizes = [1, 64], strides = [1, 1]} : vector<16x64xf32> to vector<1x64xf32>
    %287 = vector.broadcast %286 : vector<1x64xf32> to vector<8x64xf32>
    %288 = arith.addf %285, %287 : vector<8x64xf32>
    %289 = vector.shape_cast %284 : vector<8x64xf32> to vector<1x8x64xf32>
    %290 = vector.shape_cast %18 : vector<8x8xf32> to vector<8x8x1xf32>
    %291 = vector.broadcast %289 : vector<1x8x64xf32> to vector<8x8x64xf32>
    %292 = vector.broadcast %290 : vector<8x8x1xf32> to vector<8x8x64xf32>
    %293 = arith.addf %291, %292 : vector<8x8x64xf32>
    %cst_114 = arith.constant dense<0xFF800000> : vector<8x64xf32>
    %294 = vector.multi_reduction <maximumf>, %293, %cst_114 [1] : vector<8x8x64xf32> to vector<8x64xf32>
    %295 = arith.addf %288, %294 : vector<8x64xf32>
    %cst_115 = arith.constant 0.00999999977 : f32
    %296 = vector.broadcast %cst_115 : f32 to vector<8x64xf32>
    %297 = arith.mulf %296, %295 : vector<8x64xf32>
    %298 = arith.maximumf %295, %297 : vector<8x64xf32>
    %cst_116 = arith.constant dense<0.000000e+00> : vector<8xf32>
    %299 = vector.multi_reduction <add>, %298, %cst_116 [1] : vector<8x64xf32> to vector<8xf32>
    %300 = vector.shape_cast %299 : vector<8xf32> to vector<8x1xf32>
    %cst_117 = arith.constant 1.562500e-02 : f32
    %301 = vector.broadcast %cst_117 : f32 to vector<8x1xf32>
    %302 = arith.mulf %300, %301 : vector<8x1xf32>
    %303 = vector.broadcast %302 : vector<8x1xf32> to vector<8x64xf32>
    %304 = arith.subf %298, %303 : vector<8x64xf32>
    %305 = arith.mulf %304, %304 : vector<8x64xf32>
    %cst_118 = arith.constant dense<0.000000e+00> : vector<8xf32>
    %306 = vector.multi_reduction <add>, %305, %cst_118 [1] : vector<8x64xf32> to vector<8xf32>
    %307 = vector.shape_cast %306 : vector<8xf32> to vector<8x1xf32>
    %cst_119 = arith.constant 1.562500e-02 : f32
    %308 = vector.broadcast %cst_119 : f32 to vector<8x1xf32>
    %309 = arith.mulf %307, %308 : vector<8x1xf32>
    %cst_120 = arith.constant 9.99999974E-6 : f32
    %310 = vector.broadcast %cst_120 : f32 to vector<8x1xf32>
    %311 = arith.addf %309, %310 : vector<8x1xf32>
    %312 = math.rsqrt %311 : vector<8x1xf32>
    %313 = vector.broadcast %312 : vector<8x1xf32> to vector<8x64xf32>
    %314 = arith.mulf %304, %313 : vector<8x64xf32>
    %315 = arith.mulf %314, %6 : vector<8x64xf32>
    %316 = arith.addf %315, %12 : vector<8x64xf32>
    %c0_121 = arith.constant 0 : index
    %c384 = arith.constant 384 : index
    %317 = vector.load %arg7[%c0_121, %c384] : memref<8x640xf32, #tpu.memory_space<vmem>>, vector<8x64xf32>
    tpu.vector_store %arg7[%c0_121, %c384], %316 {strides = array<i32>} : memref<8x640xf32, #tpu.memory_space<vmem>>, vector<8x64xf32>,
    %c0_122 = arith.constant 0 : index
    %c192_123 = arith.constant 192 : index
    %318 = vector.load %arg6[%c0_122, %c192_123] : memref<16x960xf32, #tpu.memory_space<vmem>>, vector<16x192xf32>
    %cst_124 = arith.constant dense<0.000000e+00> : vector<8x192xf32>
    %319 = tpu.matmul %17, %318, %cst_124 {dimension_numbers = #tpu.dot_dimension_numbers<[1], [0], [0], [1], [0, 0, 1, 1], [], []>} : vector<8x16xf32>, vector<16x192xf32>, vector<8x192xf32> -> vector<8x192xf32>
    %c0_125 = arith.constant 0 : index
    %c448 = arith.constant 448 : index
    %320 = vector.load %arg7[%c0_125, %c448] : memref<8x640xf32, #tpu.memory_space<vmem>>, vector<8x192xf32>
    tpu.vector_store %arg7[%c0_125, %c448], %319 {strides = array<i32>} : memref<8x640xf32, #tpu.memory_space<vmem>>, vector<8x192xf32>,
    %c0_126 = arith.constant 0 : index
    %c0_127 = arith.constant 0 : index
    %321 = vector.load %arg6[%c0_126, %c0_127] : memref<16x960xf32, #tpu.memory_space<vmem>>, vector<16x384xf32>
    %c896 = arith.constant 896 : index
    %c0_128 = arith.constant 0 : index
    %322 = vector.load %arg3[%c896, %c0_128] : memref<1920x128xf32, #tpu.memory_space<vmem>>, vector<384x128xf32>
    %cst_129 = arith.constant dense<0.000000e+00> : vector<16x128xf32>
    %323 = tpu.matmul %321, %322, %cst_129 {dimension_numbers = #tpu.dot_dimension_numbers<[1], [0], [0], [1], [0, 0, 1, 1], [], []>} : vector<16x384xf32>, vector<384x128xf32>, vector<16x128xf32> -> vector<16x128xf32>
    %324 = vector.extract_strided_slice %323 {offsets = [0, 0], sizes = [16, 64], strides = [1, 1]} : vector<16x128xf32> to vector<16x64xf32>
    %325 = vector.extract_strided_slice %323 {offsets = [0, 64], sizes = [16, 64], strides = [1, 1]} : vector<16x128xf32> to vector<16x64xf32>
    %326 = vector.extract_strided_slice %0 {offsets = [9, 0], sizes = [1, 64], strides = [1, 1]} : vector<16x64xf32> to vector<1x64xf32>
    %327 = vector.broadcast %326 : vector<1x64xf32> to vector<16x64xf32>
    %328 = arith.addf %325, %327 : vector<16x64xf32>
    %329 = vector.shape_cast %324 : vector<16x64xf32> to vector<1x16x64xf32>
    %330 = vector.shape_cast %15 : vector<16x16xf32> to vector<16x16x1xf32>
    %331 = vector.broadcast %329 : vector<1x16x64xf32> to vector<16x16x64xf32>
    %332 = vector.broadcast %330 : vector<16x16x1xf32> to vector<16x16x64xf32>
    %333 = arith.addf %331, %332 : vector<16x16x64xf32>
    %cst_130 = arith.constant dense<0xFF800000> : vector<16x64xf32>
    %334 = vector.multi_reduction <maximumf>, %333, %cst_130 [1] : vector<16x16x64xf32> to vector<16x64xf32>
    %335 = arith.addf %328, %334 : vector<16x64xf32>
    %cst_131 = arith.constant 0.00999999977 : f32
    %336 = vector.broadcast %cst_131 : f32 to vector<16x64xf32>
    %337 = arith.mulf %336, %335 : vector<16x64xf32>
    %338 = arith.maximumf %335, %337 : vector<16x64xf32>
    %cst_132 = arith.constant dense<0.000000e+00> : vector<16xf32>
    %339 = vector.multi_reduction <add>, %338, %cst_132 [1] : vector<16x64xf32> to vector<16xf32>
    %340 = vector.shape_cast %339 : vector<16xf32> to vector<16x1xf32>
    %cst_133 = arith.constant 1.562500e-02 : f32
    %341 = vector.broadcast %cst_133 : f32 to vector<16x1xf32>
    %342 = arith.mulf %340, %341 : vector<16x1xf32>
    %343 = vector.broadcast %342 : vector<16x1xf32> to vector<16x64xf32>
    %344 = arith.subf %338, %343 : vector<16x64xf32>
    %345 = arith.mulf %344, %344 : vector<16x64xf32>
    %cst_134 = arith.constant dense<0.000000e+00> : vector<16xf32>
    %346 = vector.multi_reduction <add>, %345, %cst_134 [1] : vector<16x64xf32> to vector<16xf32>
    %347 = vector.shape_cast %346 : vector<16xf32> to vector<16x1xf32>
    %cst_135 = arith.constant 1.562500e-02 : f32
    %348 = vector.broadcast %cst_135 : f32 to vector<16x1xf32>
    %349 = arith.mulf %347, %348 : vector<16x1xf32>
    %cst_136 = arith.constant 9.99999974E-6 : f32
    %350 = vector.broadcast %cst_136 : f32 to vector<16x1xf32>
    %351 = arith.addf %349, %350 : vector<16x1xf32>
    %352 = math.rsqrt %351 : vector<16x1xf32>
    %353 = vector.broadcast %352 : vector<16x1xf32> to vector<16x64xf32>
    %354 = arith.mulf %344, %353 : vector<16x64xf32>
    %355 = arith.mulf %354, %3 : vector<16x64xf32>
    %356 = arith.addf %355, %9 : vector<16x64xf32>
    %c0_137 = arith.constant 0 : index
    %c384_138 = arith.constant 384 : index
    %357 = vector.load %arg6[%c0_137, %c384_138] : memref<16x960xf32, #tpu.memory_space<vmem>>, vector<16x64xf32>
    tpu.vector_store %arg6[%c0_137, %c384_138], %356 {strides = array<i32>} : memref<16x960xf32, #tpu.memory_space<vmem>>, vector<16x64xf32>,
    %c0_139 = arith.constant 0 : index
    %c192_140 = arith.constant 192 : index
    %358 = vector.load %arg7[%c0_139, %c192_140] : memref<8x640xf32, #tpu.memory_space<vmem>>, vector<8x192xf32>
    %cst_141 = arith.constant dense<0.000000e+00> : vector<16x192xf32>
    %359 = tpu.matmul %14, %358, %cst_141 {dimension_numbers = #tpu.dot_dimension_numbers<[1], [0], [0], [1], [0, 0, 1, 1], [], []>} : vector<16x8xf32>, vector<8x192xf32>, vector<16x192xf32> -> vector<16x192xf32>
    %c0_142 = arith.constant 0 : index
    %c448_143 = arith.constant 448 : index
    %360 = vector.load %arg6[%c0_142, %c448_143] : memref<16x960xf32, #tpu.memory_space<vmem>>, vector<16x192xf32>
    tpu.vector_store %arg6[%c0_142, %c448_143], %359 {strides = array<i32>} : memref<16x960xf32, #tpu.memory_space<vmem>>, vector<16x192xf32>,
    %c0_144 = arith.constant 0 : index
    %c0_145 = arith.constant 0 : index
    %361 = vector.load %arg6[%c0_144, %c0_145] : memref<16x960xf32, #tpu.memory_space<vmem>>, vector<16x640xf32>
    %c1280 = arith.constant 1280 : index
    %c0_146 = arith.constant 0 : index
    %362 = vector.load %arg3[%c1280, %c0_146] : memref<1920x128xf32, #tpu.memory_space<vmem>>, vector<640x128xf32>
    %cst_147 = arith.constant dense<0.000000e+00> : vector<16x128xf32>
    %363 = tpu.matmul %361, %362, %cst_147 {dimension_numbers = #tpu.dot_dimension_numbers<[1], [0], [0], [1], [0, 0, 1, 1], [], []>} : vector<16x640xf32>, vector<640x128xf32>, vector<16x128xf32> -> vector<16x128xf32>
    %364 = vector.extract_strided_slice %363 {offsets = [0, 0], sizes = [16, 64], strides = [1, 1]} : vector<16x128xf32> to vector<16x64xf32>
    %365 = vector.extract_strided_slice %363 {offsets = [0, 64], sizes = [16, 64], strides = [1, 1]} : vector<16x128xf32> to vector<16x64xf32>
    %366 = vector.extract_strided_slice %0 {offsets = [10, 0], sizes = [1, 64], strides = [1, 1]} : vector<16x64xf32> to vector<1x64xf32>
    %367 = vector.broadcast %366 : vector<1x64xf32> to vector<16x64xf32>
    %368 = arith.addf %365, %367 : vector<16x64xf32>
    %369 = vector.shape_cast %364 : vector<16x64xf32> to vector<1x16x64xf32>
    %370 = vector.shape_cast %15 : vector<16x16xf32> to vector<16x16x1xf32>
    %371 = vector.broadcast %369 : vector<1x16x64xf32> to vector<16x16x64xf32>
    %372 = vector.broadcast %370 : vector<16x16x1xf32> to vector<16x16x64xf32>
    %373 = arith.addf %371, %372 : vector<16x16x64xf32>
    %cst_148 = arith.constant dense<0xFF800000> : vector<16x64xf32>
    %374 = vector.multi_reduction <maximumf>, %373, %cst_148 [1] : vector<16x16x64xf32> to vector<16x64xf32>
    %375 = arith.addf %368, %374 : vector<16x64xf32>
    %cst_149 = arith.constant 0.00999999977 : f32
    %376 = vector.broadcast %cst_149 : f32 to vector<16x64xf32>
    %377 = arith.mulf %376, %375 : vector<16x64xf32>
    %378 = arith.maximumf %375, %377 : vector<16x64xf32>
    %cst_150 = arith.constant dense<0.000000e+00> : vector<16xf32>
    %379 = vector.multi_reduction <add>, %378, %cst_150 [1] : vector<16x64xf32> to vector<16xf32>
    %380 = vector.shape_cast %379 : vector<16xf32> to vector<16x1xf32>
    %cst_151 = arith.constant 1.562500e-02 : f32
    %381 = vector.broadcast %cst_151 : f32 to vector<16x1xf32>
    %382 = arith.mulf %380, %381 : vector<16x1xf32>
    %383 = vector.broadcast %382 : vector<16x1xf32> to vector<16x64xf32>
    %384 = arith.subf %378, %383 : vector<16x64xf32>
    %385 = arith.mulf %384, %384 : vector<16x64xf32>
    %cst_152 = arith.constant dense<0.000000e+00> : vector<16xf32>
    %386 = vector.multi_reduction <add>, %385, %cst_152 [1] : vector<16x64xf32> to vector<16xf32>
    %387 = vector.shape_cast %386 : vector<16xf32> to vector<16x1xf32>
    %cst_153 = arith.constant 1.562500e-02 : f32
    %388 = vector.broadcast %cst_153 : f32 to vector<16x1xf32>
    %389 = arith.mulf %387, %388 : vector<16x1xf32>
    %cst_154 = arith.constant 9.99999974E-6 : f32
    %390 = vector.broadcast %cst_154 : f32 to vector<16x1xf32>
    %391 = arith.addf %389, %390 : vector<16x1xf32>
    %392 = math.rsqrt %391 : vector<16x1xf32>
    %393 = vector.broadcast %392 : vector<16x1xf32> to vector<16x64xf32>
    %394 = arith.mulf %384, %393 : vector<16x64xf32>
    %395 = arith.mulf %394, %3 : vector<16x64xf32>
    %396 = arith.addf %395, %9 : vector<16x64xf32>
    %c0_155 = arith.constant 0 : index
    %c640_156 = arith.constant 640 : index
    %397 = vector.load %arg6[%c0_155, %c640_156] : memref<16x960xf32, #tpu.memory_space<vmem>>, vector<16x64xf32>
    tpu.vector_store %arg6[%c0_155, %c640_156], %396 {strides = array<i32>} : memref<16x960xf32, #tpu.memory_space<vmem>>, vector<16x64xf32>,
    %c0_157 = arith.constant 0 : index
    %c384_158 = arith.constant 384 : index
    %398 = vector.load %arg7[%c0_157, %c384_158] : memref<8x640xf32, #tpu.memory_space<vmem>>, vector<8x256xf32>
    %cst_159 = arith.constant dense<0.000000e+00> : vector<16x256xf32>
    %399 = tpu.matmul %14, %398, %cst_159 {dimension_numbers = #tpu.dot_dimension_numbers<[1], [0], [0], [1], [0, 0, 1, 1], [], []>} : vector<16x8xf32>, vector<8x256xf32>, vector<16x256xf32> -> vector<16x256xf32>
    %c0_160 = arith.constant 0 : index
    %c704_161 = arith.constant 704 : index
    %400 = vector.load %arg6[%c0_160, %c704_161] : memref<16x960xf32, #tpu.memory_space<vmem>>, vector<16x256xf32>
    tpu.vector_store %arg6[%c0_160, %c704_161], %399 {strides = array<i32>} : memref<16x960xf32, #tpu.memory_space<vmem>>, vector<16x256xf32>,
    %c0_162 = arith.constant 0 : index
    %c0_163 = arith.constant 0 : index
    %401 = vector.load %arg6[%c0_162, %c0_163] : memref<16x960xf32, #tpu.memory_space<vmem>>, vector<16x960xf32>
    %c144 = arith.constant 144 : index
    %c0_164 = arith.constant 0 : index
    %402 = vector.load %arg4[%c144, %c0_164] : memref<1168x64xf32, #tpu.memory_space<vmem>>, vector<960x64xf32>
    %cst_165 = arith.constant dense<0.000000e+00> : vector<16x64xf32>
    %403 = tpu.matmul %401, %402, %cst_165 {dimension_numbers = #tpu.dot_dimension_numbers<[1], [0], [0], [1], [0, 0, 1, 1], [], []>} : vector<16x960xf32>, vector<960x64xf32>, vector<16x64xf32> -> vector<16x64xf32>
    %404 = vector.extract_strided_slice %0 {offsets = [11, 0], sizes = [1, 64], strides = [1, 1]} : vector<16x64xf32> to vector<1x64xf32>
    %405 = vector.broadcast %404 : vector<1x64xf32> to vector<16x64xf32>
    %406 = arith.addf %403, %405 : vector<16x64xf32>
    %cst_166 = arith.constant 0.00999999977 : f32
    %407 = vector.broadcast %cst_166 : f32 to vector<16x64xf32>
    %408 = arith.mulf %407, %406 : vector<16x64xf32>
    %409 = arith.maximumf %406, %408 : vector<16x64xf32>
    %cst_167 = arith.constant dense<0.000000e+00> : vector<16xf32>
    %410 = vector.multi_reduction <add>, %409, %cst_167 [1] : vector<16x64xf32> to vector<16xf32>
    %411 = vector.shape_cast %410 : vector<16xf32> to vector<16x1xf32>
    %cst_168 = arith.constant 1.562500e-02 : f32
    %412 = vector.broadcast %cst_168 : f32 to vector<16x1xf32>
    %413 = arith.mulf %411, %412 : vector<16x1xf32>
    %414 = vector.broadcast %413 : vector<16x1xf32> to vector<16x64xf32>
    %415 = arith.subf %409, %414 : vector<16x64xf32>
    %416 = arith.mulf %415, %415 : vector<16x64xf32>
    %cst_169 = arith.constant dense<0.000000e+00> : vector<16xf32>
    %417 = vector.multi_reduction <add>, %416, %cst_169 [1] : vector<16x64xf32> to vector<16xf32>
    %418 = vector.shape_cast %417 : vector<16xf32> to vector<16x1xf32>
    %cst_170 = arith.constant 1.562500e-02 : f32
    %419 = vector.broadcast %cst_170 : f32 to vector<16x1xf32>
    %420 = arith.mulf %418, %419 : vector<16x1xf32>
    %cst_171 = arith.constant 9.99999974E-6 : f32
    %421 = vector.broadcast %cst_171 : f32 to vector<16x1xf32>
    %422 = arith.addf %420, %421 : vector<16x1xf32>
    %423 = math.rsqrt %422 : vector<16x1xf32>
    %424 = vector.broadcast %423 : vector<16x1xf32> to vector<16x64xf32>
    %425 = arith.mulf %415, %424 : vector<16x64xf32>
    %426 = arith.mulf %425, %3 : vector<16x64xf32>
    %427 = arith.addf %426, %9 : vector<16x64xf32>
    %c1104 = arith.constant 1104 : index
    %c0_172 = arith.constant 0 : index
    %428 = vector.load %arg4[%c1104, %c0_172] : memref<1168x64xf32, #tpu.memory_space<vmem>>, vector<64x64xf32>
    %cst_173 = arith.constant dense<0.000000e+00> : vector<16x64xf32>
    %429 = tpu.matmul %427, %428, %cst_173 {dimension_numbers = #tpu.dot_dimension_numbers<[1], [0], [0], [1], [0, 0, 1, 1], [], []>} : vector<16x64xf32>, vector<64x64xf32>, vector<16x64xf32> -> vector<16x64xf32>
    %430 = vector.extract_strided_slice %0 {offsets = [12, 0], sizes = [1, 64], strides = [1, 1]} : vector<16x64xf32> to vector<1x64xf32>
    %431 = vector.broadcast %430 : vector<1x64xf32> to vector<16x64xf32>
    %432 = arith.addf %429, %431 : vector<16x64xf32>
    %c0_174 = arith.constant 0 : index
    %c0_175 = arith.constant 0 : index
    %433 = vector.load %arg5[%c0_174, %c0_175] : memref<16x64xf32, #tpu.memory_space<vmem>>, vector<16x64xf32>
    tpu.vector_store %arg5[%c0_174, %c0_175], %432 {strides = array<i32>} : memref<16x64xf32, #tpu.memory_space<vmem>>, vector<16x64xf32>,
    return
  }
}

</mosaic_0001>

<bundles_post_ra>
// kernel: forward.1
= control target key start
LH: loop header
LB: loop body
LE: loop exit
PB: predicated region body
PF: predicated region fallthrough
CT: control target
= control target key end

     0   :  { %vm39_vm0 = vcmask 64512   ;;  %v8305_v2 = vmov 0.0   ;;  %vm5811_vm1 = vmmov 0   ;;  %s8299_s0 = inlined_call_operand.vmem [shape: f32[16,32], index: 0, kind: input, shape index: {}]   ;;  %s8300_s1 = inlined_call_operand.vmem [shape: f32[8,32], index: 1, kind: input, shape index: {}]   ;;  %s8301_s2 = inlined_call_operand.vmem [shape: f32[16,64], index: 2, kind: input, shape index: {}]   ;;  %s8302_s3 = inlined_call_operand.vmem [shape: f32[1920,128], index: 3, kind: input, shape index: {}]   ;;  %s8303_s4 = inlined_call_operand.vmem [shape: f32[1168,64], index: 4, kind: input, shape index: {}]   ;;  %s8304_s5 = inlined_call_operand.hbm [shape: f32[16,64], index: 5, kind: output, shape index: {}]  }
   0x1   :  { %v34_v0 = vld [vmem:[%s8303_s4] sm:$0xff]  ;;  %4978 = vmatprep.subr.mxu0 %v8305_v2  ;;  %4980 = vmatprep.mubr.msk.f32.mxu0 %vm5811_vm1, %v8305_v2 }
   0x2   :  { %v5854_v1 = vld [vmem:[%s8300_s1] sm:$0xff] }
   0x3   :  { %10 = vsyncpa [#allocation5], 0  ;;  %4979 = vmatpush3.msra.mxu0 %v34_v0  ;;  %5042 = vmatprep.mubr.msk.f32.mxu1 %vm5811_vm1, %v8305_v2  ;;  %v23_v3 = vlaneseq  ;;  %v5873_v6 = vld [vmem:[%s8301_s2] sm:$0xff]  ;;  %vm115_vm2 = vcmask 523264   ;;  %v131_v19 = vld [vmem:[%s8303_s4 + $0x8] sm:$0xff]  ;;  %v8307_v22 = vmov 0.0|0.0  }
   0x4   :  { %4981 = vmatmul.mubr.msk.f32.vlgmr.msra.gmra.mrb[0].mxu0 %vm39_vm0, %v5854_v1  ;;  %v132_v20 = vld [vmem:[%s8303_s4 + $0x10] sm:$0xff]  ;;  %5212 = vmatprep.subr.bf16.mxu0 %v8307_v22  ;;  %v133_v23 = vld [vmem:[%s8303_s4 + $0x18] sm:$0xff]  ;;  %v134_v24 = vld [vmem:[%s8303_s4 + $0x20] sm:$0xff]  ;;  %s5813_s27 = smov 120   ;;  %s5814_s28 = smov 64   ;;  %vm709_vm3 = vcmask 1041409  }
   0x5   :  { %4999 = vmatprep.mubr.msk.f32.mxu0 %vm5811_vm1, %v8305_v2  ;;  %v5865_v4 = vshrl.u32 %v23_v3, 7  ;;  %v5213_v21 = vpack.c.bf16 %v132_v20, %v131_v19  ;;  %5240 = vmatprep.subr.bf16.mxu1 %v8307_v22  ;;  %v5216_v25 = vpack.c.bf16 %v134_v24, %v133_v23  ;;  %v135_v26 = vld [vmem:[%s8303_s4 + $0x28] sm:$0xff]  ;;  %v136_v27 = vld [vmem:[%s8303_s4 + $0x30] sm:$0xff]  ;;  %v137_v29 = vld [vmem:[%s8303_s4 + $0x38] sm:$0xff]  ;;  %vm711_vm4 = vcmask 1042434   ;;  %s5815_s1 = smov [#allocation4]  }
   0x6   :  { %v5219_v28 = vpack.c.bf16 %v136_v27, %v135_v26  ;;  %v138_v30 = vld [vmem:[%s8303_s4 + $0x40] sm:$0xff]  ;;  %v233_v32 = vld [vmem:[%s8303_s4 + $0x48] sm:$0xff]  ;;  %v354_v19 = vld [vmem:[%s8303_s4 + $0x58] sm:$0xff]  ;;  %vm764_vm5 = vcmask 130048   ;;  %vm713_vm6 = vcmask 1043459   ;;  %vm715_vm7 = vcmask 1044484  }
   0x7   :  { %v5868_v5 = vsub.s32 0, %v5865_v4  ;;  %5214 = vmatpush3.bf16.msra.mxu0 %v5213_v21  ;;  %v5222_v31 = vpack.c.bf16 %v138_v30, %v137_v29  ;;  %v5912_v36 = vsub.s32 5, %v5865_v4  ;;  %v22_v37 = vld [vmem:[%s8301_s2 + $0x8] sm:$0xff]  ;;  %v5918_v38 = vsub.s32 6, %v5865_v4  ;;  %v5931_v45 = vld [vmem:[%s8299_s0] sm:$0xff]  ;;  %v358_v26 = vld [vmem:[%s8303_s4 + $0x78] sm:$0xff] }
   0x8   :  { %5215 = vmatprep.subr.bf16.mxu0 %v8307_v22  ;;  %v5939_v46 = vld [vmem:[%s8299_s0 + $0x8] sm:$0xff]  ;;  %v5944_v47 = vsub.s32 2, %v5865_v4  ;;  %v5951_v61 = vsub.s32 1, %v5865_v4  ;;  %v355_v21 = vld [vmem:[%s8303_s4 + $0x60] sm:$0xff]  ;;  %vm717_vm8 = vcmask 1045509   ;;  %vm719_vm9 = vcmask 1046534  }
   0x9   :  { %v38_v7 = vrot.slane %v5873_v6, %v5868_v5  ;;  %8354 = vst [vmem:[#allocation7_spill] sm:$0xff] %v5918_v38  ;;  %v5921_v39 = vrot.slane %v22_v37, %v5912_v36  ;;  %v5924_v42 = vrot.slane %v22_v37, %v5918_v38  ;;  %v356_v23 = vld [vmem:[%s8303_s4 + $0x68] sm:$0xff]  ;;  %vm721_vm10 = vcmask 1047559   ;;  %s4559_s22 = sshll.u32 %s5815_s1, 4  ;;  %s4560_s22 = int_to_ptr.vmem [resolvable:$true] %s4559_s22 }
   0xa   :  { %8357 = vst [vmem:[#allocation10_spill] sm:$0xff] %v5944_v47  ;;  %v237_v50 = vrot.slane %v5873_v6, %v5944_v47  ;;  %8358 = vst [vmem:[#allocation11_spill] sm:$0xff] %v5951_v61  ;;  %v142_v62 = vrot.slane %v5873_v6, %v5951_v61  ;;  %v5228_v24 = vpack.c.bf16 %v356_v23, %v355_v21  ;;  %v360_v29 = vld [vmem:[%s8303_s4 + $0x88] sm:$0xff]  ;;  %vm760_vm11 = vcmask 1048064   ;;  %s5786_s23 = scalar_lea.vmem %s4560_s22, 256  ;;  %p5791_p1 = scmp.lt.s32.totalorder %s4560_s22, %s4560_s22 }
   0xb   :  { %5217 = vmatpush3.bf16.msra.mxu0 %v5216_v25  ;;  %8355 = vst [vmem:[#allocation8_spill] sm:$0xff] %v5921_v39  ;;  %8356 = vst [vmem:[#allocation9_spill] sm:$0xff] %v5924_v42  ;;  %v357_v25 = vld [vmem:[%s8303_s4 + $0x70] sm:$0xff]  ;;  %p5787_p0 = scmp.ne.s32.totalorder %s4560_s22, %s5786_s23  ;;  %p5792_p2 = scmp.lt.s32.totalorder %s5786_s23, %s5786_s23 }
   0xc   :  { %5218 = vmatprep.subr.bf16.mxu0 %v8307_v22  ;;  %v5232_v27 = vpack.c.bf16 %v358_v26, %v357_v25 }
   0xd   :  { %p5793_p3 = por %p5792_p2, %p5791_p1 }
   0xf   :  { %5220 = vmatpush3.bf16.msra.mxu0 %v5219_v28  ;;  %v359_v28 = vld [vmem:[%s8303_s4 + $0x80] sm:$0xff]  ;;  %p5794_p4 = pnand %p5793_p3, %p5787_p0 }
  0x10   :  { %5221 = vmatprep.subr.bf16.mxu0 %v8307_v22  ;;  %v5236_v30 = vpack.c.bf16 %v360_v29, %v359_v28 }
  0x13   :  { %5223 = vmatpush3.bf16.msra.mxu0 %v5222_v31 }
  0x14   :  { %5002 = vmatprep.subr.mxu0 %v233_v32 }
  0xd7   :  { %v109_v8 = vpop.f32.mrb[0].mxu0 }
  0xd8   :  { %v110_v9 = vadd.f32 %v109_v8, %v38_v7  ;;  %v4982_v10 = vpop.f32.mrb[1].mxu0 }
  0xda   :  { %v113_v11 = vmul.f32 0.01, %v110_v9 }
  0xdc   :  { %v114_v12 = vmax.f32 %v110_v9, %v113_v11 }
  0xde   :  { %v116_v13 = vsel %vm115_vm2, %v114_v12, 0.0 }
  0xdf   :  { %117 = vadd.xlane.f32.xlu0 %v116_v13 }
 0x16c   :  { %v118_v14 = vpop.xlane.xlu0 %117 }
 0x16d   :  { %v119_v15 = vmul.f32 0.015625, %v118_v14 }
 0x16f   :  { %v120_v16 = vsub.f32 %v114_v12, %v119_v15 }
 0x171   :  { %v121_v17 = vmul.f32 %v120_v16, %v120_v16 }
 0x173   :  { %v122_v18 = vsel %vm115_vm2, %v121_v17, 0.0 }
 0x174   :  { %123 = vadd.xlane.f32.xlu0 %v122_v18  ;;  %v353_v18 = vld [vmem:[%s8303_s4 + $0x50] sm:$0xff] }
 0x175   :  { %v5224_v20 = vpack.c.bf16 %v354_v19, %v353_v18  ;;  %v6025_v18 = vsub.s32 3, %v5865_v4 }
 0x177   :  { %8359 = vst [vmem:[#allocation12_spill] sm:$0xff] %v6025_v18  ;;  %v364_v19 = vrot.slane %v5873_v6, %v6025_v18 }
 0x201   :  { %v124_v33 = vpop.xlane.xlu0 %123 }
 0x202   :  { %v125_v34 = vmul.f32 0.015625, %v124_v33 }
 0x204   :  { %v126_v35 = vadd.f32 1e-05, %v125_v34 }
 0x206   :  { %5742 = vrsqrt.f32 %v126_v35 }
 0x210   :  { %v5743_v40 = vpop.eup %5742 }
 0x211   :  { %v128_v41 = vmul.f32 %v5743_v40, %v120_v16 }
 0x213   :  { %v129_v43 = vmul.f32 %v128_v41, %v5921_v39 }
 0x215   :  { %v130_v44 = vadd.f32 %v129_v43, %v5924_v42 }
 0x217   :  { %5000 = vmatmul.mubr.msk.f32.vlgmr.msra.gmra.mrb[2].mxu0 %vm115_vm2, %v130_v44 }
 0x218   :  { %5003 = vmatpush3.msra.mxu0 %v233_v32  ;;  %5004 = vmatprep.mubr.msk.f32.mxu0 %vm39_vm0, %v5931_v45 }
 0x219   :  { %5225 = vmatprep.subr.bf16.mxu0 %v5224_v20 }
 0x21b   :  { %5005 = vmatmul.mubr.msk.f32.vlgmr.msra.gmra.mrb[4].mxu0 %vm39_vm0, %v5939_v46 }
 0x21c   :  { %5227 = vmatpush3.bf16.msra.mxu0 %v5224_v20 }
 0x21d   :  { %5229 = vmatprep.subr.bf16.mxu0 %v5228_v24 }
 0x220   :  { %5231 = vmatpush3.bf16.msra.mxu0 %v5228_v24 }
 0x221   :  { %5233 = vmatprep.subr.bf16.mxu0 %v5232_v27 }
 0x224   :  { %5235 = vmatpush3.bf16.msra.mxu0 %v5232_v27 }
 0x225   :  { %5237 = vmatprep.subr.bf16.mxu0 %v5236_v30 }
 0x228   :  { %5239 = vmatpush3.bf16.msra.mxu0 %v5236_v30 }
 0x229   :  { %5252 = vmatprep.subr.bf16.mxu0 %v8307_v22 }
 0x2ea   :  { %v212_v48 = vpop.f32.mrb[2].mxu0 }
 0x2eb   :  { %v5001_v49 = vpop.f32.mrb[3].mxu0  ;;  %v213_v63 = vadd.f32 %v212_v48, %v142_v62  ;;  %v486_v62 = vld [vmem:[%s8302_s3 + $0x18] sm:$0xff] }
 0x2ed   :  { %v216_v7 = vmul.f32 0.01, %v213_v63 }
 0x2ee   :  { %v5006_v51 = vpop.f32.mrb[4].mxu0 }
 0x2ef   :  { %v316_v52 = vadd.f32 %v5006_v51, %v237_v50  ;;  %v310_v53 = vpop.f32.mrb[5].mxu0  ;;  %v217_v14 = vmax.f32 %v213_v63, %v216_v7 }
 0x2f0   :  { %v311_v54 = vadd.f32 %v310_v53, %v237_v50 }
 0x2f1   :  { %v320_v55 = vmul.f32 0.01, %v316_v52  ;;  %v218_v16 = vsel %vm115_vm2, %v217_v14, 0.0 }
 0x2f2   :  { %v319_v56 = vmul.f32 0.01, %v311_v54 }
 0x2f3   :  { %v322_v59 = vmax.f32 %v316_v52, %v320_v55 }
 0x2f4   :  { %v321_v57 = vmax.f32 %v311_v54, %v319_v56 }
 0x2f5   :  { %v326_v60 = vsel %vm115_vm2, %v322_v59, 0.0 }
 0x2f6   :  { %v323_v58 = vsel %vm115_vm2, %v321_v57, 0.0 }
 0x2f7   :  { %324 = vadd.xlane.f32.xlu1 %v323_v58  ;;  %v484_v58 = vld [vmem:[%s8302_s3 + $0x8] sm:$0xff] }
 0x2fb   :  { %327 = vadd.xlane.f32.xlu1 %v326_v60  ;;  %v485_v60 = vld [vmem:[%s8302_s3 + $0x10] sm:$0xff] }
 0x2fc   :  { %v5244_v63 = vpack.c.bf16 %v486_v62, %v485_v60 }
 0x384   :  { %v325_v0 = vpop.xlane.xlu1 %324 }
 0x385   :  { %v329_v3 = vmul.f32 0.015625, %v325_v0  ;;  %v487_v0 = vld [vmem:[%s8302_s3 + $0x20] sm:$0xff] }
 0x387   :  { %v331_v8 = vsub.f32 %v321_v57, %v329_v3  ;;  %v483_v57 = vld [vmem:[%s8302_s3] sm:$0xff]  ;;  %v488_v3 = vld [vmem:[%s8302_s3 + $0x28] sm:$0xff] }
 0x388   :  { %v328_v9 = vpop.xlane.xlu1 %327  ;;  %v5247_v7 = vpack.c.bf16 %v488_v3, %v487_v0 }
 0x389   :  { %v330_v10 = vmul.f32 0.015625, %v328_v9  ;;  %v333_v11 = vmul.f32 %v331_v8, %v331_v8  ;;  %v490_v9 = vld [vmem:[%s8302_s3 + $0x38] sm:$0xff] }
 0x38b   :  { %v332_v12 = vsub.f32 %v322_v59, %v330_v10  ;;  %v335_v13 = vsel %vm115_vm2, %v333_v11, 0.0  ;;  %v5241_v59 = vpack.c.bf16 %v484_v58, %v483_v57  ;;  %v6061_v57 = vsub.s32 7, %v5865_v4 }
 0x38c   :  { %336 = vadd.xlane.f32.xlu0 %v335_v13  ;;  %v624_v58 = vrot.slane %v5854_v1, %v5918_v38 }
 0x38d   :  { %v334_v15 = vmul.f32 %v332_v12, %v332_v12  ;;  %5242 = vmatpush3.bf16.msra.mxu1 %v5241_v59  ;;  %v632_v59 = vrot.slane %v5854_v1, %v6061_v57 }
 0x38e   :  { %5243 = vmatprep.subr.bf16.mxu1 %v8307_v22 }
 0x38f   :  { %v338_v17 = vsel %vm115_vm2, %v334_v15, 0.0 }
 0x390   :  { %219 = vadd.xlane.f32.xlu0 %v218_v16  ;;  %339 = vadd.xlane.f32.xlu1 %v338_v17 }
 0x391   :  { %5245 = vmatpush3.bf16.msra.mxu1 %v5244_v63 }
 0x392   :  { %5246 = vmatprep.subr.bf16.mxu1 %v8307_v22 }
 0x395   :  { %5248 = vmatpush3.bf16.msra.mxu1 %v5247_v7 }
 0x396   :  { %5249 = vmatprep.subr.bf16.mxu1 %v8307_v22 }
 0x419   :  { %v337_v31 = vpop.xlane.xlu0 %336 }
 0x41a   :  { %v341_v32 = vmul.f32 0.015625, %v337_v31 }
 0x41c   :  { %v343_v33 = vadd.f32 1e-05, %v341_v32 }
 0x41d   :  { %v220_v34 = vpop.xlane.xlu0 %219  ;;  %v340_v35 = vpop.xlane.xlu1 %339 }
 0x41e   :  { %5744 = vrsqrt.f32 %v343_v33  ;;  %v221_v37 = vmul.f32 0.015625, %v220_v34  ;;  %v342_v40 = vmul.f32 0.015625, %v340_v35 }
 0x420   :  { %v222_v41 = vsub.f32 %v217_v14, %v221_v37  ;;  %v344_v43 = vadd.f32 1e-05, %v342_v40 }
 0x422   :  { %5746 = vrsqrt.f32 %v344_v43  ;;  %v223_v44 = vmul.f32 %v222_v41, %v222_v41 }
 0x424   :  { %v224_v48 = vsel %vm115_vm2, %v223_v44, 0.0 }
 0x425   :  { %225 = vadd.xlane.f32.xlu1 %v224_v48 }
 0x428   :  { %v5745_v49 = vpop.eup %5744 }
 0x429   :  { %v347_v50 = vmul.f32 %v5745_v49, %v331_v8  ;;  %v489_v8 = vld [vmem:[%s8302_s3 + $0x30] sm:$0xff] }
 0x42a   :  { %v5250_v10 = vpack.c.bf16 %v490_v9, %v489_v8 }
 0x42b   :  { %v349_v51 = vmul.f32 %v347_v50, %v5921_v39  ;;  %v576_v50 = vrot.slane %v5854_v1, %v5868_v5 }
 0x42c   :  { %v5747_v52 = vpop.eup %5746  ;;  %5251 = vmatpush3.bf16.msra.mxu1 %v5250_v10 }
 0x42d   :  { %v348_v53 = vmul.f32 %v5747_v52, %v332_v12  ;;  %v351_v54 = vadd.f32 %v349_v51, %v5924_v42  ;;  %v584_v51 = vrot.slane %v5854_v1, %v5951_v61  ;;  %v592_v52 = vrot.slane %v5854_v1, %v5944_v47 }
 0x42f   :  { %5023 = vmatprep.mubr.msk.f32.mxu0 %vm115_vm2, %v351_v54  ;;  %v350_v55 = vmul.f32 %v348_v53, %v5921_v39  ;;  %v6050_v53 = vsub.s32 4, %v5865_v4  ;;  %v600_v54 = vrot.slane %v5854_v1, %v6025_v18 }
 0x431   :  { %v352_v56 = vadd.f32 %v350_v55, %v5924_v42  ;;  %8360 = vst [vmem:[#allocation13_spill] sm:$0xff] %v6050_v53  ;;  %v608_v55 = vrot.slane %v5854_v1, %v6050_v53  ;;  %v567_v60 = vrot.slane %v5873_v6, %v6050_v53 }
 0x433   :  { %5024 = vmatmul.mubr.msk.f32.vlgmr.msra.gmra.mrb[6].mxu0 %vm115_vm2, %v352_v56  ;;  %v616_v56 = vrot.slane %v5854_v1, %v5912_v36 }
 0x434   :  { %5049 = vmatprep.mubr.msk.f32.mxu0 %vm5811_vm1, %v8305_v2 }
 0x4b2   :  { %v226_v11 = vpop.xlane.xlu1 %225 }
 0x4b3   :  { %v227_v12 = vmul.f32 0.015625, %v226_v11 }
 0x4b5   :  { %v228_v13 = vadd.f32 1e-05, %v227_v12 }
 0x4b7   :  { %5748 = vrsqrt.f32 %v228_v13 }
 0x4c1   :  { %v5749_v14 = vpop.eup %5748 }
 0x4c2   :  { %v230_v15 = vmul.f32 %v5749_v14, %v222_v41 }
 0x4c4   :  { %v231_v16 = vmul.f32 %v230_v15, %v5921_v39 }
 0x4c6   :  { %v232_v17 = vadd.f32 %v231_v16, %v5924_v42 }
 0x4c8   :  { %480 = vst.msk [vmem:[#allocation3] sm:$0xff] %vm115_vm2, %v232_v17  ;;  %5043 = vmatmul.mubr.msk.f32.vlgmr.msra.gmra.mrb[0].mxu1 %vm115_vm2, %v232_v17  ;;  %5071 = vmatprep.subr.mxu1 %v232_v17 }
 0x4c9   :  { %5072 = vmatpush3.msra.mxu1 %v232_v17 }
 0x4ca   :  { %5271 = vmatprep.subr.bf16.mxu1 %v8307_v22 }
 0x506   :  { %v5025_v20 = vpop.f32.mrb[6].mxu0 }
 0x507   :  { %v443_v21 = vadd.f32 %v5025_v20, %v364_v19  ;;  %v437_v23 = vpop.f32.mrb[7].mxu0 }
 0x508   :  { %v438_v24 = vadd.f32 %v437_v23, %v364_v19 }
 0x509   :  { %v447_v25 = vmul.f32 0.01, %v443_v21 }
 0x50a   :  { %v446_v26 = vmul.f32 0.01, %v438_v24 }
 0x50b   :  { %v449_v27 = vmax.f32 %v443_v21, %v447_v25 }
 0x50c   :  { %v448_v28 = vmax.f32 %v438_v24, %v446_v26 }
 0x50d   :  { %v453_v29 = vsel %vm115_vm2, %v449_v27, 0.0 }
 0x50e   :  { %454 = vadd.xlane.f32.xlu1 %v453_v29  ;;  %v450_v30 = vsel %vm115_vm2, %v448_v28, 0.0 }
 0x50f   :  { %451 = vadd.xlane.f32.xlu0 %v450_v30 }
 0x59b   :  { %v6031_v31 = vpop.f32.mrb[0].mxu1  ;;  %v455_v32 = vpop.xlane.xlu1 %454 }
 0x59c   :  { %v457_v33 = vmul.f32 0.015625, %v455_v32  ;;  %v452_v34 = vpop.xlane.xlu0 %451  ;;  %v5044_v35 = vpop.f32.mrb[1].mxu1 }
 0x59d   :  { %v456_v37 = vmul.f32 0.015625, %v452_v34 }
 0x59e   :  { %v6033_v40 = vsub.f32 %v449_v27, %v457_v33 }
 0x59f   :  { %v6035_v41 = vsub.f32 %v448_v28, %v456_v37 }
 0x5a0   :  { %v461_v43 = vmul.f32 %v6033_v40, %v6033_v40 }
 0x5a1   :  { %v460_v44 = vmul.f32 %v6035_v41, %v6035_v41 }
 0x5a2   :  { %v465_v48 = vsel %vm115_vm2, %v461_v43, 0.0 }
 0x5a3   :  { %466 = vadd.xlane.f32.xlu1 %v465_v48  ;;  %v462_v49 = vsel %vm115_vm2, %v460_v44, 0.0 }
 0x5a4   :  { %463 = vadd.xlane.f32.xlu0 %v462_v49 }
 0x5b4   :  { %579 = vbcast.lane.b32.xlu1 %v576_v50, 280 }
 0x5b8   :  { %587 = vbcast.lane.b32.xlu1 %v584_v51, 280 }
 0x5ba   :  { %762 = vrot.lane.b32.xlu0 %v5854_v1, %s5813_s27 }
 0x5bc   :  { %595 = vbcast.lane.b32.xlu1 %v592_v52, 280 }
 0x5be   :  { %603 = vbcast.lane.b32.xlu0 %v600_v54, 280 }
 0x5c0   :  { %611 = vbcast.lane.b32.xlu1 %v608_v55, 280 }
 0x5c2   :  { %619 = vbcast.lane.b32.xlu0 %v616_v56, 280 }
 0x5c4   :  { %627 = vbcast.lane.b32.xlu1 %v624_v58, 280 }
 0x5c6   :  { %635 = vbcast.lane.b32.xlu0 %v632_v59, 280 }
 0x5c8   :  { %569 = vrot.lane.b32.xlu1 %v567_v60, %s5814_s28 }
 0x630   :  { %v467_v62 = vpop.xlane.xlu1 %466 }
 0x631   :  { %v469_v63 = vmul.f32 0.015625, %v467_v62  ;;  %v464_v4 = vpop.xlane.xlu0 %463 }
 0x632   :  { %v468_v0 = vmul.f32 0.015625, %v464_v4 }
 0x633   :  { %v471_v3 = vadd.f32 1e-05, %v469_v63 }
 0x634   :  { %v470_v7 = vadd.f32 1e-05, %v468_v0  ;;  %v6070_v8 = vpop.permute.xlu1 %579 }
 0x635   :  { %8361 = vst [vmem:[#allocation14_spill] sm:$0xff] %v6070_v8  ;;  %5750 = vrsqrt.f32 %v471_v3  ;;  %v637_v1 = vadd.f32 %v6070_v8, %v6031_v31  ;;  %v6074_v9 = vpop.permute.xlu0 %762 }
 0x636   :  { %5752 = vrsqrt.f32 %v470_v7 }
 0x637   :  { %v645_v10 = vsel %vm115_vm2, %v637_v1, -inf }
 0x638   :  { %v646_v11 = vrot.slane %v645_v10, 4  ;;  %v6077_v12 = vpop.permute.xlu1 %587 }
 0x639   :  { %8362 = vst [vmem:[#allocation15_spill] sm:$0xff] %v6077_v12  ;;  %v638_v13 = vadd.f32 %v6077_v12, %v6031_v31  ;;  %v6081_v14 = vpop.permute.xlu0 %603 }
 0x63a   :  { %8363 = vst [vmem:[#allocation16_spill] sm:$0xff] %v6081_v14  ;;  %v647_v15 = vmax.f32 %v645_v10, %v646_v11  ;;  %v640_v16 = vadd.f32 %v6081_v14, %v6031_v31 }
 0x63b   :  { %v652_v17 = vsel %vm115_vm2, %v638_v13, -inf }
 0x63c   :  { %v648_v19 = vrot.slane %v647_v15, 2  ;;  %v653_v20 = vrot.slane %v652_v17, 4  ;;  %v666_v21 = vsel %vm115_vm2, %v640_v16, -inf  ;;  %v6087_v23 = vpop.permute.xlu1 %595 }
 0x63d   :  { %8364 = vst [vmem:[#allocation17_spill] sm:$0xff] %v6087_v23  ;;  %v667_v24 = vrot.slane %v666_v21, 4  ;;  %v639_v25 = vadd.f32 %v6087_v23, %v6031_v31  ;;  %v6091_v26 = vpop.permute.xlu0 %619 }
 0x63e   :  { %8365 = vst [vmem:[#allocation18_spill] sm:$0xff] %v6091_v26  ;;  %v654_v27 = vmax.f32 %v652_v17, %v653_v20  ;;  %v642_v28 = vadd.f32 %v6091_v26, %v6031_v31  ;;  %v649_v30 = vmax.f32 %v647_v15, %v648_v19 }
 0x63f   :  { %v5751_v29 = vpop.eup %5750  ;;  %v668_v32 = vmax.f32 %v666_v21, %v667_v24  ;;  %v659_v33 = vsel %vm115_vm2, %v639_v25, -inf  ;;  %v838_v21 = vld [vmem:[%s8302_s3 + $0x280] sm:$0xff]  ;;  %v839_v24 = vld [vmem:[%s8302_s3 + $0x288] sm:$0xff] }
 0x640   :  { %v5753_v34 = vpop.eup %5752  ;;  %v475_v35 = vmul.f32 %v5751_v29, %v6033_v40  ;;  %v655_v37 = vrot.slane %v654_v27, 2  ;;  %v660_v43 = vrot.slane %v659_v33, 4  ;;  %v6097_v44 = vpop.permute.xlu1 %611  ;;  %v680_v50 = vsel %vm115_vm2, %v642_v28, -inf }
 0x641   :  { %8366 = vst [vmem:[#allocation19_spill] sm:$0xff] %v6097_v44  ;;  %v474_v48 = vmul.f32 %v5753_v34, %v6035_v41  ;;  %v669_v49 = vrot.slane %v668_v32, 2  ;;  %v641_v51 = vadd.f32 %v6097_v44, %v6031_v31  ;;  %v6103_v52 = vpop.permute.xlu0 %635  ;;  %v681_v56 = vrot.slane %v680_v50, 4 }
 0x642   :  { %8367 = vst [vmem:[#allocation20_spill] sm:$0xff] %v6103_v52  ;;  %v656_v54 = vmax.f32 %v654_v27, %v655_v37  ;;  %v661_v55 = vmax.f32 %v659_v33, %v660_v43  ;;  %v650_v58 = vrot.slane %v649_v30, 1  ;;  %v644_v59 = vadd.f32 %v6103_v52, %v6031_v31 }
 0x643   :  { %v673_v40 = vsel %vm115_vm2, %v641_v51, -inf  ;;  %v476_v41 = vmul.f32 %v474_v48, %v5921_v39  ;;  %v682_v63 = vmax.f32 %v680_v50, %v681_v56  ;;  %v670_v3 = vmax.f32 %v668_v32, %v669_v49  ;;  %v841_v51 = vld [vmem:[%s8302_s3 + $0x298] sm:$0xff] }
 0x644   :  { %v657_v60 = vrot.slane %v656_v54, 1  ;;  %v662_v62 = vrot.slane %v661_v55, 2  ;;  %v674_v4 = vrot.slane %v673_v40, 4  ;;  %v6109_v0 = vpop.permute.xlu1 %627  ;;  %v694_v7 = vsel %vm115_vm2, %v644_v59, -inf }
 0x645   :  { %8368 = vst [vmem:[#allocation21_spill] sm:$0xff] %v6109_v0  ;;  %v643_v1 = vadd.f32 %v6109_v0, %v6031_v31  ;;  %v477_v10 = vmul.f32 %v475_v35, %v5921_v39  ;;  %v683_v13 = vrot.slane %v682_v63, 2  ;;  %v695_v17 = vrot.slane %v694_v7, 4 }
 0x646   :  { %v663_v11 = vmax.f32 %v661_v55, %v662_v62  ;;  %v675_v15 = vmax.f32 %v673_v40, %v674_v4  ;;  %v658_v16 = vmax.f32 %v656_v54, %v657_v60  ;;  %v478_v20 = vadd.f32 %v476_v41, %v5924_v42 }
 0x647   :  { %v687_v19 = vsel %vm115_vm2, %v643_v1, -inf  ;;  %v651_v25 = vmax.f32 %v649_v30, %v650_v58  ;;  %v671_v32 = vrot.slane %v670_v3, 1  ;;  %v684_v33 = vmax.f32 %v682_v63, %v683_v13  ;;  %v840_v30 = vld [vmem:[%s8302_s3 + $0x290] sm:$0xff]  ;;  %v843_v1 = vld [vmem:[%s8302_s3 + $0x2a8] sm:$0xff] }
 0x648   :  { %v664_v27 = vrot.slane %v663_v11, 1  ;;  %v676_v28 = vrot.slane %v675_v15, 2  ;;  %v688_v29 = vrot.slane %v687_v19, 4  ;;  %v696_v34 = vmax.f32 %v694_v7, %v695_v17  ;;  %481 = vst.msk [vmem:[#allocation2] sm:$0xff] %vm115_vm2, %v478_v20  ;;  %v842_v7 = vld [vmem:[%s8302_s3 + $0x2a0] sm:$0xff] }
 0x649   :  { %v479_v35 = vadd.f32 %v477_v10, %v5924_v42  ;;  %v5255_v49 = vpack.c.bf16 %v839_v24, %v838_v21  ;;  %v710_v55 = vsel %vm709_vm3, %v658_v16, %v651_v25  ;;  %v672_v59 = vmax.f32 %v670_v3, %v671_v32  ;;  %v844_v24 = vld [vmem:[%s8302_s3 + $0x2b0] sm:$0xff]  ;;  %v845_v25 = vld [vmem:[%s8302_s3 + $0x2b8] sm:$0xff] }
 0x64a   :  { %v665_v37 = vmax.f32 %v663_v11, %v664_v27  ;;  %v677_v43 = vmax.f32 %v675_v15, %v676_v28  ;;  %v689_v48 = vmax.f32 %v687_v19, %v688_v29  ;;  %v697_v54 = vrot.slane %v696_v34, 2 }
 0x64b   :  { %482 = vst.msk [vmem:[#allocation2 + $0x40] sm:$0xff] %vm115_vm2, %v479_v35  ;;  %v5253_v50 = vpack.c.bf16 %v479_v35, %v478_v20  ;;  %v685_v41 = vrot.slane %v684_v33, 1  ;;  %v5259_v63 = vpack.c.bf16 %v841_v51, %v840_v30  ;;  %v5263_v16 = vpack.c.bf16 %v843_v1, %v842_v7 }
 0x64c   :  { %v678_v56 = vrot.slane %v677_v43, 1  ;;  %v690_v58 = vrot.slane %v689_v48, 2  ;;  %v712_v40 = vsel %vm711_vm4, %v665_v37, %v710_v55  ;;  %v698_v60 = vmax.f32 %v696_v34, %v697_v54 }
 0x64d   :  { %5254 = vmatpush3.bf16.msra.mxu0 %v5253_v50  ;;  %v714_v11 = vsel %vm713_vm6, %v672_v59, %v712_v40  ;;  %v686_v15 = vmax.f32 %v684_v33, %v685_v41  ;;  %v5267_v28 = vpack.c.bf16 %v845_v25, %v844_v24  ;;  %v940_v29 = vrot.slane %v5931_v45, %v5868_v5  ;;  %v570_v40 = vpop.permute.xlu1 %569 }
 0x64e   :  { %v679_v62 = vmax.f32 %v677_v43, %v678_v56  ;;  %5256 = vmatprep.subr.bf16.mxu0 %v5255_v49  ;;  %v691_v4 = vmax.f32 %v689_v48, %v690_v58  ;;  %v699_v10 = vrot.slane %v698_v60, 1  ;;  %v952_v32 = vrot.slane %v5931_v45, %v5951_v61 }
 0x64f   :  { %v1036_v33 = vrot.slane %v5939_v46, %v5868_v5  ;;  %v1048_v34 = vrot.slane %v5939_v46, %v5951_v61  ;;  %v964_v37 = vrot.slane %v5931_v45, %v5944_v47  ;;  %v1060_v43 = vrot.slane %v5939_v46, %v5944_v47 }
 0x650   :  { %5050 = vmatmul.mubr.msk.f32.vlgmr.msra.gmra.mrb[8].mxu0 %vm764_vm5, %v6074_v9  ;;  %v692_v3 = vrot.slane %v691_v4, 1  ;;  %v716_v13 = vsel %vm715_vm7, %v679_v62, %v714_v11  ;;  %v700_v19 = vmax.f32 %v698_v60, %v699_v10  ;;  %v976_v48 = vrot.slane %v5931_v45, %v6025_v18 }
 0x651   :  { %5258 = vmatpush3.bf16.msra.mxu0 %v5255_v49  ;;  %5068 = vmatprep.mubr.msk.f32.mxu0 %vm115_vm2, %v478_v20  ;;  %v718_v21 = vsel %vm717_vm8, %v686_v15, %v716_v13  ;;  %v988_v49 = vrot.slane %v5931_v45, %v6050_v53  ;;  %v1084_v50 = vrot.slane %v5939_v46, %v6050_v53 }
 0x652   :  { %5260 = vmatprep.subr.bf16.mxu0 %v5259_v63  ;;  %v693_v17 = vmax.f32 %v691_v4, %v692_v3  ;;  %v1000_v30 = vrot.slane %v5931_v45, %v5912_v36  ;;  %v1096_v51 = vrot.slane %v5939_v46, %v5912_v36  ;;  %v1012_v54 = vrot.slane %v5931_v45, %v5918_v38 }
 0x653   :  { %v1108_v55 = vrot.slane %v5939_v46, %v5918_v38  ;;  %v1024_v56 = vrot.slane %v5931_v45, %v6061_v57  ;;  %v1120_v58 = vrot.slane %v5939_v46, %v6061_v57  ;;  %v572_v59 = vadd.f32 %v570_v40, %v6031_v31 }
 0x654   :  { %v720_v27 = vsel %vm719_vm9, %v693_v17, %v718_v21  ;;  %v930_v45 = vrot.slane %v5873_v6, %v6061_v57 }
 0x655   :  { %5262 = vmatpush3.bf16.msra.mxu0 %v5259_v63  ;;  %v722_v20 = vsel %vm721_vm10, %v700_v19, %v720_v27 }
 0x656   :  { %5264 = vmatprep.subr.bf16.mxu0 %v5263_v16  ;;  %723 = vrot.lane.b32.xlu0 %v722_v20, %s5814_s28 }
 0x659   :  { %5266 = vmatpush3.bf16.msra.mxu0 %v5263_v16 }
 0x65a   :  { %5268 = vmatprep.subr.bf16.mxu0 %v5267_v28  ;;  %943 = vbcast.lane.b32.xlu0 %v940_v29, 272 }
 0x65d   :  { %5270 = vmatpush3.bf16.msra.mxu0 %v5267_v28 }
 0x65e   :  { %955 = vbcast.lane.b32.xlu0 %v952_v32, 272  ;;  %5307 = vmatprep.subr.bf16.mxu0 %v8307_v22 }
 0x660   :  { %5069 = vmatmul.mubr.msk.f32.vlgmr.msra.gmra.mrb[10].mxu0 %vm115_vm2, %v479_v35  ;;  %v1072_v35 = vrot.slane %v5939_v46, %v6025_v18 }
 0x661   :  { %5080 = vmatprep.mubr.msk.f32.mxu0 %vm5811_vm1, %v8305_v2 }
 0x662   :  { %1039 = vbcast.lane.b32.xlu0 %v1036_v33, 272 }
 0x666   :  { %1051 = vbcast.lane.b32.xlu0 %v1048_v34, 272 }
 0x66a   :  { %967 = vbcast.lane.b32.xlu0 %v964_v37, 272 }
 0x66e   :  { %1063 = vbcast.lane.b32.xlu0 %v1060_v43, 272 }
 0x672   :  { %979 = vbcast.lane.b32.xlu0 %v976_v48, 272 }
 0x676   :  { %1075 = vbcast.lane.b32.xlu0 %v1072_v35, 272 }
 0x67a   :  { %991 = vbcast.lane.b32.xlu0 %v988_v49, 272 }
 0x67e   :  { %1087 = vbcast.lane.b32.xlu0 %v1084_v50, 272 }
 0x682   :  { %1003 = vbcast.lane.b32.xlu0 %v1000_v30, 272 }
 0x686   :  { %1099 = vbcast.lane.b32.xlu0 %v1096_v51, 272 }
 0x68a   :  { %1015 = vbcast.lane.b32.xlu0 %v1012_v54, 272 }
 0x68e   :  { %1111 = vbcast.lane.b32.xlu0 %v1108_v55, 272 }
 0x692   :  { %1027 = vbcast.lane.b32.xlu0 %v1024_v56, 272 }
 0x696   :  { %1123 = vbcast.lane.b32.xlu0 %v1120_v58, 272 }
 0x6c8   :  { %v724_v41 = vpop.permute.xlu0 %723 }
 0x6c9   :  { %v726_v60 = vadd.f32 %v724_v41, %v572_v59 }
 0x6cb   :  { %v727_v62 = vmul.f32 0.01, %v726_v60 }
 0x6cc   :  { %v6199_v31 = vpop.permute.xlu0 %943 }
 0x6cd   :  { %v6192_v63 = vmax.f32 %v726_v60, %v727_v62 }
 0x6cf   :  { %730 = vrot.lane.b32.xlu1 %v6192_v63, %s5814_s28 }
 0x6d0   :  { %v6202_v1 = vpop.permute.xlu0 %955 }
 0x6d3   :  { %947 = vbcast.lane.b32.xlu1 %v940_v29, 280 }
 0x6d4   :  { %v6204_v10 = vpop.permute.xlu0 %1039 }
 0x6d7   :  { %959 = vbcast.lane.b32.xlu1 %v952_v32, 280 }
 0x6d8   :  { %v6210_v13 = vpop.permute.xlu0 %1051 }
 0x6db   :  { %1043 = vbcast.lane.b32.xlu1 %v1036_v33, 280 }
 0x6dc   :  { %v6212_v15 = vpop.permute.xlu0 %967 }
 0x6df   :  { %1055 = vbcast.lane.b32.xlu1 %v1048_v34, 280 }
 0x6e0   :  { %v6214_v6 = vpop.permute.xlu0 %1063 }
 0x6e3   :  { %971 = vbcast.lane.b32.xlu1 %v964_v37, 280 }
 0x6e4   :  { %v6223_v24 = vpop.permute.xlu0 %979 }
 0x6e5   :  { %8369 = vst [vmem:[#allocation22_spill] sm:$0xff] %v6223_v24 }
 0x6e7   :  { %1067 = vbcast.lane.b32.xlu1 %v1060_v43, 280 }
 0x6eb   :  { %983 = vbcast.lane.b32.xlu1 %v976_v48, 280  ;;  %v6237_v48 = vpop.permute.xlu0 %1075 }
 0x6ef   :  { %1079 = vbcast.lane.b32.xlu1 %v1072_v35, 280 }
 0x6f3   :  { %995 = vbcast.lane.b32.xlu1 %v988_v49, 280 }
 0x6f7   :  { %1091 = vbcast.lane.b32.xlu1 %v1084_v50, 280 }
 0x6fb   :  { %1007 = vbcast.lane.b32.xlu1 %v1000_v30, 280 }
 0x6ff   :  { %1103 = vbcast.lane.b32.xlu1 %v1096_v51, 280 }
 0x703   :  { %1019 = vbcast.lane.b32.xlu1 %v1012_v54, 280 }
 0x707   :  { %1115 = vbcast.lane.b32.xlu1 %v1108_v55, 280 }
 0x70b   :  { %1031 = vbcast.lane.b32.xlu1 %v1024_v56, 280 }
 0x70f   :  { %1127 = vbcast.lane.b32.xlu1 %v1120_v58, 280 }
 0x713   :  { %932 = vrot.lane.b32.xlu1 %v930_v45, %s5814_s28  ;;  %v6251_v45 = vpop.permute.xlu0 %991 }
 0x714   :  { %8370 = vst [vmem:[#allocation23_spill] sm:$0xff] %v6251_v45 }
 0x723   :  { %v833_v4 = vpop.f32.mrb[8].mxu0 }
 0x724   :  { %837 = vst.msk [vmem:[#allocation3 + $0x8] sm:$0xff] %vm115_vm2, %v833_v4  ;;  %v5051_v7 = vpop.f32.mrb[9].mxu0 }
 0x733   :  { %v6206_v11 = vpop.f32.mrb[10].mxu0 }
 0x734   :  { %v6208_v3 = vpop.f32.mrb[11].mxu0 }
 0x735   :  { %v1129_v17 = vadd.f32 %v6199_v31, %v6208_v3  ;;  %v1131_v20 = vadd.f32 %v6202_v1, %v6208_v3  ;;  %v1145_v43 = vadd.f32 %v6204_v10, %v6208_v3  ;;  %v1147_v58 = vadd.f32 %v6210_v13, %v6208_v3 }
 0x737   :  { %v1161_v25 = vsel %vm115_vm2, %v1129_v17, -inf  ;;  %v1170_v34 = vsel %vm115_vm2, %v1131_v20, -inf  ;;  %v1233_v55 = vsel %vm115_vm2, %v1145_v43, -inf }
 0x741   :  { %v731_v57 = vpop.permute.xlu1 %730 }
 0x742   :  { %v733_v16 = vsel %vm115_vm2, %v731_v57, 0.0 }
 0x743   :  { %734 = vadd.xlane.f32.xlu0 %v733_v16  ;;  %v1242_v16 = vsel %vm115_vm2, %v1147_v58, -inf }
 0x745   :  { %v6219_v19 = vpop.permute.xlu1 %947 }
 0x746   :  { %v1130_v21 = vadd.f32 %v6206_v11, %v6219_v19 }
 0x748   :  { %v1162_v27 = vsel %vm115_vm2, %v1130_v21, -inf  ;;  %v1133_v21 = vadd.f32 %v6212_v15, %v6208_v3 }
 0x749   :  { %v1163_v28 = vmax.f32 %v1161_v25, %v1162_v27  ;;  %v6229_v29 = vpop.permute.xlu1 %959 }
 0x74a   :  { %v1132_v32 = vadd.f32 %v6206_v11, %v6229_v29 }
 0x74b   :  { %v1164_v33 = vrot.slane %v1163_v28, 4 }
 0x74c   :  { %v1171_v37 = vsel %vm115_vm2, %v1132_v32, -inf }
 0x74d   :  { %v1165_v35 = vmax.f32 %v1163_v28, %v1164_v33  ;;  %v1172_v49 = vmax.f32 %v1170_v34, %v1171_v37  ;;  %v6239_v50 = vpop.permute.xlu1 %1043 }
 0x74e   :  { %v1146_v30 = vadd.f32 %v6206_v11, %v6239_v50 }
 0x74f   :  { %v1166_v51 = vrot.slane %v1165_v35, 2  ;;  %v1173_v54 = vrot.slane %v1172_v49, 4 }
 0x750   :  { %v1234_v56 = vsel %vm115_vm2, %v1146_v30, -inf  ;;  %v1149_v30 = vadd.f32 %v6214_v6, %v6208_v3 }
 0x751   :  { %v1167_v40 = vmax.f32 %v1165_v35, %v1166_v51  ;;  %v1174_v59 = vmax.f32 %v1172_v49, %v1173_v54  ;;  %v1235_v41 = vmax.f32 %v1233_v55, %v1234_v56  ;;  %v6247_v60 = vpop.permute.xlu1 %1055  ;;  %v1179_v35 = vsel %vm115_vm2, %v1133_v21, -inf  ;;  %v6265_v51 = vpop.permute.xlu0 %1087 }
 0x752   :  { %v1148_v62 = vadd.f32 %v6206_v11, %v6247_v60 }
 0x753   :  { %v1175_v4 = vrot.slane %v1174_v59, 2  ;;  %v1236_v7 = vrot.slane %v1235_v41, 4  ;;  %v1168_v57 = vrot.slane %v1167_v40, 1 }
 0x754   :  { %v1243_v17 = vsel %vm115_vm2, %v1148_v62, -inf }
 0x755   :  { %v1176_v25 = vmax.f32 %v1174_v59, %v1175_v4  ;;  %v1237_v27 = vmax.f32 %v1235_v41, %v1236_v7  ;;  %v1244_v20 = vmax.f32 %v1242_v16, %v1243_v17  ;;  %v6257_v28 = vpop.permute.xlu1 %971  ;;  %v1169_v43 = vmax.f32 %v1167_v40, %v1168_v57 }
 0x756   :  { %8371 = vst [vmem:[#allocation24_spill] sm:$0xff] %v6257_v28  ;;  %v1134_v32 = vadd.f32 %v6206_v11, %v6257_v28  ;;  %v1251_v57 = vsel %vm115_vm2, %v1149_v30, -inf  ;;  %v1135_v17 = vadd.f32 %v6223_v24, %v6208_v3  ;;  %v1151_v30 = vadd.f32 %v6237_v48, %v6208_v3 }
 0x757   :  { %v1177_v33 = vrot.slane %v1176_v25, 1  ;;  %v1238_v34 = vrot.slane %v1237_v27, 2  ;;  %v1245_v37 = vrot.slane %v1244_v20, 4 }
 0x758   :  { %v1180_v49 = vsel %vm115_vm2, %v1134_v32, -inf  ;;  %v6282_v32 = vpop.permute.xlu0 %1003 }
 0x759   :  { %v1178_v54 = vmax.f32 %v1176_v25, %v1177_v33  ;;  %v1239_v55 = vmax.f32 %v1237_v27, %v1238_v34  ;;  %v1246_v56 = vmax.f32 %v1244_v20, %v1245_v37  ;;  %v1181_v58 = vmax.f32 %v1179_v35, %v1180_v49  ;;  %v6267_v59 = vpop.permute.xlu1 %1067  ;;  %1397 = vrot.lane.b32.xlu0 %v5939_v46, %s5813_s27 }
 0x75a   :  { %v1150_v40 = vadd.f32 %v6206_v11, %v6267_v59  ;;  %8373 = vst [vmem:[#allocation26_spill] sm:$0xff] %v6282_v32  ;;  %v1188_v35 = vsel %vm115_vm2, %v1135_v17, -inf }
 0x75b   :  { %v1247_v41 = vrot.slane %v1246_v56, 2  ;;  %v1182_v62 = vrot.slane %v1181_v58, 4  ;;  %v1321_v4 = vsel %vm709_vm3, %v1178_v54, %v1169_v43  ;;  %v1240_v7 = vrot.slane %v1239_v55, 1 }
 0x75c   :  { %v1252_v16 = vsel %vm115_vm2, %v1150_v40, -inf }
 0x75d   :  { %v1248_v21 = vmax.f32 %v1246_v56, %v1247_v41  ;;  %v1183_v25 = vmax.f32 %v1181_v58, %v1182_v62  ;;  %v1253_v27 = vmax.f32 %v1251_v57, %v1252_v16  ;;  %v6278_v20 = vpop.permute.xlu1 %983  ;;  %v1241_v43 = vmax.f32 %v1239_v55, %v1240_v7 }
 0x75e   :  { %8372 = vst [vmem:[#allocation25_spill] sm:$0xff] %v6278_v20  ;;  %v1136_v46 = vadd.f32 %v6206_v11, %v6278_v20  ;;  %v1260_v7 = vsel %vm115_vm2, %v1151_v30, -inf }
 0x75f   :  { %v1249_v33 = vrot.slane %v1248_v21, 1  ;;  %v1184_v34 = vrot.slane %v1183_v25, 2  ;;  %v1254_v37 = vrot.slane %v1253_v27, 4 }
 0x760   :  { %v1189_v49 = vsel %vm115_vm2, %v1136_v46, -inf }
 0x761   :  { %v1250_v54 = vmax.f32 %v1248_v21, %v1249_v33  ;;  %v1185_v56 = vmax.f32 %v1183_v25, %v1184_v34  ;;  %v1255_v58 = vmax.f32 %v1253_v27, %v1254_v37  ;;  %v1190_v40 = vmax.f32 %v1188_v35, %v1189_v49  ;;  %v6288_v41 = vpop.permute.xlu1 %1079  ;;  %v6297_v25 = vpop.permute.xlu0 %1099 }
 0x762   :  { %v1152_v62 = vadd.f32 %v6206_v11, %v6288_v41  ;;  %v1137_v21 = vadd.f32 %v6251_v45, %v6208_v3 }
 0x763   :  { %v1186_v57 = vrot.slane %v1185_v56, 1  ;;  %v1256_v16 = vrot.slane %v1255_v58, 2  ;;  %v1191_v2 = vrot.slane %v1190_v40, 4  ;;  %v1328_v55 = vsel %vm709_vm3, %v1250_v54, %v1241_v43 }
 0x764   :  { %v1261_v17 = vsel %vm115_vm2, %v1152_v62, -inf  ;;  %v1197_v62 = vsel %vm115_vm2, %v1137_v21, -inf }
 0x765   :  { %v1257_v27 = vmax.f32 %v1255_v58, %v1256_v16  ;;  %v1192_v46 = vmax.f32 %v1190_v40, %v1191_v2  ;;  %v1262_v33 = vmax.f32 %v1260_v7, %v1261_v17  ;;  %v6299_v34 = vpop.permute.xlu1 %995  ;;  %v1187_v37 = vmax.f32 %v1185_v56, %v1186_v57  ;;  %v6312_v17 = vpop.permute.xlu0 %1015 }
 0x766   :  { %8374 = vst [vmem:[#allocation27_spill] sm:$0xff] %v6299_v34  ;;  %v1138_v35 = vadd.f32 %v6206_v11, %v6299_v34  ;;  %v1153_v58 = vadd.f32 %v6265_v51, %v6208_v3  ;;  %8375 = vst [vmem:[#allocation28_spill] sm:$0xff] %v6312_v17 }
 0x767   :  { %v1258_v49 = vrot.slane %v1257_v27, 1  ;;  %v1193_v43 = vrot.slane %v1192_v46, 2  ;;  %v1263_v54 = vrot.slane %v1262_v33, 4  ;;  %v1322_v30 = vsel %vm711_vm4, %v1187_v37, %v1321_v4 }
 0x768   :  { %v1198_v22 = vsel %vm115_vm2, %v1138_v35, -inf  ;;  %v1269_v35 = vsel %vm115_vm2, %v1153_v58, -inf }
 0x769   :  { %v1194_v2 = vmax.f32 %v1192_v46, %v1193_v43  ;;  %v1264_v40 = vmax.f32 %v1262_v33, %v1263_v54  ;;  %v1199_v16 = vmax.f32 %v1197_v62, %v1198_v22  ;;  %v6308_v7 = vpop.permute.xlu1 %1091  ;;  %v1259_v56 = vmax.f32 %v1257_v27, %v1258_v49 }
 0x76a   :  { %v1154_v57 = vadd.f32 %v6206_v11, %v6308_v7  ;;  %v1139_v22 = vadd.f32 %v6282_v32, %v6208_v3 }
 0x76b   :  { %v1265_v53 = vrot.slane %v1264_v40, 2  ;;  %v1200_v4 = vrot.slane %v1199_v16, 4  ;;  %v1195_v37 = vrot.slane %v1194_v2, 1  ;;  %v1329_v21 = vsel %vm711_vm4, %v1259_v56, %v1328_v55 }
 0x76c   :  { %v1270_v18 = vsel %vm115_vm2, %v1154_v57, -inf  ;;  %v1206_v58 = vsel %vm115_vm2, %v1139_v22, -inf }
 0x76d   :  { %v1266_v46 = vmax.f32 %v1264_v40, %v1265_v53  ;;  %v1201_v33 = vmax.f32 %v1199_v16, %v1200_v4  ;;  %v1271_v27 = vmax.f32 %v1269_v35, %v1270_v18  ;;  %v6319_v49 = vpop.permute.xlu1 %1007  ;;  %v1196_v43 = vmax.f32 %v1194_v2, %v1195_v37  ;;  %v6328_v40 = vpop.permute.xlu0 %1111 }
 0x76e   :  { %8376 = vst [vmem:[#allocation29_spill] sm:$0xff] %v6319_v49  ;;  %v1140_v54 = vadd.f32 %v6206_v11, %v6319_v49  ;;  %v1155_v53 = vadd.f32 %v6297_v25, %v6208_v3 }
 0x76f   :  { %v1202_v62 = vrot.slane %v1201_v33, 2  ;;  %v1272_v47 = vrot.slane %v1271_v27, 4  ;;  %v1323_v55 = vsel %vm713_vm6, %v1196_v43, %v1322_v30  ;;  %v1267_v56 = vrot.slane %v1266_v46, 1 }
 0x770   :  { %v1207_v57 = vsel %vm115_vm2, %v1140_v54, -inf  ;;  %v1278_v54 = vsel %vm115_vm2, %v1155_v53, -inf }
 0x771   :  { %v1273_v18 = vmax.f32 %v1271_v27, %v1272_v47  ;;  %v1208_v16 = vmax.f32 %v1206_v58, %v1207_v57  ;;  %v6330_v2 = vpop.permute.xlu1 %1103  ;;  %v1203_v4 = vmax.f32 %v1201_v33, %v1202_v62  ;;  %v1268_v37 = vmax.f32 %v1266_v46, %v1267_v56  ;;  %v6343_v56 = vpop.permute.xlu0 %1027 }
 0x772   :  { %v1156_v35 = vadd.f32 %v6206_v11, %v6330_v2  ;;  %v1141_v47 = vadd.f32 %v6312_v17, %v6208_v3  ;;  %8378 = vst [vmem:[#allocation31_spill] sm:$0xff] %v6343_v56 }
 0x773   :  { %v1274_v30 = vrot.slane %v1273_v18, 2  ;;  %v1209_v43 = vrot.slane %v1208_v16, 4  ;;  %v1204_v38 = vrot.slane %v1203_v4, 1  ;;  %v1330_v22 = vsel %vm713_vm6, %v1268_v37, %v1329_v21 }
 0x774   :  { %v1279_v61 = vsel %vm115_vm2, %v1156_v35, -inf  ;;  %v1215_v35 = vsel %vm115_vm2, %v1141_v47, -inf }
 0x775   :  { %v1210_v27 = vmax.f32 %v1208_v16, %v1209_v43  ;;  %v1280_v58 = vmax.f32 %v1278_v54, %v1279_v61  ;;  %v6339_v57 = vpop.permute.xlu1 %1019  ;;  %v1205_v46 = vmax.f32 %v1203_v4, %v1204_v38  ;;  %v1275_v33 = vmax.f32 %v1273_v18, %v1274_v30 }
 0x776   :  { %8377 = vst [vmem:[#allocation30_spill] sm:$0xff] %v6339_v57  ;;  %v1142_v62 = vadd.f32 %v6206_v11, %v6339_v57  ;;  %v1157_v61 = vadd.f32 %v6328_v40, %v6208_v3 }
 0x777   :  { %v1281_v49 = vrot.slane %v1280_v58, 4  ;;  %v1211_v21 = vrot.slane %v1210_v27, 2  ;;  %v1324_v53 = vsel %vm715_vm7, %v1205_v46, %v1323_v55  ;;  %v1276_v37 = vrot.slane %v1275_v33, 1 }
 0x778   :  { %v1216_v17 = vsel %vm115_vm2, %v1142_v62, -inf  ;;  %v1287_v47 = vsel %vm115_vm2, %v1157_v61, -inf }
 0x779   :  { %v1282_v16 = vmax.f32 %v1280_v58, %v1281_v49  ;;  %v1217_v38 = vmax.f32 %v1215_v35, %v1216_v17  ;;  %v6350_v18 = vpop.permute.xlu1 %1115  ;;  %v1212_v4 = vmax.f32 %v1210_v27, %v1211_v21  ;;  %v1277_v30 = vmax.f32 %v1275_v33, %v1276_v37  ;;  %v6359_v17 = vpop.permute.xlu0 %1123 }
 0x77a   :  { %v1158_v43 = vadd.f32 %v6206_v11, %v6350_v18  ;;  %v1143_v49 = vadd.f32 %v6343_v56, %v6208_v3 }
 0x77b   :  { %v1218_v54 = vrot.slane %v1217_v38, 4  ;;  %v1213_v57 = vrot.slane %v1212_v4, 1  ;;  %v1283_v55 = vrot.slane %v1282_v16, 2  ;;  %v1331_v46 = vsel %vm715_vm7, %v1277_v30, %v1330_v22 }
 0x77c   :  { %v1288_v62 = vsel %vm115_vm2, %v1158_v43, -inf  ;;  %v1159_v43 = vadd.f32 %v6359_v17, %v6208_v3  ;;  %v1224_v56 = vsel %vm115_vm2, %v1143_v49, -inf }
 0x77d   :  { %v1289_v58 = vmax.f32 %v1287_v47, %v1288_v62  ;;  %v6361_v27 = vpop.permute.xlu1 %1031  ;;  %v1214_v33 = vmax.f32 %v1212_v4, %v1213_v57  ;;  %v1219_v21 = vmax.f32 %v1217_v38, %v1218_v54  ;;  %v1284_v37 = vmax.f32 %v1282_v16, %v1283_v55 }
 0x77e   :  { %8379 = vst [vmem:[#allocation32_spill] sm:$0xff] %v6361_v27  ;;  %v1144_v35 = vadd.f32 %v6206_v11, %v6361_v27  ;;  %v1296_v27 = vsel %vm115_vm2, %v1159_v43, -inf }
 0x77f   :  { %v1290_v32 = vrot.slane %v1289_v58, 4  ;;  %v1220_v22 = vrot.slane %v1219_v21, 2  ;;  %v1325_v61 = vsel %vm717_vm8, %v1214_v33, %v1324_v53  ;;  %v1285_v30 = vrot.slane %v1284_v37, 1 }
 0x780   :  { %v1225_v47 = vsel %vm115_vm2, %v1144_v35, -inf }
 0x781   :  { %v1226_v62 = vmax.f32 %v1224_v56, %v1225_v47  ;;  %v6370_v34 = vpop.permute.xlu1 %1127  ;;  %v1221_v57 = vmax.f32 %v1219_v21, %v1220_v22  ;;  %v1286_v16 = vmax.f32 %v1284_v37, %v1285_v30  ;;  %v1291_v38 = vmax.f32 %v1289_v58, %v1290_v32 }
 0x782   :  { %8380 = vst [vmem:[#allocation33_spill] sm:$0xff] %v6370_v34  ;;  %v1160_v4 = vadd.f32 %v6206_v11, %v6370_v34 }
 0x783   :  { %v1222_v54 = vrot.slane %v1221_v57, 1  ;;  %v1227_v55 = vrot.slane %v1226_v62, 4  ;;  %v1292_v53 = vrot.slane %v1291_v38, 2  ;;  %v1332_v33 = vsel %vm717_vm8, %v1286_v16, %v1331_v46 }
 0x784   :  { %v1297_v49 = vsel %vm115_vm2, %v1160_v4, -inf }
 0x785   :  { %v1298_v45 = vmax.f32 %v1296_v27, %v1297_v49  ;;  %v1223_v35 = vmax.f32 %v1221_v57, %v1222_v54  ;;  %v1228_v56 = vmax.f32 %v1226_v62, %v1227_v55  ;;  %v1293_v47 = vmax.f32 %v1291_v38, %v1292_v53 }
 0x787   :  { %v1229_v20 = vrot.slane %v1228_v56, 2  ;;  %v1326_v21 = vsel %vm719_vm9, %v1223_v35, %v1325_v61  ;;  %v1294_v32 = vrot.slane %v1293_v47, 1  ;;  %v1299_v58 = vrot.slane %v1298_v45, 4 }
 0x789   :  { %v1230_v37 = vmax.f32 %v1228_v56, %v1229_v20  ;;  %v1295_v22 = vmax.f32 %v1293_v47, %v1294_v32  ;;  %v1300_v30 = vmax.f32 %v1298_v45, %v1299_v58 }
 0x78b   :  { %v1231_v24 = vrot.slane %v1230_v37, 1  ;;  %v1301_v28 = vrot.slane %v1300_v30, 2  ;;  %v1333_v46 = vsel %vm719_vm9, %v1295_v22, %v1332_v33  ;;  %v1482_v22 = vld [vmem:[%s8302_s3 + $0x40] sm:$0xff] }
 0x78d   :  { %v1232_v16 = vmax.f32 %v1230_v37, %v1231_v24  ;;  %v1302_v43 = vmax.f32 %v1300_v30, %v1301_v28  ;;  %v933_v24 = vpop.permute.xlu1 %932  ;;  %v1483_v30 = vld [vmem:[%s8302_s3 + $0x48] sm:$0xff] }
 0x78e   :  { %v935_v28 = vadd.f32 %v933_v24, %v6208_v3  ;;  %v936_v33 = vadd.f32 %v6206_v11, %v933_v24  ;;  %v5780_v3 = vld [vmem:[%s8299_s0] sm:$0xff]  ;;  %v1487_v24 = vld [vmem:[%s8302_s3 + $0x68] sm:$0xff] }
 0x78f   :  { %v1327_v4 = vsel %vm721_vm10, %v1232_v16, %v1326_v21  ;;  %v1303_v27 = vrot.slane %v1302_v43, 1 }
 0x790   :  { %1335 = vrot.lane.b32.xlu1 %v1327_v4, %s5814_s28 }
 0x791   :  { %v1304_v62 = vmax.f32 %v1302_v43, %v1303_v27  ;;  %v5272_v43 = vpack.c.bf16 %v1483_v30, %v1482_v22  ;;  %v1484_v27 = vld [vmem:[%s8302_s3 + $0x50] sm:$0xff]  ;;  %v1497_v22 = vld [vmem:[%s8302_s3 + $0xb8] sm:$0xff] }
 0x793   :  { %v1334_v57 = vsel %vm721_vm10, %v1304_v62, %v1333_v46  ;;  %v1485_v62 = vld [vmem:[%s8302_s3 + $0x58] sm:$0xff] }
 0x794   :  { %1337 = vrot.lane.b32.xlu1 %v1334_v57, %s5814_s28  ;;  %v1481_v57 = vld [vmem:[#allocation3 + $0x8] sm:$0xff] }
 0x7d0   :  { %v735_v61 = vpop.xlane.xlu0 %734 }
 0x7d1   :  { %v736_v20 = vmul.f32 0.015625, %v735_v61  ;;  %v5275_v61 = vpack.c.bf16 %v1485_v62, %v1484_v27  ;;  %v1500_v62 = vld [vmem:[%s8302_s3 + $0xd0] sm:$0xff] }
 0x7d3   :  { %v6384_v45 = vsub.f32 %v6192_v63, %v736_v20  ;;  %v8382_v20 = vmov 0.0|0.0  }
 0x7d4   :  { %v6412_v16 = vpop.permute.xlu0 %1397 }
 0x7d5   :  { %v738_v38 = vmul.f32 %v6384_v45, %v6384_v45 }
 0x7d7   :  { %740 = vrot.lane.b32.xlu1 %v738_v38, %s5814_s28  ;;  %v1486_v38 = vld [vmem:[%s8302_s3 + $0x60] sm:$0xff] }
 0x802   :  { %v1336_v54 = vpop.permute.xlu1 %1335 }
 0x803   :  { %v1341_v55 = vadd.f32 %v1336_v54, %v935_v28  ;;  %v5278_v28 = vpack.c.bf16 %v1487_v24, %v1486_v38  ;;  %v1488_v54 = vld [vmem:[%s8302_s3 + $0x70] sm:$0xff]  ;;  %v1502_v38 = vld [vmem:[%s8302_s3 + $0xe0] sm:$0xff]  ;;  %v1503_v24 = vld [vmem:[%s8302_s3 + $0xe8] sm:$0xff] }
 0x805   :  { %v1343_v53 = vmul.f32 0.01, %v1341_v55 }
 0x806   :  { %v1338_v49 = vpop.permute.xlu1 %1337 }
 0x807   :  { %v6391_v35 = vmax.f32 %v1341_v55, %v1343_v53  ;;  %v1342_v56 = vadd.f32 %v1338_v49, %v936_v33  ;;  %v1489_v55 = vld [vmem:[%s8302_s3 + $0x78] sm:$0xff]  ;;  %v1490_v33 = vld [vmem:[%s8302_s3 + $0x80] sm:$0xff]  ;;  %v1491_v49 = vld [vmem:[%s8302_s3 + $0x88] sm:$0xff] }
 0x808   :  { %v5281_v53 = vpack.c.bf16 %v1489_v55, %v1488_v54  ;;  %v1504_v54 = vld [vmem:[%s8302_s3 + $0xf0] sm:$0xff]  ;;  %v1505_v55 = vld [vmem:[%s8302_s3 + $0xf8] sm:$0xff] }
 0x809   :  { %v1344_v47 = vmul.f32 0.01, %v1342_v56  ;;  %1349 = vrot.lane.b32.xlu1 %v6391_v35, %s5814_s28 }
 0x80b   :  { %v6395_v63 = vmax.f32 %v1342_v56, %v1344_v47  ;;  %v5284_v56 = vpack.c.bf16 %v1491_v49, %v1490_v33  ;;  %v1492_v47 = vld [vmem:[%s8302_s3 + $0x90] sm:$0xff] }
 0x80d   :  { %1351 = vrot.lane.b32.xlu1 %v6395_v63, %s5814_s28 }
 0x811   :  { %1395 = vrot.lane.b32.xlu1 %v5780_v3, %s5813_s27  ;;  %v1493_v3 = vld [vmem:[%s8302_s3 + $0x98] sm:$0xff] }
 0x849   :  { %v741_v11 = vpop.permute.xlu1 %740 }
 0x84a   :  { %v743_v21 = vsel %vm115_vm2, %v741_v11, 0.0  ;;  %v5287_v11 = vpack.c.bf16 %v1493_v3, %v1492_v47 }
 0x84b   :  { %744 = vadd.xlane.f32.xlu1 %v743_v21  ;;  %v1494_v21 = vld [vmem:[%s8302_s3 + $0xa0] sm:$0xff] }
 0x87b   :  { %v1350_v32 = vpop.permute.xlu1 %1349 }
 0x87c   :  { %v1355_v58 = vsel %vm115_vm2, %v1350_v32, 0.0  ;;  %v1495_v32 = vld [vmem:[%s8302_s3 + $0xa8] sm:$0xff] }
 0x87d   :  { %1356 = vadd.xlane.f32.xlu0 %v1355_v58  ;;  %v5290_v58 = vpack.c.bf16 %v1495_v32, %v1494_v21 }
 0x87f   :  { %v1352_v37 = vpop.permute.xlu1 %1351 }
 0x880   :  { %v1358_v46 = vsel %vm115_vm2, %v1352_v37, 0.0  ;;  %v1496_v37 = vld [vmem:[%s8302_s3 + $0xb0] sm:$0xff] }
 0x881   :  { %1359 = vadd.xlane.f32.xlu1 %v1358_v46  ;;  %v5293_v30 = vpack.c.bf16 %v1497_v22, %v1496_v37  ;;  %v1498_v46 = vld [vmem:[%s8302_s3 + $0xc0] sm:$0xff] }
 0x883   :  { %v6414_v4 = vpop.permute.xlu1 %1395 }
 0x884   :  { %8381 = vst [vmem:[#allocation34_spill] sm:$0xff] %v6414_v4  ;;  %5073 = vmatprep.mubr.msk.f32.mxu1 %vm39_vm0, %v6414_v4 }
 0x885   :  { %5074 = vmatmul.mubr.msk.f32.vlgmr.msra.gmra.mrb[2].mxu1 %vm39_vm0, %v6412_v16 }
 0x886   :  { %4582 = vmatprep.mubr.msk.f32.mxu1 %vm115_vm2, %v1481_v57  ;;  %5273 = vmatpush1.bf16.msra.mxu1 %v5272_v43  ;;  %v1499_v43 = vld [vmem:[%s8302_s3 + $0xc8] sm:$0xff]  ;;  %v1501_v57 = vld [vmem:[%s8302_s3 + $0xd8] sm:$0xff] }
 0x887   :  { %5274 = vmatprep.subr.bf16.mxu1 %v8382_v20  ;;  %v5296_v27 = vpack.c.bf16 %v1499_v43, %v1498_v46 }
 0x88a   :  { %5276 = vmatpush1.bf16.msra.mxu1 %v5275_v61  ;;  %v5299_v61 = vpack.c.bf16 %v1501_v57, %v1500_v62 }
 0x88b   :  { %5277 = vmatprep.subr.bf16.mxu1 %v8382_v20 }
 0x88e   :  { %5279 = vmatpush1.bf16.msra.mxu1 %v5278_v28  ;;  %v5302_v28 = vpack.c.bf16 %v1503_v24, %v1502_v38 }
 0x88f   :  { %5280 = vmatprep.subr.bf16.mxu1 %v8382_v20 }
 0x892   :  { %751 = vrot.lane.b32.xlu1 %v5921_v39, %s5814_s28  ;;  %5282 = vmatpush1.bf16.msra.mxu1 %v5281_v53  ;;  %v5305_v53 = vpack.c.bf16 %v1505_v55, %v1504_v54 }
 0x893   :  { %756 = vrot.lane.b32.xlu0 %v5924_v42, %s5814_s28  ;;  %5283 = vmatprep.subr.bf16.mxu1 %v8382_v20 }
 0x896   :  { %5285 = vmatpush1.bf16.msra.mxu1 %v5284_v56 }
 0x897   :  { %5286 = vmatprep.subr.bf16.mxu1 %v8382_v20 }
 0x89a   :  { %5288 = vmatpush1.bf16.msra.mxu1 %v5287_v11 }
 0x89b   :  { %5289 = vmatprep.subr.bf16.mxu1 %v8382_v20 }
 0x89e   :  { %5291 = vmatpush1.bf16.msra.mxu1 %v5290_v58 }
 0x89f   :  { %5292 = vmatprep.subr.bf16.mxu1 %v8382_v20 }
 0x8a2   :  { %5294 = vmatpush1.bf16.msra.mxu1 %v5293_v30 }
 0x8a3   :  { %5295 = vmatprep.subr.bf16.mxu1 %v8382_v20 }
 0x8a6   :  { %5297 = vmatpush1.bf16.msra.mxu1 %v5296_v27 }
 0x8a7   :  { %5298 = vmatprep.subr.bf16.mxu1 %v8382_v20 }
 0x8aa   :  { %5300 = vmatpush1.bf16.msra.mxu1 %v5299_v61 }
 0x8ab   :  { %5301 = vmatprep.subr.bf16.mxu1 %v8382_v20 }
 0x8ae   :  { %5303 = vmatpush1.bf16.msra.mxu1 %v5302_v28 }
 0x8af   :  { %5304 = vmatprep.subr.bf16.mxu1 %v8382_v20 }
 0x8b2   :  { %5306 = vmatpush1.bf16.msra.mxu1 %v5305_v53 }
 0x8d8   :  { %v745_v33 = vpop.xlane.xlu1 %744 }
 0x8d9   :  { %v746_v49 = vmul.f32 0.015625, %v745_v33 }
 0x8db   :  { %v747_v56 = vadd.f32 1e-05, %v746_v49 }
 0x8dd   :  { %5754 = vrsqrt.f32 %v747_v56 }
 0x8e7   :  { %v5755_v21 = vpop.eup %5754 }
 0x8e8   :  { %v749_v22 = vmul.f32 %v5755_v21, %v6384_v45 }
 0x90a   :  { %v1357_v47 = vpop.xlane.xlu0 %1356 }
 0x90b   :  { %v1361_v3 = vmul.f32 0.015625, %v1357_v47 }
 0x90d   :  { %v6503_v11 = vsub.f32 %v6391_v35, %v1361_v3 }
 0x90e   :  { %v1360_v32 = vpop.xlane.xlu1 %1359  ;;  %v6514_v43 = vpop.permute.xlu0 %756 }
 0x90f   :  { %v1362_v58 = vmul.f32 0.015625, %v1360_v32  ;;  %v1365_v37 = vmul.f32 %v6503_v11, %v6503_v11 }
 0x911   :  { %v6509_v30 = vsub.f32 %v6395_v63, %v1362_v58  ;;  %1369 = vrot.lane.b32.xlu1 %v1365_v37, %s5814_s28 }
 0x912   :  { %v6512_v46 = vpop.permute.xlu1 %751 }
 0x913   :  { %v754_v35 = vmul.f32 %v6512_v46, %v749_v22  ;;  %v1366_v27 = vmul.f32 %v6509_v30, %v6509_v30 }
 0x915   :  { %v759_v62 = vadd.f32 %v6514_v43, %v754_v35  ;;  %1371 = vrot.lane.b32.xlu1 %v1366_v27, %s5814_s28 }
 0x917   :  { %761 = vst.msk [vmem:[#allocation3] sm:$0xff] %vm760_vm11, %v759_v62 }
 0x91e   :  { %v6522_v45 = vld [vmem:[#allocation3] sm:$0xff] }
 0x91f   :  { %1574 = vmatmul.mubr.f32.vlgmr.msra.gmra.mrb[4].mxu1 %v6522_v45 }
 0x920   :  { %5085 = vmatprep.mubr.msk.f32.mxu1 %vm39_vm0, %v6414_v4 }
 0x958   :  { %v5075_v63 = vpop.f32.mrb[2].mxu1 }
 0x959   :  { %1479 = vst.msk [vmem:[#allocation2 + $0x48] sm:$0xff] %vm115_vm2, %v5075_v63  ;;  %v1469_v57 = vpop.f32.mrb[3].mxu1 }
 0x95a   :  { %1478 = vst.msk [vmem:[#allocation2 + $0x8] sm:$0xff] %vm115_vm2, %v1469_v57 }
 0x983   :  { %v1370_v61 = vpop.permute.xlu1 %1369 }
 0x984   :  { %v1375_v38 = vsel %vm115_vm2, %v1370_v61, 0.0 }
 0x985   :  { %1376 = vadd.xlane.f32.xlu1 %v1375_v38 }
 0x987   :  { %v1372_v24 = vpop.permute.xlu1 %1371 }
 0x988   :  { %v1378_v28 = vsel %vm115_vm2, %v1372_v24, 0.0 }
 0x989   :  { %1379 = vadd.xlane.f32.xlu0 %v1378_v28 }
 0x9f2   :  { %v6531_v54 = vpop.f32.mrb[4].mxu1 }
 0x9f3   :  { %v1577_v55 = vpop.f32.mrb[5].mxu1  ;;  %v1588_v53 = vadd.f32 %v6531_v54, %v6070_v8  ;;  %v1589_v33 = vadd.f32 %v6531_v54, %v6077_v12  ;;  %v1590_v49 = vadd.f32 %v6531_v54, %v6087_v23  ;;  %v1591_v3 = vadd.f32 %v6531_v54, %v6081_v14 }
 0x9f4   :  { %v1592_v22 = vadd.f32 %v6531_v54, %v6097_v44  ;;  %v1593_v24 = vadd.f32 %v6531_v54, %v6091_v26 }
 0x9f5   :  { %v1596_v56 = vsel %vm115_vm2, %v1588_v53, -inf  ;;  %v1603_v47 = vsel %vm115_vm2, %v1589_v33, -inf  ;;  %v1610_v58 = vsel %vm115_vm2, %v1590_v49, -inf  ;;  %v1617_v57 = vsel %vm115_vm2, %v1591_v3, -inf }
 0x9f6   :  { %v1597_v21 = vrot.slane %v1596_v56, 4  ;;  %v1604_v32 = vrot.slane %v1603_v47, 4  ;;  %v1611_v35 = vrot.slane %v1610_v58, 4  ;;  %v1618_v55 = vrot.slane %v1617_v57, 4 }
 0x9f7   :  { %v1624_v53 = vsel %vm115_vm2, %v1592_v22, -inf  ;;  %v1631_v3 = vsel %vm115_vm2, %v1593_v24, -inf }
 0x9f8   :  { %v1598_v62 = vmax.f32 %v1596_v56, %v1597_v21  ;;  %v1605_v63 = vmax.f32 %v1603_v47, %v1604_v32  ;;  %v1612_v28 = vmax.f32 %v1610_v58, %v1611_v35  ;;  %v1594_v56 = vadd.f32 %v6531_v54, %v6109_v0 }
 0x9f9   :  { %v1625_v21 = vrot.slane %v1624_v53, 4  ;;  %v1595_v58 = vadd.f32 %v6531_v54, %v6103_v52  ;;  %v1632_v22 = vrot.slane %v1631_v3, 4 }
 0x9fa   :  { %v1599_v49 = vrot.slane %v1598_v62, 2  ;;  %v1606_v42 = vrot.slane %v1605_v63, 2  ;;  %v1613_v47 = vrot.slane %v1612_v28, 2  ;;  %v1638_v35 = vsel %vm115_vm2, %v1594_v56, -inf }
 0x9fb   :  { %v1639_v0 = vrot.slane %v1638_v35, 4  ;;  %v1645_v14 = vsel %vm115_vm2, %v1595_v58, -inf  ;;  %v1633_v24 = vmax.f32 %v1631_v3, %v1632_v22 }
 0x9fc   :  { %v1600_v32 = vmax.f32 %v1598_v62, %v1599_v49  ;;  %v1646_v49 = vrot.slane %v1645_v14, 4 }
 0x9fe   :  { %v1647_v22 = vmax.f32 %v1645_v14, %v1646_v49 }
 0xa12   :  { %v1377_v37 = vpop.xlane.xlu1 %1376 }
 0xa13   :  { %v1381_v27 = vmul.f32 0.015625, %v1377_v37  ;;  %v1607_v37 = vmax.f32 %v1605_v63, %v1606_v42 }
 0xa15   :  { %v1383_v61 = vadd.f32 1e-05, %v1381_v27  ;;  %v1619_v27 = vmax.f32 %v1617_v57, %v1618_v55  ;;  %v1608_v26 = vrot.slane %v1607_v37, 1 }
 0xa16   :  { %v1380_v38 = vpop.xlane.xlu0 %1379 }
 0xa17   :  { %5756 = vrsqrt.f32 %v1383_v61  ;;  %v1382_v33 = vmul.f32 0.015625, %v1380_v38  ;;  %v1614_v61 = vmax.f32 %v1612_v28, %v1613_v47  ;;  %v1626_v38 = vmax.f32 %v1624_v53, %v1625_v21 }
 0xa18   :  { %v1620_v44 = vrot.slane %v1619_v27, 2  ;;  %v1609_v57 = vmax.f32 %v1607_v37, %v1608_v26  ;;  %v1640_v28 = vmax.f32 %v1638_v35, %v1639_v0  ;;  %v1634_v47 = vrot.slane %v1633_v24, 2 }
 0xa19   :  { %v1384_v39 = vadd.f32 1e-05, %v1382_v33  ;;  %v1601_v33 = vrot.slane %v1600_v32, 1  ;;  %v1615_v42 = vrot.slane %v1614_v61, 1  ;;  %v1627_v62 = vrot.slane %v1626_v38, 2 }
 0xa1a   :  { %v1621_v55 = vmax.f32 %v1619_v27, %v1620_v44  ;;  %v1641_v44 = vrot.slane %v1640_v28, 2  ;;  %v1648_v35 = vrot.slane %v1647_v22, 2 }
 0xa1b   :  { %5758 = vrsqrt.f32 %v1384_v39  ;;  %v1602_v63 = vmax.f32 %v1600_v32, %v1601_v33  ;;  %v1616_v58 = vmax.f32 %v1614_v61, %v1615_v42  ;;  %v1628_v12 = vmax.f32 %v1626_v38, %v1627_v62 }
 0xa1c   :  { %v1622_v3 = vrot.slane %v1621_v55, 1 }
 0xa1d   :  { %v1629_v32 = vrot.slane %v1628_v12, 1 }
 0xa1e   :  { %v1623_v27 = vmax.f32 %v1621_v55, %v1622_v3 }
 0xa1f   :  { %v1630_v38 = vmax.f32 %v1628_v12, %v1629_v32  ;;  %v6579_v12 = vld [vmem:[#allocation2 + $0x48] sm:$0xff] }
 0xa21   :  { %v5757_v23 = vpop.eup %5756 }
 0xa22   :  { %v1387_v39 = vmul.f32 %v5757_v23, %v6503_v11  ;;  %v1660_v23 = vsel %vm709_vm3, %v1609_v57, %v1602_v63  ;;  %v1635_v11 = vmax.f32 %v1633_v24, %v1634_v47  ;;  %v5781_v57 = vld [vmem:[%s8301_s2] sm:$0xff] }
 0xa23   :  { %v1661_v37 = vsel %vm711_vm4, %v1616_v58, %v1660_v23  ;;  %v1582_v55 = vrot.slane %v5781_v57, %v5912_v36  ;;  %v1796_v57 = vld [vmem:[%s8302_s3 + $0x2e0] sm:$0xff] }
 0xa24   :  { %v1389_v56 = vmul.f32 %v1387_v39, %v6512_v46  ;;  %v1636_v61 = vrot.slane %v1635_v11, 1  ;;  %v1662_v14 = vsel %vm713_vm6, %v1623_v27, %v1661_v37  ;;  %v1698_v39 = vld [vmem:[#allocation2 + $0x8] sm:$0xff] }
 0xa25   :  { %v5759_v53 = vpop.eup %5758  ;;  %v1663_v62 = vsel %vm715_vm7, %v1630_v38, %v1662_v14 }
 0xa26   :  { %v1391_v21 = vadd.f32 %v1389_v56, %v6514_v43  ;;  %v1388_v52 = vmul.f32 %v5759_v53, %v6509_v30  ;;  %v1642_v30 = vmax.f32 %v1640_v28, %v1641_v44  ;;  %v1637_v63 = vmax.f32 %v1635_v11, %v1636_v61 }
 0xa28   :  { %1393 = vst.msk [vmem:[#allocation2] sm:$0xff] %vm760_vm11, %v1391_v21  ;;  %v1390_v26 = vmul.f32 %v1388_v52, %v6512_v46  ;;  %v1649_v52 = vmax.f32 %v1647_v22, %v1648_v35  ;;  %v1643_v42 = vrot.slane %v1642_v30, 1  ;;  %v1664_v28 = vsel %vm717_vm8, %v1637_v63, %v1663_v62  ;;  %v1792_v35 = vld [vmem:[%s8302_s3 + $0x2c0] sm:$0xff] }
 0xa2a   :  { %v1392_v0 = vadd.f32 %v1390_v26, %v6514_v43  ;;  %v1650_v56 = vrot.slane %v1649_v52, 1  ;;  %v1644_v47 = vmax.f32 %v1642_v30, %v1643_v42  ;;  %v1793_v30 = vld [vmem:[%s8302_s3 + $0x2c8] sm:$0xff]  ;;  %v1795_v42 = vld [vmem:[%s8302_s3 + $0x2d8] sm:$0xff] }
 0xa2c   :  { %1394 = vst.msk [vmem:[#allocation2 + $0x40] sm:$0xff] %vm760_vm11, %v1392_v0  ;;  %v1665_v21 = vsel %vm719_vm9, %v1644_v47, %v1664_v28  ;;  %v1651_v58 = vmax.f32 %v1649_v52, %v1650_v56  ;;  %v5311_v52 = vpack.c.bf16 %v1793_v30, %v1792_v35  ;;  %v1799_v28 = vld [vmem:[%s8302_s3 + $0x2f8] sm:$0xff]  ;;  %v1800_v47 = vld [vmem:[%s8302_s3 + $0x300] sm:$0xff]  ;;  %v1810_v30 = vld [vmem:[%s8302_s3 + $0x350] sm:$0xff] }
 0xa2e   :  { %v1666_v36 = vsel %vm721_vm10, %v1651_v58, %v1665_v21  ;;  %v1801_v21 = vld [vmem:[%s8302_s3 + $0x308] sm:$0xff] }
 0xa2f   :  { %v6568_v33 = vld [vmem:[#allocation2] sm:$0xff]  ;;  %v5323_v58 = vpack.c.bf16 %v1801_v21, %v1800_v47  ;;  %v2300_v21 = vld [vmem:[%s8302_s3 + $0x228] sm:$0xff] }
 0xa30   :  { %v5722_v24 = vpack.i.bf16 %v1698_v39, %v6568_v33  ;;  %v2299_v47 = vld [vmem:[%s8302_s3 + $0x220] sm:$0xff] }
 0xa32   :  { %5723 = vrot.lane.b32.xlu1 %v5722_v24, %s5814_s28 }
 0xa33   :  { %v6577_v49 = vld [vmem:[#allocation2 + $0x40] sm:$0xff] }
 0xa34   :  { %v5727_v53 = vpack.i.bf16 %v6579_v12, %v6577_v49 }
 0xa36   :  { %5728 = vrot.lane.b32.xlu0 %v5727_v53, %s5814_s28  ;;  %1584 = vrot.lane.b32.xlu1 %v1582_v55, %s5814_s28  ;;  %v1797_v55 = vld [vmem:[%s8302_s3 + $0x2e8] sm:$0xff] }
 0xa37   :  { %v5317_v56 = vpack.c.bf16 %v1797_v55, %v1796_v57  ;;  %v2295_v57 = vld [vmem:[%s8302_s3 + $0x200] sm:$0xff]  ;;  %v2296_v55 = vld [vmem:[%s8302_s3 + $0x208] sm:$0xff] }
 0xa3a   :  { %1667 = vrot.lane.b32.xlu1 %v1666_v36, %s5814_s28  ;;  %v1802_v36 = vld [vmem:[%s8302_s3 + $0x310] sm:$0xff] }
 0xaa4   :  { %v5724_v3 = vpop.permute.xlu1 %5723 }
 0xaa5   :  { %v5726_v22 = vunpack.i.h.bf16 %v5724_v3  ;;  %v5725_v23 = vunpack.i.l.bf16 %v5724_v3  ;;  %v1803_v3 = vld [vmem:[%s8302_s3 + $0x318] sm:$0xff] }
 0xaa7   :  { %v1713_v32 = vsel %vm115_vm2, %v5725_v23, %v5726_v22  ;;  %v5326_v22 = vpack.c.bf16 %v1803_v3, %v1802_v36  ;;  %v1804_v23 = vld [vmem:[%s8302_s3 + $0x320] sm:$0xff]  ;;  %v2302_v36 = vld [vmem:[%s8302_s3 + $0x238] sm:$0xff] }
 0xaa8   :  { %v5729_v26 = vpop.permute.xlu0 %5728  ;;  %v1585_v44 = vpop.permute.xlu1 %1584 }
 0xaa9   :  { %v5731_v11 = vunpack.i.h.bf16 %v5729_v26  ;;  %v5730_v0 = vunpack.i.l.bf16 %v5729_v26  ;;  %v1587_v27 = vadd.f32 %v1585_v44, %v6531_v54  ;;  %v1794_v54 = vld [vmem:[%s8302_s3 + $0x2d0] sm:$0xff]  ;;  %v1805_v26 = vld [vmem:[%s8302_s3 + $0x328] sm:$0xff] }
 0xaaa   :  { %v5314_v63 = vpack.c.bf16 %v1795_v42, %v1794_v54  ;;  %v5329_v44 = vpack.c.bf16 %v1805_v26, %v1804_v23  ;;  %v1814_v54 = vld [vmem:[%s8302_s3 + $0x370] sm:$0xff]  ;;  %v1815_v42 = vld [vmem:[%s8302_s3 + $0x378] sm:$0xff] }
 0xaab   :  { %v1714_v37 = vsel %vm115_vm2, %v5730_v0, %v5731_v11  ;;  %v1806_v11 = vld [vmem:[%s8302_s3 + $0x330] sm:$0xff]  ;;  %v1807_v0 = vld [vmem:[%s8302_s3 + $0x338] sm:$0xff] }
 0xaac   :  { %v5308_v61 = vpack.c.bf16 %v1714_v37, %v1713_v32  ;;  %v1668_v14 = vpop.permute.xlu1 %1667  ;;  %v5332_v32 = vpack.c.bf16 %v1807_v0, %v1806_v11  ;;  %v1808_v37 = vld [vmem:[%s8302_s3 + $0x340] sm:$0xff]  ;;  %v2305_v26 = vld [vmem:[%s8302_s3 + $0x250] sm:$0xff] }
 0xaad   :  { %v1670_v38 = vadd.f32 %v1668_v14, %v1587_v27  ;;  %v1809_v27 = vld [vmem:[%s8302_s3 + $0x348] sm:$0xff]  ;;  %v2307_v0 = vld [vmem:[%s8302_s3 + $0x260] sm:$0xff] }
 0xaae   :  { %5309 = vmatpush3.bf16.msra.mxu0 %v5308_v61  ;;  %v5335_v35 = vpack.c.bf16 %v1809_v27, %v1808_v37  ;;  %v1811_v61 = vld [vmem:[%s8302_s3 + $0x358] sm:$0xff]  ;;  %v2309_v27 = vld [vmem:[%s8302_s3 + $0x270] sm:$0xff] }
 0xaaf   :  { %v1671_v24 = vmul.f32 0.01, %v1670_v38  ;;  %5310 = vmatprep.subr.bf16.mxu0 %v8382_v20  ;;  %v5338_v14 = vpack.c.bf16 %v1811_v61, %v1810_v30 }
 0xab1   :  { %v6605_v62 = vmax.f32 %v1670_v38, %v1671_v24  ;;  %5081 = vmatmul.mubr.msk.f32.vlgmr.msra.gmra.mrb[12].mxu0 %vm764_vm5, %v6074_v9  ;;  %v1812_v38 = vld [vmem:[%s8302_s3 + $0x360] sm:$0xff] }
 0xab2   :  { %5312 = vmatpush1.bf16.msra.mxu0 %v5311_v52  ;;  %4584 = vmatprep.mubr.msk.f32.mxu0 %vm115_vm2, %v1698_v39  ;;  %v1798_v39 = vld [vmem:[%s8302_s3 + $0x2f0] sm:$0xff]  ;;  %v1813_v52 = vld [vmem:[%s8302_s3 + $0x368] sm:$0xff] }
 0xab3   :  { %1674 = vrot.lane.b32.xlu1 %v6605_v62, %s5814_s28  ;;  %5313 = vmatprep.subr.bf16.mxu0 %v8382_v20  ;;  %v5320_v53 = vpack.c.bf16 %v1799_v28, %v1798_v39  ;;  %v5341_v24 = vpack.c.bf16 %v1813_v52, %v1812_v38  ;;  %v2297_v39 = vld [vmem:[%s8302_s3 + $0x210] sm:$0xff]  ;;  %v2298_v28 = vld [vmem:[%s8302_s3 + $0x218] sm:$0xff]  ;;  %v6749_v38 = vld [vmem:[%s8301_s2 + $0x8] sm:$0xff] }
 0xab4   :  { %v1900_v52 = vrot.slane %v6749_v38, %v5868_v5 }
 0xab6   :  { %5315 = vmatpush1.bf16.msra.mxu0 %v5314_v63  ;;  %v5344_v63 = vpack.c.bf16 %v1815_v42, %v1814_v54 }
 0xab7   :  { %5316 = vmatprep.subr.bf16.mxu0 %v8382_v20 }
 0xaba   :  { %5318 = vmatpush1.bf16.msra.mxu0 %v5317_v56  ;;  %v5379_v56 = vpack.c.bf16 %v2296_v55, %v2295_v57 }
 0xabb   :  { %5319 = vmatprep.subr.bf16.mxu0 %v8382_v20 }
 0xabe   :  { %5321 = vmatpush1.bf16.msra.mxu0 %v5320_v53  ;;  %v5382_v53 = vpack.c.bf16 %v2298_v28, %v2297_v39 }
 0xabf   :  { %5322 = vmatprep.subr.bf16.mxu0 %v8382_v20 }
 0xac2   :  { %5324 = vmatpush1.bf16.msra.mxu0 %v5323_v58  ;;  %v5385_v58 = vpack.c.bf16 %v2300_v21, %v2299_v47 }
 0xac3   :  { %5325 = vmatprep.subr.bf16.mxu0 %v8382_v20 }
 0xac6   :  { %5327 = vmatpush1.bf16.msra.mxu0 %v5326_v22  ;;  %v2304_v22 = vld [vmem:[%s8302_s3 + $0x248] sm:$0xff] }
 0xac7   :  { %5328 = vmatprep.subr.bf16.mxu0 %v8382_v20 }
 0xaca   :  { %5330 = vmatpush1.bf16.msra.mxu0 %v5329_v44  ;;  %v2306_v44 = vld [vmem:[%s8302_s3 + $0x258] sm:$0xff] }
 0xacb   :  { %5331 = vmatprep.subr.bf16.mxu0 %v8382_v20  ;;  %v5394_v11 = vpack.c.bf16 %v2306_v44, %v2305_v26 }
 0xace   :  { %5333 = vmatpush1.bf16.msra.mxu0 %v5332_v32  ;;  %v2308_v32 = vld [vmem:[%s8302_s3 + $0x268] sm:$0xff] }
 0xacf   :  { %5334 = vmatprep.subr.bf16.mxu0 %v8382_v20  ;;  %v5397_v37 = vpack.c.bf16 %v2308_v32, %v2307_v0 }
 0xad2   :  { %5336 = vmatpush1.bf16.msra.mxu0 %v5335_v35  ;;  %v2310_v35 = vld [vmem:[%s8302_s3 + $0x278] sm:$0xff] }
 0xad3   :  { %5337 = vmatprep.subr.bf16.mxu0 %v8382_v20  ;;  %v5400_v30 = vpack.c.bf16 %v2310_v35, %v2309_v27 }
 0xad6   :  { %5339 = vmatpush1.bf16.msra.mxu0 %v5338_v14 }
 0xad7   :  { %5340 = vmatprep.subr.bf16.mxu0 %v8382_v20 }
 0xada   :  { %5342 = vmatpush1.bf16.msra.mxu0 %v5341_v24 }
 0xadb   :  { %5343 = vmatprep.subr.bf16.mxu0 %v8382_v20 }
 0xade   :  { %5345 = vmatpush1.bf16.msra.mxu0 %v5344_v63 }
 0xadf   :  { %5378 = vmatprep.subr.bf16.mxu0 %v8382_v20 }
 0xae1   :  { %1887 = vmatmul.mubr.f32.vlgmr.msra.gmra.mrb[14].mxu0 %v6568_v33  ;;  %v8383_v33 = vmov 0.0  }
 0xae2   :  { %4585 = vmatprep.mubr.msk.f32.mxu0 %vm115_vm2, %v6579_v12  ;;  %5380 = vmatpush3.bf16.msra.mxu0 %v5379_v56  ;;  %v2301_v12 = vld [vmem:[%s8302_s3 + $0x230] sm:$0xff] }
 0xae3   :  { %5381 = vmatprep.subr.bf16.mxu0 %v8382_v20  ;;  %v5388_v3 = vpack.c.bf16 %v2302_v36, %v2301_v12 }
 0xae5   :  { %1892 = vmatmul.mubr.f32.gmra.mrb[16].mxu0 %v6577_v49  ;;  %v2303_v49 = vld [vmem:[%s8302_s3 + $0x240] sm:$0xff] }
 0xae6   :  { %5383 = vmatpush3.bf16.msra.mxu0 %v5382_v53  ;;  %5120 = vmatprep.mubr.msk.f32.mxu0 %vm5811_vm1, %v8383_v33  ;;  %v5391_v23 = vpack.c.bf16 %v2304_v22, %v2303_v49 }
 0xae7   :  { %5384 = vmatprep.subr.bf16.mxu0 %v8382_v20 }
 0xaea   :  { %5386 = vmatpush3.bf16.msra.mxu0 %v5385_v58 }
 0xaeb   :  { %5387 = vmatprep.subr.bf16.mxu0 %v8382_v20 }
 0xaee   :  { %5389 = vmatpush3.bf16.msra.mxu0 %v5388_v3 }
 0xaef   :  { %5390 = vmatprep.subr.bf16.mxu0 %v8382_v20 }
 0xaf2   :  { %5392 = vmatpush3.bf16.msra.mxu0 %v5391_v23 }
 0xaf3   :  { %5393 = vmatprep.subr.bf16.mxu0 %v8382_v20 }
 0xaf6   :  { %5395 = vmatpush3.bf16.msra.mxu0 %v5394_v11 }
 0xaf7   :  { %5396 = vmatprep.subr.bf16.mxu0 %v8382_v20 }
 0xafa   :  { %5398 = vmatpush3.bf16.msra.mxu0 %v5397_v37 }
 0xafb   :  { %5399 = vmatprep.subr.bf16.mxu0 %v8382_v20 }
 0xafe   :  { %5401 = vmatpush3.bf16.msra.mxu0 %v5400_v30 }
 0xb25   :  { %v1675_v61 = vpop.permute.xlu1 %1674 }
 0xb26   :  { %v1677_v14 = vsel %vm115_vm2, %v1675_v61, 0.0 }
 0xb27   :  { %1678 = vadd.xlane.f32.xlu0 %v1677_v14 }
 0xb3d   :  { %1902 = vrot.lane.b32.xlu0 %v1900_v52, %s5814_s28 }
 0xb84   :  { %v1783_v24 = vpop.f32.mrb[12].mxu0 }
 0xb85   :  { %1787 = vst [vmem:[#allocation3 + $0x10] sm:$0xff] %v1783_v24  ;;  %v5082_v54 = vpop.f32.mrb[13].mxu0  ;;  %5121 = vmatmul.mubr.f32.vlgmr.msra.gmra.mrb[18].mxu0 %v1783_v24 }
 0xbb4   :  { %v1679_v42 = vpop.xlane.xlu0 %1678  ;;  %v6754_v63 = vpop.f32.mrb[14].mxu0 }
 0xbb5   :  { %v1680_v57 = vmul.f32 0.015625, %v1679_v42  ;;  %v1890_v55 = vpop.f32.mrb[15].mxu0  ;;  %v1923_v56 = vadd.f32 %v6754_v63, %v6204_v10  ;;  %v1925_v39 = vadd.f32 %v6754_v63, %v6210_v13  ;;  %v1927_v5 = vadd.f32 %v6754_v63, %v6214_v6 }
 0xbb6   :  { %v1929_v28 = vadd.f32 %v6754_v63, %v6237_v48  ;;  %v1931_v53 = vadd.f32 %v6754_v63, %v6265_v51  ;;  %v1933_v47 = vadd.f32 %v6754_v63, %v6297_v25  ;;  %v1935_v58 = vadd.f32 %v6754_v63, %v6328_v40 }
 0xbb7   :  { %v6769_v21 = vsub.f32 %v6605_v62, %v1680_v57  ;;  %v1937_v12 = vadd.f32 %v6754_v63, %v6359_v17  ;;  %v2011_v36 = vsel %vm115_vm2, %v1923_v56, -inf  ;;  %v2020_v49 = vsel %vm115_vm2, %v1925_v39, -inf }
 0xbb8   :  { %v6776_v3 = vpop.f32.mrb[16].mxu0  ;;  %v2029_v22 = vsel %vm115_vm2, %v1927_v5, -inf  ;;  %v2038_v23 = vsel %vm115_vm2, %v1929_v28, -inf  ;;  %v2047_v26 = vsel %vm115_vm2, %v1931_v53, -inf  ;;  %v2056_v32 = vsel %vm115_vm2, %v1933_v47, -inf }
 0xbb9   :  { %v1895_v62 = vpop.f32.mrb[17].mxu0  ;;  %v1682_v44 = vmul.f32 %v6769_v21, %v6769_v21  ;;  %v1924_v11 = vadd.f32 %v6776_v3, %v6239_v50  ;;  %v1926_v0 = vadd.f32 %v6776_v3, %v6247_v60  ;;  %v1928_v37 = vadd.f32 %v6776_v3, %v6267_v59 }
 0xbba   :  { %v1930_v27 = vadd.f32 %v6776_v3, %v6288_v41  ;;  %v1932_v35 = vadd.f32 %v6776_v3, %v6308_v7  ;;  %v1934_v30 = vadd.f32 %v6776_v3, %v6330_v2  ;;  %v1936_v61 = vadd.f32 %v6776_v3, %v6350_v18 }
 0xbbb   :  { %1684 = vrot.lane.b32.xlu1 %v1682_v44, %s5814_s28  ;;  %v1938_v14 = vadd.f32 %v6776_v3, %v6370_v34  ;;  %v2012_v52 = vsel %vm115_vm2, %v1924_v11, -inf  ;;  %v2021_v24 = vsel %vm115_vm2, %v1926_v0, -inf  ;;  %v2030_v57 = vsel %vm115_vm2, %v1928_v37, -inf }
 0xbbc   :  { %v2013_v54 = vmax.f32 %v2011_v36, %v2012_v52  ;;  %v2022_v42 = vmax.f32 %v2020_v49, %v2021_v24  ;;  %v2039_v55 = vsel %vm115_vm2, %v1930_v27, -inf  ;;  %v2031_v56 = vmax.f32 %v2029_v22, %v2030_v57 }
 0xbbd   :  { %v2040_v39 = vmax.f32 %v2038_v23, %v2039_v55  ;;  %v2048_v5 = vsel %vm115_vm2, %v1932_v35, -inf  ;;  %v2057_v28 = vsel %vm115_vm2, %v1934_v30, -inf  ;;  %v2065_v0 = vsel %vm115_vm2, %v1935_v58, -inf }
 0xbbe   :  { %v2014_v53 = vrot.slane %v2013_v54, 4  ;;  %v2023_v47 = vrot.slane %v2022_v42, 4  ;;  %v2049_v62 = vmax.f32 %v2047_v26, %v2048_v5  ;;  %v2058_v44 = vmax.f32 %v2056_v32, %v2057_v28 }
 0xbbf   :  { %v2032_v20 = vrot.slane %v2031_v56, 4  ;;  %v2041_v11 = vrot.slane %v2040_v39, 4  ;;  %v2066_v36 = vsel %vm115_vm2, %v1936_v61, -inf  ;;  %v2074_v35 = vsel %vm115_vm2, %v1937_v12, -inf }
 0xbc0   :  { %v2015_v49 = vmax.f32 %v2013_v54, %v2014_v53  ;;  %v2024_v37 = vmax.f32 %v2022_v42, %v2023_v47  ;;  %v2050_v52 = vrot.slane %v2049_v62, 4  ;;  %v2059_v27 = vrot.slane %v2058_v44, 4 }
 0xbc1   :  { %v2033_v22 = vmax.f32 %v2031_v56, %v2032_v20  ;;  %v2042_v23 = vmax.f32 %v2040_v39, %v2041_v11  ;;  %v2067_v24 = vmax.f32 %v2065_v0, %v2066_v36  ;;  %v2075_v58 = vsel %vm115_vm2, %v1938_v14, -inf }
 0xbc2   :  { %v2016_v30 = vrot.slane %v2015_v49, 2  ;;  %v2025_v57 = vrot.slane %v2024_v37, 2  ;;  %v2051_v55 = vmax.f32 %v2049_v62, %v2050_v52  ;;  %v2060_v26 = vmax.f32 %v2058_v44, %v2059_v27 }
 0xbc3   :  { %v2034_v32 = vrot.slane %v2033_v22, 2  ;;  %v2043_v5 = vrot.slane %v2042_v23, 2  ;;  %v2068_v28 = vrot.slane %v2067_v24, 4  ;;  %v2076_v56 = vmax.f32 %v2074_v35, %v2075_v58 }
 0xbc4   :  { %v2017_v8 = vmax.f32 %v2015_v49, %v2016_v30  ;;  %v2026_v61 = vmax.f32 %v2024_v37, %v2025_v57  ;;  %v2052_v54 = vrot.slane %v2051_v55, 2  ;;  %v2061_v42 = vrot.slane %v2060_v26, 2 }
 0xbc5   :  { %v2035_v53 = vmax.f32 %v2033_v22, %v2034_v32  ;;  %v2044_v47 = vmax.f32 %v2042_v23, %v2043_v5  ;;  %v2069_v20 = vmax.f32 %v2067_v24, %v2068_v28  ;;  %v2077_v52 = vrot.slane %v2076_v56, 4 }
 0xbc6   :  { %v2018_v39 = vrot.slane %v2017_v8, 1  ;;  %v2027_v11 = vrot.slane %v2026_v61, 1  ;;  %v2053_v12 = vmax.f32 %v2051_v55, %v2052_v54  ;;  %v2062_v0 = vmax.f32 %v2060_v26, %v2061_v42  ;;  %v8384_v42 = vld [vmem:[#allocation24_spill] sm:$0xff] }
 0xbc7   :  { %v2036_v36 = vrot.slane %v2035_v53, 1  ;;  %v2045_v62 = vrot.slane %v2044_v47, 1  ;;  %v2070_v44 = vrot.slane %v2069_v20, 2  ;;  %v2078_v57 = vmax.f32 %v2076_v56, %v2077_v52 }
 0xbc8   :  { %v2019_v27 = vmax.f32 %v2017_v8, %v2018_v39  ;;  %v2028_v4 = vmax.f32 %v2026_v61, %v2027_v11  ;;  %v2054_v34 = vrot.slane %v2053_v12, 1  ;;  %v2063_v14 = vrot.slane %v2062_v0, 1  ;;  %v8386_v39 = vld [vmem:[#allocation25_spill] sm:$0xff] }
 0xbc9   :  { %v2037_v49 = vmax.f32 %v2035_v53, %v2036_v36  ;;  %v2046_v37 = vmax.f32 %v2044_v47, %v2045_v62  ;;  %v2071_v30 = vmax.f32 %v2069_v20, %v2070_v44  ;;  %v1907_v35 = vadd.f32 %v6754_v63, %v6199_v31  ;;  %v8385_v20 = vld [vmem:[#allocation22_spill] sm:$0xff]  ;;  %v8388_v44 = vld [vmem:[#allocation27_spill] sm:$0xff] }
 0xbca   :  { %v2055_v22 = vmax.f32 %v2053_v12, %v2054_v34  ;;  %v2064_v23 = vmax.f32 %v2062_v0, %v2063_v14  ;;  %v2106_v24 = vsel %vm709_vm3, %v2028_v4, %v2019_v27  ;;  %v2079_v26 = vrot.slane %v2078_v57, 2  ;;  %v8387_v12 = vld [vmem:[#allocation23_spill] sm:$0xff]  ;;  %v8389_v27 = vld [vmem:[#allocation26_spill] sm:$0xff] }
 0xbcb   :  { %v2072_v55 = vrot.slane %v2071_v30, 1  ;;  %v2107_v32 = vsel %vm711_vm4, %v2037_v49, %v2106_v24  ;;  %v1908_v8 = vadd.f32 %v6776_v3, %v6219_v19  ;;  %v1909_v28 = vadd.f32 %v6754_v63, %v6202_v1  ;;  %v8390_v49 = vld [vmem:[#allocation29_spill] sm:$0xff]  ;;  %v8393_v24 = vld [vmem:[#allocation31_spill] sm:$0xff] }
 0xbcc   :  { %v2108_v5 = vsel %vm713_vm6, %v2046_v37, %v2107_v32  ;;  %v1910_v34 = vadd.f32 %v6776_v3, %v6229_v29  ;;  %v1911_v4 = vadd.f32 %v6754_v63, %v6212_v15  ;;  %v2080_v61 = vmax.f32 %v2078_v57, %v2079_v26  ;;  %v8394_v32 = vld [vmem:[#allocation32_spill] sm:$0xff] }
 0xbcd   :  { %v2073_v58 = vmax.f32 %v2071_v30, %v2072_v55  ;;  %v2109_v54 = vsel %vm715_vm7, %v2055_v22, %v2108_v5  ;;  %v1912_v53 = vadd.f32 %v6776_v3, %v8384_v42  ;;  %v1913_v56 = vadd.f32 %v6754_v63, %v8385_v20  ;;  %v8391_v30 = vld [vmem:[#allocation28_spill] sm:$0xff]  ;;  %v8392_v22 = vld [vmem:[#allocation30_spill] sm:$0xff] }
 0xbce   :  { %v2110_v47 = vsel %vm717_vm8, %v2064_v23, %v2109_v54  ;;  %v1914_v11 = vadd.f32 %v6776_v3, %v8386_v39  ;;  %v1915_v0 = vadd.f32 %v6754_v63, %v8387_v12  ;;  %v2081_v36 = vrot.slane %v2080_v61, 1 }
 0xbcf   :  { %v2111_v62 = vsel %vm719_vm9, %v2073_v58, %v2110_v47  ;;  %v1916_v52 = vadd.f32 %v6776_v3, %v8388_v44  ;;  %v1917_v14 = vadd.f32 %v6754_v63, %v8389_v27  ;;  %v1918_v37 = vadd.f32 %v6776_v3, %v8390_v49 }
 0xbd0   :  { %v1919_v57 = vadd.f32 %v6754_v63, %v8391_v30  ;;  %v1920_v23 = vadd.f32 %v6776_v3, %v8392_v22  ;;  %v1921_v55 = vadd.f32 %v6754_v63, %v8393_v24  ;;  %v2082_v26 = vmax.f32 %v2080_v61, %v2081_v36 }
 0xbd1   :  { %v1922_v5 = vadd.f32 %v6776_v3, %v8394_v32  ;;  %v1939_v58 = vsel %vm115_vm2, %v1907_v35, -inf  ;;  %v1940_v54 = vsel %vm115_vm2, %v1908_v8, -inf  ;;  %v1948_v49 = vsel %vm115_vm2, %v1909_v28, -inf }
 0xbd2   :  { %v1941_v47 = vmax.f32 %v1939_v58, %v1940_v54  ;;  %v1949_v27 = vsel %vm115_vm2, %v1910_v34, -inf  ;;  %v1957_v30 = vsel %vm115_vm2, %v1911_v4, -inf  ;;  %v2112_v22 = vsel %vm721_vm10, %v2082_v26, %v2111_v62 }
 0xbd3   :  { %v1950_v44 = vmax.f32 %v1948_v49, %v1949_v27  ;;  %v1958_v24 = vsel %vm115_vm2, %v1912_v53, -inf  ;;  %v1966_v61 = vsel %vm115_vm2, %v1913_v56, -inf  ;;  %2115 = vrot.lane.b32.xlu0 %v2112_v22, %s5814_s28  ;;  %v1967_v8 = vsel %vm115_vm2, %v1914_v11, -inf }
 0xbd4   :  { %v1942_v36 = vrot.slane %v1941_v47, 4  ;;  %v1959_v35 = vmax.f32 %v1957_v30, %v1958_v24  ;;  %v1975_v58 = vsel %vm115_vm2, %v1915_v0, -inf  ;;  %v1968_v54 = vmax.f32 %v1966_v61, %v1967_v8 }
 0xbd5   :  { %v1951_v28 = vrot.slane %v1950_v44, 4  ;;  %v1976_v34 = vsel %vm115_vm2, %v1916_v52, -inf  ;;  %v1984_v4 = vsel %vm115_vm2, %v1917_v14, -inf  ;;  %v1985_v53 = vsel %vm115_vm2, %v1918_v37, -inf }
 0xbd6   :  { %v1943_v62 = vmax.f32 %v1941_v47, %v1942_v36  ;;  %v1960_v27 = vrot.slane %v1959_v35, 4  ;;  %v1977_v49 = vmax.f32 %v1975_v58, %v1976_v34  ;;  %v1969_v26 = vrot.slane %v1968_v54, 4 }
 0xbd7   :  { %v1952_v56 = vmax.f32 %v1950_v44, %v1951_v28  ;;  %v1986_v22 = vmax.f32 %v1984_v4, %v1985_v53  ;;  %v1993_v30 = vsel %vm115_vm2, %v1919_v57, -inf  ;;  %v1994_v0 = vsel %vm115_vm2, %v1920_v23, -inf }
 0xbd8   :  { %v1944_v24 = vrot.slane %v1943_v62, 2  ;;  %v1961_v11 = vmax.f32 %v1959_v35, %v1960_v27  ;;  %v1978_v32 = vrot.slane %v1977_v49, 4  ;;  %v1970_v8 = vmax.f32 %v1968_v54, %v1969_v26 }
 0xbd9   :  { %v1953_v61 = vrot.slane %v1952_v56, 2  ;;  %v1987_v52 = vrot.slane %v1986_v22, 4  ;;  %v1995_v12 = vmax.f32 %v1993_v30, %v1994_v0  ;;  %v2002_v58 = vsel %vm115_vm2, %v1921_v55, -inf }
 0xbda   :  { %v1945_v14 = vmax.f32 %v1943_v62, %v1944_v24  ;;  %v1962_v47 = vrot.slane %v1961_v11, 2  ;;  %v1979_v36 = vmax.f32 %v1977_v49, %v1978_v32  ;;  %v1971_v44 = vrot.slane %v1970_v8, 2 }
 0xbdb   :  { %v1954_v37 = vmax.f32 %v1952_v56, %v1953_v61  ;;  %v1988_v28 = vmax.f32 %v1986_v22, %v1987_v52  ;;  %v1996_v34 = vrot.slane %v1995_v12, 4  ;;  %v2003_v35 = vsel %vm115_vm2, %v1922_v5, -inf }
 0xbdc   :  { %v1946_v4 = vrot.slane %v1945_v14, 1  ;;  %v1963_v57 = vmax.f32 %v1961_v11, %v1962_v47  ;;  %v1980_v53 = vrot.slane %v1979_v36, 2  ;;  %v1972_v23 = vmax.f32 %v1970_v8, %v1971_v44 }
 0xbdd   :  { %v1955_v27 = vrot.slane %v1954_v37, 1  ;;  %v1989_v39 = vrot.slane %v1988_v28, 2  ;;  %v1997_v54 = vmax.f32 %v1995_v12, %v1996_v34  ;;  %v2004_v24 = vmax.f32 %v2002_v58, %v2003_v35 }
 0xbde   :  { %v1947_v26 = vmax.f32 %v1945_v14, %v1946_v4  ;;  %v1964_v30 = vrot.slane %v1963_v57, 1  ;;  %v1981_v62 = vmax.f32 %v1979_v36, %v1980_v53  ;;  %v1973_v49 = vrot.slane %v1972_v23, 1 }
 0xbdf   :  { %v1956_v32 = vmax.f32 %v1954_v37, %v1955_v27  ;;  %v1990_v55 = vmax.f32 %v1988_v28, %v1989_v39  ;;  %v1998_v56 = vrot.slane %v1997_v54, 2  ;;  %v2005_v61 = vrot.slane %v2004_v24, 4 }
 0xbe0   :  { %v1965_v0 = vmax.f32 %v1963_v57, %v1964_v30  ;;  %v1982_v22 = vrot.slane %v1981_v62, 1  ;;  %v1974_v52 = vmax.f32 %v1972_v23, %v1973_v49 }
 0xbe1   :  { %v1991_v11 = vrot.slane %v1990_v55, 1  ;;  %v1999_v47 = vmax.f32 %v1997_v54, %v1998_v56  ;;  %v2099_v5 = vsel %vm709_vm3, %v1956_v32, %v1947_v26  ;;  %v2006_v8 = vmax.f32 %v2004_v24, %v2005_v61  ;;  %v1903_v54 = vpop.permute.xlu0 %1902 }
 0xbe2   :  { %v1983_v20 = vmax.f32 %v1981_v62, %v1982_v22  ;;  %v2100_v12 = vsel %vm711_vm4, %v1965_v0, %v2099_v5  ;;  %v1906_v26 = vadd.f32 %v1903_v54, %v6776_v3  ;;  %v1905_v0 = vadd.f32 %v1903_v54, %v6754_v63  ;;  %v2265_v54 = vld [vmem:[%s8302_s3 + $0x110] sm:$0xff] }
 0xbe3   :  { %v1992_v14 = vmax.f32 %v1990_v55, %v1991_v11  ;;  %v2000_v44 = vrot.slane %v1999_v47, 1  ;;  %v2101_v36 = vsel %vm713_vm6, %v1974_v52, %v2100_v12  ;;  %v2007_v58 = vrot.slane %v2006_v8, 2 }
 0xbe4   :  { %v2102_v39 = vsel %vm715_vm7, %v1983_v20, %v2101_v36 }
 0xbe5   :  { %v2001_v37 = vmax.f32 %v1999_v47, %v2000_v44  ;;  %v2103_v28 = vsel %vm717_vm8, %v1992_v14, %v2102_v39  ;;  %v2008_v34 = vmax.f32 %v2006_v8, %v2007_v58  ;;  %v2263_v39 = vld [vmem:[%s8302_s3 + $0x100] sm:$0xff] }
 0xbe7   :  { %v2104_v4 = vsel %vm719_vm9, %v2001_v37, %v2103_v28  ;;  %v2009_v57 = vrot.slane %v2008_v34, 1  ;;  %v2264_v37 = vld [vmem:[%s8302_s3 + $0x108] sm:$0xff]  ;;  %v2281_v28 = vld [vmem:[%s8302_s3 + $0x190] sm:$0xff] }
 0xbe9   :  { %v2010_v53 = vmax.f32 %v2008_v34, %v2009_v57  ;;  %v2282_v34 = vld [vmem:[%s8302_s3 + $0x198] sm:$0xff] }
 0xbeb   :  { %v2105_v35 = vsel %vm721_vm10, %v2010_v53, %v2104_v4 }
 0xc2d   :  { %v1685_v27 = vpop.permute.xlu1 %1684 }
 0xc2e   :  { %v1687_v23 = vsel %vm115_vm2, %v1685_v27, 0.0  ;;  %v5348_v27 = vpack.c.bf16 %v2264_v37, %v2263_v39  ;;  %v2273_v39 = vld [vmem:[%s8302_s3 + $0x150] sm:$0xff]  ;;  %v2274_v37 = vld [vmem:[%s8302_s3 + $0x158] sm:$0xff] }
 0xc2f   :  { %1688 = vadd.xlane.f32.xlu1 %v1687_v23  ;;  %v5350_v23 = vpack.c.bf16 %v2282_v34, %v2281_v28  ;;  %v2291_v28 = vld [vmem:[%s8302_s3 + $0x1e0] sm:$0xff]  ;;  %v2292_v34 = vld [vmem:[%s8302_s3 + $0x1e8] sm:$0xff] }
 0xc40   :  { %2113 = vrot.lane.b32.xlu1 %v2105_v35, %s5814_s28 }
 0xc45   :  { %v2116_v20 = vpop.permute.xlu0 %2115 }
 0xc46   :  { %v2120_v30 = vadd.f32 %v2116_v20, %v1906_v26  ;;  %v2266_v26 = vld [vmem:[%s8302_s3 + $0x118] sm:$0xff]  ;;  %v2283_v20 = vld [vmem:[%s8302_s3 + $0x1a0] sm:$0xff] }
 0xc48   :  { %v2122_v62 = vmul.f32 0.01, %v2120_v30 }
 0xc4a   :  { %v6878_v24 = vmax.f32 %v2120_v30, %v2122_v62  ;;  %v2284_v30 = vld [vmem:[%s8302_s3 + $0x1a8] sm:$0xff]  ;;  %v5352_v62 = vpack.c.bf16 %v2266_v26, %v2265_v54 }
 0xc4c   :  { %2129 = vrot.lane.b32.xlu1 %v6878_v24, %s5814_s28 }
 0xc58   :  { %v6882_v32 = vpop.f32.mrb[18].mxu0 }
 0xc59   :  { %v5122_v49 = vpop.f32.mrb[19].mxu0 }
 0xc5a   :  { %v5354_v49 = vpack.c.bf16 %v2284_v30, %v2283_v20  ;;  %v2277_v20 = vld [vmem:[%s8302_s3 + $0x170] sm:$0xff]  ;;  %v2278_v30 = vld [vmem:[%s8302_s3 + $0x178] sm:$0xff] }
 0xcbc   :  { %v1689_v55 = vpop.xlane.xlu1 %1688 }
 0xcbd   :  { %v1690_v56 = vmul.f32 0.015625, %v1689_v55  ;;  %v2267_v55 = vld [vmem:[%s8302_s3 + $0x120] sm:$0xff] }
 0xcbf   :  { %v1691_v22 = vadd.f32 1e-05, %v1690_v56  ;;  %v2268_v56 = vld [vmem:[%s8302_s3 + $0x128] sm:$0xff] }
 0xcc0   :  { %v2114_v61 = vpop.permute.xlu1 %2113 }
 0xcc1   :  { %5760 = vrsqrt.f32 %v1691_v22  ;;  %v2119_v52 = vadd.f32 %v2114_v61, %v1905_v0  ;;  %v2285_v0 = vld [vmem:[%s8302_s3 + $0x1b0] sm:$0xff]  ;;  %v2286_v22 = vld [vmem:[%s8302_s3 + $0x1b8] sm:$0xff]  ;;  %v5356_v61 = vpack.c.bf16 %v2268_v56, %v2267_v55  ;;  %v2715_v55 = vld [vmem:[%s8302_s3 + $0x480] sm:$0xff] }
 0xcc2   :  { %v2716_v56 = vld [vmem:[%s8302_s3 + $0x488] sm:$0xff] }
 0xcc3   :  { %v2121_v3 = vmul.f32 0.01, %v2119_v52 }
 0xcc4   :  { %v2130_v14 = vpop.permute.xlu1 %2129 }
 0xcc5   :  { %v6885_v11 = vmax.f32 %v2119_v52, %v2121_v3  ;;  %v2136_v44 = vsel %vm115_vm2, %v2130_v14, 0.0  ;;  %v5358_v52 = vpack.c.bf16 %v2286_v22, %v2285_v0  ;;  %v2269_v3 = vld [vmem:[%s8302_s3 + $0x130] sm:$0xff]  ;;  %v2271_v14 = vld [vmem:[%s8302_s3 + $0x140] sm:$0xff]  ;;  %v5438_v22 = vpack.c.bf16 %v2716_v56, %v2715_v55 }
 0xcc6   :  { %v2717_v0 = vld [vmem:[%s8302_s3 + $0x490] sm:$0xff] }
 0xcc7   :  { %2127 = vrot.lane.b32.xlu0 %v6885_v11, %s5814_s28  ;;  %5439 = vmatprep.subr.bf16.mxu0 %v5438_v22 }
 0xcc8   :  { %5441 = vmatpush3.bf16.msra.mxu0 %v5438_v22 }
 0xccb   :  { %v5761_v47 = vpop.eup %5760  ;;  %2177 = vrot.lane.b32.xlu0 %v6522_v45, %s5814_s28  ;;  %v2279_v45 = vld [vmem:[%s8302_s3 + $0x180] sm:$0xff] }
 0xccc   :  { %v1693_v5 = vmul.f32 %v5761_v47, %v6769_v21  ;;  %v2280_v21 = vld [vmem:[%s8302_s3 + $0x188] sm:$0xff]  ;;  %v2270_v47 = vld [vmem:[%s8302_s3 + $0x138] sm:$0xff] }
 0xccd   :  { %v5346_v53 = vpack.c.bf16 %v2280_v21, %v2279_v45 }
 0xcce   :  { %v1694_v8 = vmul.f32 %v1693_v5, %v6512_v46  ;;  %v2287_v5 = vld [vmem:[%s8302_s3 + $0x1c0] sm:$0xff] }
 0xcd0   :  { %v1695_v63 = vadd.f32 %v1694_v8, %v6514_v43  ;;  %v2288_v8 = vld [vmem:[%s8302_s3 + $0x1c8] sm:$0xff] }
 0xcd2   :  { %1696 = vst.msk [vmem:[#allocation3 + $0x8] sm:$0xff] %vm760_vm11, %v1695_v63  ;;  %v5360_v63 = vpack.c.bf16 %v2270_v47, %v2269_v3  ;;  %v2719_v3 = vld [vmem:[%s8302_s3 + $0x4a0] sm:$0xff]  ;;  %v2720_v47 = vld [vmem:[%s8302_s3 + $0x4a8] sm:$0xff] }
 0xcd9   :  { %v2174_v12 = vld [vmem:[#allocation3 + $0x8] sm:$0xff] }
 0xcda   :  { %2179 = vrot.lane.b32.xlu1 %v2174_v12, %s5814_s28 }
 0xcfe   :  { %2137 = vadd.xlane.f32.xlu1 %v2136_v44  ;;  %v2272_v44 = vld [vmem:[%s8302_s3 + $0x148] sm:$0xff] }
 0xcff   :  { %v5364_v45 = vpack.c.bf16 %v2272_v44, %v2271_v14  ;;  %v2722_v14 = vld [vmem:[%s8302_s3 + $0x4b8] sm:$0xff] }
 0xd39   :  { %v2128_v36 = vpop.permute.xlu0 %2127 }
 0xd3a   :  { %v2133_v58 = vsel %vm115_vm2, %v2128_v36, 0.0  ;;  %v2289_v36 = vld [vmem:[%s8302_s3 + $0x1d0] sm:$0xff] }
 0xd3b   :  { %2134 = vadd.xlane.f32.xlu0 %v2133_v58  ;;  %v2290_v58 = vld [vmem:[%s8302_s3 + $0x1d8] sm:$0xff] }
 0xd3c   :  { %v5366_v21 = vpack.c.bf16 %v2290_v58, %v2289_v36 }
 0xd3d   :  { %v2178_v4 = vpop.permute.xlu0 %2177 }
 0xd4c   :  { %v2180_v57 = vpop.permute.xlu1 %2179 }
 0xd4d   :  { %v2181_v35 = vsel %vm115_vm2, %v2178_v4, %v2180_v57  ;;  %v5368_v4 = vpack.c.bf16 %v2274_v37, %v2273_v39  ;;  %v5370_v57 = vpack.c.bf16 %v2292_v34, %v2291_v28  ;;  %v2726_v37 = vld [vmem:[%s8302_s3 + $0x4d8] sm:$0xff]  ;;  %v2727_v34 = vld [vmem:[%s8302_s3 + $0x4e0] sm:$0xff] }
 0xd4e   :  { %5083 = vmatprep.subr.mxu1 %v2181_v35 }
 0xd4f   :  { %5084 = vmatpush3.msra.mxu1 %v2181_v35  ;;  %v2276_v35 = vld [vmem:[%s8302_s3 + $0x168] sm:$0xff] }
 0xd50   :  { %5086 = vmatmul.mubr.msk.f32.vlgmr.msra.gmra.mrb[6].mxu1 %vm39_vm0, %v6412_v16  ;;  %5347 = vmatprep.subr.bf16.mxu1 %v5346_v53  ;;  %v2275_v53 = vld [vmem:[%s8302_s3 + $0x160] sm:$0xff] }
 0xd51   :  { %5349 = vmatpush3.bf16.msra.mxu1 %v5348_v27  ;;  %2375 = vmatprep.mubr.f32.mxu1 %v2174_v12  ;;  %v5362_v12 = vpack.c.bf16 %v2288_v8, %v2287_v5  ;;  %v2293_v27 = vld [vmem:[%s8302_s3 + $0x1f0] sm:$0xff]  ;;  %v5372_v54 = vpack.c.bf16 %v2276_v35, %v2275_v53  ;;  %v5446_v8 = vpack.c.bf16 %v2720_v47, %v2719_v3  ;;  %v2730_v35 = vld [vmem:[%s8302_s3 + $0x4f8] sm:$0xff] }
 0xd52   :  { %5351 = vmatprep.subr.bf16.mxu1 %v5350_v23  ;;  %v2294_v23 = vld [vmem:[%s8302_s3 + $0x1f8] sm:$0xff] }
 0xd53   :  { %v5374_v26 = vpack.c.bf16 %v2294_v23, %v2293_v27 }
 0xd55   :  { %5353 = vmatpush3.bf16.msra.mxu1 %v5352_v62  ;;  %v5376_v62 = vpack.c.bf16 %v2278_v30, %v2277_v20 }
 0xd56   :  { %5355 = vmatprep.subr.bf16.mxu1 %v5354_v49  ;;  %v2260_v49 = vld [vmem:[#allocation3] sm:$0xff] }
 0xd59   :  { %5357 = vmatpush3.bf16.msra.mxu1 %v5356_v61  ;;  %v2718_v61 = vld [vmem:[%s8302_s3 + $0x498] sm:$0xff] }
 0xd5a   :  { %5359 = vmatprep.subr.bf16.mxu1 %v5358_v52  ;;  %v5442_v52 = vpack.c.bf16 %v2718_v61, %v2717_v0 }
 0xd5c   :  { %5443 = vmatprep.subr.bf16.mxu0 %v5442_v52 }
 0xd5d   :  { %5361 = vmatpush3.bf16.msra.mxu1 %v5360_v63  ;;  %5445 = vmatpush3.bf16.msra.mxu0 %v5442_v52 }
 0xd5e   :  { %5363 = vmatprep.subr.bf16.mxu1 %v5362_v12  ;;  %v2721_v12 = vld [vmem:[%s8302_s3 + $0x4b0] sm:$0xff]  ;;  %5447 = vmatprep.subr.bf16.mxu0 %v5446_v8 }
 0xd5f   :  { %v5450_v36 = vpack.c.bf16 %v2722_v14, %v2721_v12 }
 0xd61   :  { %5365 = vmatpush3.bf16.msra.mxu1 %v5364_v45  ;;  %v2723_v45 = vld [vmem:[%s8302_s3 + $0x4c0] sm:$0xff]  ;;  %5449 = vmatpush3.bf16.msra.mxu0 %v5446_v8 }
 0xd62   :  { %5367 = vmatprep.subr.bf16.mxu1 %v5366_v21  ;;  %v2724_v21 = vld [vmem:[%s8302_s3 + $0x4c8] sm:$0xff]  ;;  %5451 = vmatprep.subr.bf16.mxu0 %v5450_v36 }
 0xd63   :  { %v5454_v39 = vpack.c.bf16 %v2724_v21, %v2723_v45 }
 0xd65   :  { %5369 = vmatpush3.bf16.msra.mxu1 %v5368_v4  ;;  %5453 = vmatpush3.bf16.msra.mxu0 %v5450_v36  ;;  %v2728_v4 = vld [vmem:[%s8302_s3 + $0x4e8] sm:$0xff] }
 0xd66   :  { %5371 = vmatprep.subr.bf16.mxu1 %v5370_v57  ;;  %5455 = vmatprep.subr.bf16.mxu0 %v5454_v39  ;;  %v2729_v57 = vld [vmem:[%s8302_s3 + $0x4f0] sm:$0xff]  ;;  %v5462_v53 = vpack.c.bf16 %v2728_v4, %v2727_v34 }
 0xd67   :  { %v5466_v27 = vpack.c.bf16 %v2730_v35, %v2729_v57 }
 0xd69   :  { %5373 = vmatpush3.bf16.msra.mxu1 %v5372_v54  ;;  %5457 = vmatpush3.bf16.msra.mxu0 %v5454_v39 }
 0xd6a   :  { %5375 = vmatprep.subr.bf16.mxu1 %v5374_v26 }
 0xd6d   :  { %5377 = vmatpush3.bf16.msra.mxu1 %v5376_v62 }
 0xd70   :  { %2376 = vmatmul.mubr.f32.vlgmr.msra.gmra.mrb[8].mxu1 %v2260_v49 }
 0xd71   :  { %2659 = vmatprep.mubr.f32.mxu1 %v8383_v33 }
 0xd8b   :  { %v2138_v5 = vpop.xlane.xlu1 %2137 }
 0xd8c   :  { %v2140_v63 = vmul.f32 0.015625, %v2138_v5 }
 0xd8e   :  { %v2142_v44 = vsub.f32 %v6878_v24, %v2140_v63  ;;  %v2725_v24 = vld [vmem:[%s8302_s3 + $0x4d0] sm:$0xff] }
 0xd8f   :  { %v5458_v28 = vpack.c.bf16 %v2726_v37, %v2725_v24 }
 0xd90   :  { %v2144_v58 = vmul.f32 %v2142_v44, %v2142_v44 }
 0xd91   :  { %5459 = vmatprep.subr.bf16.mxu0 %v5458_v28 }
 0xd92   :  { %2149 = vrot.lane.b32.xlu1 %v2144_v58, %s5814_s28  ;;  %5461 = vmatpush3.bf16.msra.mxu0 %v5458_v28 }
 0xd93   :  { %5463 = vmatprep.subr.bf16.mxu0 %v5462_v53 }
 0xd96   :  { %5465 = vmatpush3.bf16.msra.mxu0 %v5462_v53  ;;  %v8395_v53 = vld [vmem:[#allocation11_spill] sm:$0xff] }
 0xd97   :  { %5467 = vmatprep.subr.bf16.mxu0 %v5466_v27  ;;  %v2884_v35 = vrot.slane %v6749_v38, %v8395_v53  ;;  %v2690_v53 = vld [vmem:[%s8302_s3 + $0x3b8] sm:$0xff] }
 0xd9a   :  { %5469 = vmatpush3.bf16.msra.mxu0 %v5466_v27 }
 0xdc8   :  { %v2135_v23 = vpop.xlane.xlu0 %2134 }
 0xdc9   :  { %v2139_v54 = vmul.f32 0.015625, %v2135_v23 }
 0xdcb   :  { %v2141_v26 = vsub.f32 %v6885_v11, %v2139_v54 }
 0xdcd   :  { %v2143_v20 = vmul.f32 %v2141_v26, %v2141_v26 }
 0xdcf   :  { %2147 = vrot.lane.b32.xlu0 %v2143_v20, %s5814_s28  ;;  %v2699_v20 = vld [vmem:[%s8302_s3 + $0x400] sm:$0xff] }
 0xe04   :  { %v2150_v30 = vpop.permute.xlu1 %2149 }
 0xe05   :  { %v2156_v62 = vsel %vm115_vm2, %v2150_v30, 0.0  ;;  %v2700_v30 = vld [vmem:[%s8302_s3 + $0x408] sm:$0xff] }
 0xe06   :  { %2157 = vadd.xlane.f32.xlu1 %v2156_v62 }
 0xe23   :  { %v5087_v49 = vpop.f32.mrb[6].mxu1 }
 0xe24   :  { %2259 = vst [vmem:[#allocation2 + $0x50] sm:$0xff] %v5087_v49  ;;  %v2249_v55 = vpop.f32.mrb[7].mxu1 }
 0xe25   :  { %2258 = vst [vmem:[#allocation2 + $0x10] sm:$0xff] %v2249_v55  ;;  %5155 = vmatprep.mubr.f32.mxu0 %v2249_v55 }
 0xe26   :  { %5156 = vmatmul.mubr.f32.vlgmr.msra.gmra.mrb[20].mxu0 %v5087_v49 }
 0xe27   :  { %3240 = vmatprep.mubr.f32.mxu0 %v8383_v33 }
 0xe41   :  { %v2148_v56 = vpop.permute.xlu0 %2147 }
 0xe42   :  { %v2153_v0 = vsel %vm115_vm2, %v2148_v56, 0.0 }
 0xe43   :  { %2154 = vadd.xlane.f32.xlu0 %v2153_v0  ;;  %v4684_v11 = vpop.f32.mrb[8].mxu1  ;;  %v5406_v0 = vpack.c.bf16 %v2700_v30, %v2699_v20  ;;  %v2692_v20 = vld [vmem:[%s8302_s3 + $0x3c8] sm:$0xff]  ;;  %v2709_v30 = vld [vmem:[%s8302_s3 + $0x450] sm:$0xff] }
 0xe44   :  { %v4685_v22 = vpop.f32.mrb[9].mxu1 }
 0xe45   :  { %v4686_v61 = vadd.f32 %v4685_v22, %v4684_v11  ;;  %v2683_v11 = vld [vmem:[%s8302_s3 + $0x380] sm:$0xff]  ;;  %v2684_v22 = vld [vmem:[%s8302_s3 + $0x388] sm:$0xff] }
 0xe47   :  { %v7054_v52 = vadd.f32 %v4686_v61, %v6882_v32 }
 0xe93   :  { %v2158_v3 = vpop.xlane.xlu1 %2157 }
 0xe94   :  { %v2160_v47 = vmul.f32 0.015625, %v2158_v3  ;;  %v2701_v3 = vld [vmem:[%s8302_s3 + $0x410] sm:$0xff] }
 0xe96   :  { %v2162_v5 = vadd.f32 1e-05, %v2160_v47  ;;  %v2702_v47 = vld [vmem:[%s8302_s3 + $0x418] sm:$0xff] }
 0xe98   :  { %5762 = vrsqrt.f32 %v2162_v5  ;;  %v5408_v5 = vpack.c.bf16 %v2684_v22, %v2683_v11  ;;  %v2712_v11 = vld [vmem:[%s8302_s3 + $0x468] sm:$0xff] }
 0xea2   :  { %v5763_v8 = vpop.eup %5762 }
 0xea3   :  { %v2166_v63 = vmul.f32 %v5763_v8, %v2142_v44  ;;  %v5410_v8 = vpack.c.bf16 %v2702_v47, %v2701_v3  ;;  %v2695_v3 = vld [vmem:[%s8302_s3 + $0x3e0] sm:$0xff]  ;;  %v2696_v47 = vld [vmem:[%s8302_s3 + $0x3e8] sm:$0xff] }
 0xea5   :  { %v2168_v12 = vmul.f32 %v2166_v63, %v6512_v46  ;;  %v2685_v63 = vld [vmem:[%s8302_s3 + $0x390] sm:$0xff] }
 0xea7   :  { %v2170_v14 = vadd.f32 %v2168_v12, %v6514_v43  ;;  %v2686_v12 = vld [vmem:[%s8302_s3 + $0x398] sm:$0xff] }
 0xea9   :  { %2172 = vst.msk [vmem:[#allocation2 + $0x48] sm:$0xff] %vm760_vm11, %v2170_v14  ;;  %v2703_v14 = vld [vmem:[%s8302_s3 + $0x420] sm:$0xff] }
 0xeb0   :  { %v7059_v36 = vld [vmem:[#allocation2 + $0x48] sm:$0xff] }
 0xeb1   :  { %v5737_v58 = vpack.i.bf16 %v5087_v49, %v7059_v36 }
 0xeb3   :  { %5738 = vrot.lane.b32.xlu1 %v5737_v58, %s5814_s28  ;;  %v2704_v58 = vld [vmem:[%s8302_s3 + $0x428] sm:$0xff] }
 0xed0   :  { %v2155_v32 = vpop.xlane.xlu0 %2154 }
 0xed1   :  { %v2159_v45 = vmul.f32 0.015625, %v2155_v32  ;;  %v5412_v32 = vpack.c.bf16 %v2686_v12, %v2685_v63  ;;  %v5432_v63 = vpack.c.bf16 %v2696_v47, %v2695_v3  ;;  %v3309_v3 = vld [vmem:[%s8302_s3 + $0x5c0] sm:$0xff]  ;;  %v3310_v47 = vld [vmem:[%s8302_s3 + $0x5c8] sm:$0xff] }
 0xed3   :  { %v2161_v21 = vadd.f32 1e-05, %v2159_v45  ;;  %v5414_v45 = vpack.c.bf16 %v2704_v58, %v2703_v14  ;;  %v2697_v14 = vld [vmem:[%s8302_s3 + $0x3f0] sm:$0xff]  ;;  %v2698_v58 = vld [vmem:[%s8302_s3 + $0x3f8] sm:$0xff] }
 0xed5   :  { %5764 = vrsqrt.f32 %v2161_v21  ;;  %v2687_v21 = vld [vmem:[%s8302_s3 + $0x3a0] sm:$0xff] }
 0xedf   :  { %v5765_v39 = vpop.eup %5764 }
 0xee0   :  { %v2165_v24 = vmul.f32 %v5765_v39, %v2141_v26  ;;  %v2688_v39 = vld [vmem:[%s8302_s3 + $0x3a8] sm:$0xff] }
 0xee2   :  { %v2167_v44 = vmul.f32 %v2165_v24, %v6512_v46  ;;  %v2705_v24 = vld [vmem:[%s8302_s3 + $0x430] sm:$0xff] }
 0xee4   :  { %v2169_v37 = vadd.f32 %v2167_v44, %v6514_v43  ;;  %v5416_v44 = vpack.c.bf16 %v2688_v39, %v2687_v21  ;;  %v5436_v21 = vpack.c.bf16 %v2698_v58, %v2697_v14  ;;  %v3312_v14 = vld [vmem:[%s8302_s3 + $0x5d8] sm:$0xff] }
 0xee6   :  { %2171 = vst.msk [vmem:[#allocation2 + $0x8] sm:$0xff] %vm760_vm11, %v2169_v37 }
 0xeed   :  { %v7066_v28 = vld [vmem:[#allocation2 + $0x8] sm:$0xff] }
 0xeee   :  { %v5732_v34 = vpack.i.bf16 %v2249_v55, %v7066_v28 }
 0xef0   :  { %5733 = vrot.lane.b32.xlu0 %v5732_v34, %s5814_s28  ;;  %v2689_v34 = vld [vmem:[%s8302_s3 + $0x3b0] sm:$0xff] }
 0xef4   :  { %2886 = vrot.lane.b32.xlu0 %v2884_v35, %s5814_s28  ;;  %v2707_v35 = vld [vmem:[%s8302_s3 + $0x440] sm:$0xff] }
 0xef9   :  { %v7070_v4 = vpop.f32.mrb[20].mxu0 }
 0xefa   :  { %v7072_v57 = vpop.f32.mrb[21].mxu0 }
 0xf25   :  { %v5739_v27 = vpop.permute.xlu1 %5738 }
 0xf26   :  { %v5741_v23 = vunpack.i.h.bf16 %v5739_v27  ;;  %v5740_v54 = vunpack.i.l.bf16 %v5739_v27  ;;  %v2708_v27 = vld [vmem:[%s8302_s3 + $0x448] sm:$0xff] }
 0xf28   :  { %v2590_v55 = vsel %vm115_vm2, %v5740_v54, %v5741_v23  ;;  %v5422_v54 = vpack.c.bf16 %v2708_v27, %v2707_v35  ;;  %v3287_v35 = vld [vmem:[%s8302_s3 + $0x510] sm:$0xff]  ;;  %v3288_v27 = vld [vmem:[%s8302_s3 + $0x518] sm:$0xff] }
 0xf62   :  { %v5734_v26 = vpop.permute.xlu0 %5733 }
 0xf63   :  { %v5736_v62 = vunpack.i.h.bf16 %v5734_v26  ;;  %v5735_v49 = vunpack.i.l.bf16 %v5734_v26  ;;  %v2691_v26 = vld [vmem:[%s8302_s3 + $0x3c0] sm:$0xff] }
 0xf65   :  { %v2589_v38 = vsel %vm115_vm2, %v5735_v49, %v5736_v62  ;;  %v5402_v56 = vpack.c.bf16 %v5741_v23, %v5736_v62  ;;  %v5420_v23 = vpack.c.bf16 %v2690_v53, %v2689_v34  ;;  %v2710_v62 = vld [vmem:[%s8302_s3 + $0x458] sm:$0xff]  ;;  %v5424_v49 = vpack.c.bf16 %v2692_v20, %v2691_v26  ;;  %v3306_v26 = vld [vmem:[%s8302_s3 + $0x5a8] sm:$0xff] }
 0xf66   :  { %v5404_v61 = vpack.c.bf16 %v2590_v55, %v2589_v38  ;;  %v5426_v55 = vpack.c.bf16 %v2710_v62, %v2709_v30  ;;  %v2693_v38 = vld [vmem:[%s8302_s3 + $0x3d0] sm:$0xff]  ;;  %v5476_v20 = vpack.c.bf16 %v3288_v27, %v3287_v35  ;;  %v3289_v62 = vld [vmem:[%s8302_s3 + $0x520] sm:$0xff]  ;;  %v3316_v35 = vld [vmem:[%s8302_s3 + $0x5f8] sm:$0xff] }
 0xf67   :  { %5403 = vmatprep.subr.bf16.mxu1 %v5402_v56  ;;  %v2694_v56 = vld [vmem:[%s8302_s3 + $0x3d8] sm:$0xff] }
 0xf68   :  { %5405 = vmatpush1.bf16.msra.mxu1 %v5404_v61  ;;  %v5428_v22 = vpack.c.bf16 %v2694_v56, %v2693_v38  ;;  %v3307_v38 = vld [vmem:[%s8302_s3 + $0x5b0] sm:$0xff]  ;;  %v3308_v56 = vld [vmem:[%s8302_s3 + $0x5b8] sm:$0xff] }
 0xf69   :  { %5407 = vmatprep.subr.bf16.mxu1 %v5406_v0  ;;  %v2711_v0 = vld [vmem:[%s8302_s3 + $0x460] sm:$0xff] }
 0xf6a   :  { %v5430_v61 = vpack.c.bf16 %v2712_v11, %v2711_v0  ;;  %v5482_v11 = vpack.c.bf16 %v3308_v56, %v3307_v38 }
 0xf6b   :  { %4588 = vmatmul.mubr.msk.f32.vlgmr.msra.gmra.mrb[10].mxu1 %vm764_vm5, %v6074_v9  ;;  %v2706_v9 = vld [vmem:[%s8302_s3 + $0x438] sm:$0xff] }
 0xf6c   :  { %5409 = vmatpush3.bf16.msra.mxu1 %v5408_v5  ;;  %2795 = vmatprep.mubr.f32.mxu1 %v7066_v28  ;;  %v5418_v37 = vpack.c.bf16 %v2706_v9, %v2705_v24  ;;  %v2713_v5 = vld [vmem:[%s8302_s3 + $0x470] sm:$0xff]  ;;  %v3285_v24 = vld [vmem:[%s8302_s3 + $0x500] sm:$0xff]  ;;  %v3286_v9 = vld [vmem:[%s8302_s3 + $0x508] sm:$0xff] }
 0xf6d   :  { %5411 = vmatprep.subr.bf16.mxu1 %v5410_v8  ;;  %v2714_v8 = vld [vmem:[%s8302_s3 + $0x478] sm:$0xff]  ;;  %v5472_v34 = vpack.c.bf16 %v3286_v9, %v3285_v24  ;;  %v3314_v24 = vld [vmem:[%s8302_s3 + $0x5e8] sm:$0xff] }
 0xf6e   :  { %v5434_v12 = vpack.c.bf16 %v2714_v8, %v2713_v5  ;;  %v5486_v5 = vpack.c.bf16 %v3310_v47, %v3309_v3  ;;  %v3293_v8 = vld [vmem:[%s8302_s3 + $0x540] sm:$0xff] }
 0xf70   :  { %5413 = vmatpush3.bf16.msra.mxu1 %v5412_v32  ;;  %v3301_v32 = vld [vmem:[%s8302_s3 + $0x580] sm:$0xff] }
 0xf71   :  { %5415 = vmatprep.subr.bf16.mxu1 %v5414_v45  ;;  %v3302_v45 = vld [vmem:[%s8302_s3 + $0x588] sm:$0xff] }
 0xf72   :  { %v5470_v39 = vpack.c.bf16 %v3302_v45, %v3301_v32  ;;  %v3295_v45 = vld [vmem:[%s8302_s3 + $0x550] sm:$0xff] }
 0xf74   :  { %5417 = vmatpush3.bf16.msra.mxu1 %v5416_v44  ;;  %v3303_v44 = vld [vmem:[%s8302_s3 + $0x590] sm:$0xff] }
 0xf75   :  { %5419 = vmatprep.subr.bf16.mxu1 %v5418_v37  ;;  %v3304_v37 = vld [vmem:[%s8302_s3 + $0x598] sm:$0xff] }
 0xf76   :  { %v5474_v53 = vpack.c.bf16 %v3304_v37, %v3303_v44  ;;  %v3297_v37 = vld [vmem:[%s8302_s3 + $0x560] sm:$0xff] }
 0xf78   :  { %5421 = vmatpush3.bf16.msra.mxu1 %v5420_v23  ;;  %v2677_v23 = vld [vmem:[#allocation2] sm:$0xff] }
 0xf79   :  { %5423 = vmatprep.subr.bf16.mxu1 %v5422_v54  ;;  %v3305_v54 = vld [vmem:[%s8302_s3 + $0x5a0] sm:$0xff] }
 0xf7a   :  { %v5478_v30 = vpack.c.bf16 %v3306_v26, %v3305_v54  ;;  %v3299_v26 = vld [vmem:[%s8302_s3 + $0x570] sm:$0xff] }
 0xf7c   :  { %5425 = vmatpush3.bf16.msra.mxu1 %v5424_v49  ;;  %v3290_v49 = vld [vmem:[%s8302_s3 + $0x528] sm:$0xff] }
 0xf7d   :  { %5427 = vmatprep.subr.bf16.mxu1 %v5426_v55  ;;  %v2680_v55 = vld [vmem:[#allocation2 + $0x40] sm:$0xff]  ;;  %v5480_v0 = vpack.c.bf16 %v3290_v49, %v3289_v62 }
 0xf80   :  { %5429 = vmatpush3.bf16.msra.mxu1 %v5428_v22  ;;  %v3291_v22 = vld [vmem:[%s8302_s3 + $0x530] sm:$0xff] }
 0xf81   :  { %5431 = vmatprep.subr.bf16.mxu1 %v5430_v61  ;;  %v3292_v61 = vld [vmem:[%s8302_s3 + $0x538] sm:$0xff] }
 0xf84   :  { %5433 = vmatpush3.bf16.msra.mxu1 %v5432_v63  ;;  %v3294_v63 = vld [vmem:[%s8302_s3 + $0x548] sm:$0xff] }
 0xf85   :  { %5435 = vmatprep.subr.bf16.mxu1 %v5434_v12  ;;  %v3311_v12 = vld [vmem:[%s8302_s3 + $0x5d0] sm:$0xff]  ;;  %v5488_v58 = vpack.c.bf16 %v3294_v63, %v3293_v8 }
 0xf86   :  { %v5490_v32 = vpack.c.bf16 %v3312_v14, %v3311_v12 }
 0xf88   :  { %5437 = vmatpush3.bf16.msra.mxu1 %v5436_v21  ;;  %v3296_v21 = vld [vmem:[%s8302_s3 + $0x558] sm:$0xff] }
 0xf89   :  { %5471 = vmatprep.subr.bf16.mxu1 %v5470_v39  ;;  %v3313_v39 = vld [vmem:[%s8302_s3 + $0x5e0] sm:$0xff]  ;;  %v5492_v9 = vpack.c.bf16 %v3296_v21, %v3295_v45 }
 0xf8a   :  { %v5494_v44 = vpack.c.bf16 %v3314_v24, %v3313_v39 }
 0xf8b   :  { %2796 = vmatmul.mubr.f32.vlgmr.msra.gmra.mrb[12].mxu1 %v2677_v23 }
 0xf8c   :  { %2800 = vmatprep.mubr.f32.mxu1 %v7059_v36  ;;  %5473 = vmatpush3.bf16.msra.mxu1 %v5472_v34  ;;  %v3298_v34 = vld [vmem:[%s8302_s3 + $0x568] sm:$0xff] }
 0xf8d   :  { %5475 = vmatprep.subr.bf16.mxu1 %v5474_v53  ;;  %v3315_v53 = vld [vmem:[%s8302_s3 + $0x5f0] sm:$0xff]  ;;  %v5496_v27 = vpack.c.bf16 %v3298_v34, %v3297_v37  ;;  %v8398_v34 = vld [vmem:[#allocation33_spill] sm:$0xff] }
 0xf8e   :  { %v5498_v54 = vpack.c.bf16 %v3316_v35, %v3315_v53 }
 0xf8f   :  { %2801 = vmatmul.mubr.f32.gmra.mrb[14].mxu1 %v2680_v55 }
 0xf90   :  { %5477 = vmatpush3.bf16.msra.mxu1 %v5476_v20  ;;  %3429 = vmatprep.mubr.f32.mxu1 %v7066_v28  ;;  %v5484_v28 = vpack.c.bf16 %v3292_v61, %v3291_v22  ;;  %v3300_v20 = vld [vmem:[%s8302_s3 + $0x578] sm:$0xff] }
 0xf91   :  { %5479 = vmatprep.subr.bf16.mxu1 %v5478_v30  ;;  %v5500_v30 = vpack.c.bf16 %v3300_v20, %v3299_v26 }
 0xf94   :  { %5481 = vmatpush3.bf16.msra.mxu1 %v5480_v0 }
 0xf95   :  { %5483 = vmatprep.subr.bf16.mxu1 %v5482_v11 }
 0xf98   :  { %5485 = vmatpush3.bf16.msra.mxu1 %v5484_v28 }
 0xf99   :  { %5487 = vmatprep.subr.bf16.mxu1 %v5486_v5 }
 0xf9c   :  { %5489 = vmatpush3.bf16.msra.mxu1 %v5488_v58 }
 0xf9d   :  { %5491 = vmatprep.subr.bf16.mxu1 %v5490_v32 }
 0xfa0   :  { %5493 = vmatpush3.bf16.msra.mxu1 %v5492_v9 }
 0xfa1   :  { %5495 = vmatprep.subr.bf16.mxu1 %v5494_v44 }
 0xfa4   :  { %5497 = vmatpush3.bf16.msra.mxu1 %v5496_v27 }
 0xfa5   :  { %5499 = vmatprep.subr.bf16.mxu1 %v5498_v54 }
 0xfa8   :  { %5501 = vmatpush3.bf16.msra.mxu1 %v5500_v30 }
 0xfab   :  { %3430 = vmatmul.mubr.f32.vlgmr.msra.gmra.mrb[16].mxu1 %v2677_v23 }
 0xfac   :  { %3434 = vmatprep.mubr.f32.mxu1 %v7059_v36 }
 0xfaf   :  { %3435 = vmatmul.mubr.f32.gmra.mrb[18].mxu1 %v2680_v55 }
0x103e   :  { %v7277_v62 = vpop.f32.mrb[10].mxu1 }
0x103f   :  { %8396 = vst [vmem:[#allocation11_spill] sm:$0xff] %v7277_v62  ;;  %v7279_v49 = vpop.f32.mrb[11].mxu1 }
0x1040   :  { %8397 = vst [vmem:[#allocation35_spill] sm:$0xff] %v7279_v49 }
0x105e   :  { %v4736_v38 = vpop.f32.mrb[12].mxu1 }
0x105f   :  { %v4737_v56 = vpop.f32.mrb[13].mxu1 }
0x1060   :  { %v4738_v0 = vadd.f32 %v4737_v56, %v4736_v38 }
0x1062   :  { %v7282_v11 = vadd.f32 %v4738_v0, %v7072_v57  ;;  %v4739_v22 = vpop.f32.mrb[14].mxu1 }
0x1063   :  { %v4740_v61 = vpop.f32.mrb[15].mxu1 }
0x1064   :  { %v4741_v3 = vadd.f32 %v4740_v61, %v4739_v22  ;;  %v2907_v47 = vadd.f32 %v7282_v11, %v6204_v10  ;;  %v2909_v36 = vadd.f32 %v7282_v11, %v6210_v13  ;;  %v2911_v23 = vadd.f32 %v7282_v11, %v6214_v6 }
0x1065   :  { %v2913_v55 = vadd.f32 %v7282_v11, %v6237_v48  ;;  %v2915_v28 = vadd.f32 %v7282_v11, %v6265_v51  ;;  %v2917_v57 = vadd.f32 %v7282_v11, %v6297_v25  ;;  %v2919_v8 = vadd.f32 %v7282_v11, %v6328_v40 }
0x1066   :  { %v7297_v5 = vadd.f32 %v7070_v4, %v4741_v3  ;;  %v2921_v63 = vadd.f32 %v7282_v11, %v6359_v17  ;;  %v2995_v12 = vsel %vm115_vm2, %v2907_v47, -inf  ;;  %v3004_v14 = vsel %vm115_vm2, %v2909_v36, -inf }
0x1067   :  { %v3013_v58 = vsel %vm115_vm2, %v2911_v23, -inf  ;;  %v3022_v32 = vsel %vm115_vm2, %v2913_v55, -inf  ;;  %v3031_v45 = vsel %vm115_vm2, %v2915_v28, -inf  ;;  %v3040_v22 = vsel %vm115_vm2, %v2917_v57, -inf }
0x1068   :  { %v2908_v4 = vadd.f32 %v7297_v5, %v6239_v50  ;;  %v2910_v21 = vadd.f32 %v7297_v5, %v6247_v60  ;;  %v2912_v39 = vadd.f32 %v7297_v5, %v6267_v59  ;;  %v2914_v24 = vadd.f32 %v7297_v5, %v6288_v41 }
0x1069   :  { %v2916_v9 = vadd.f32 %v7297_v5, %v6308_v7  ;;  %v2918_v44 = vadd.f32 %v7297_v5, %v6330_v2  ;;  %v2920_v37 = vadd.f32 %v7297_v5, %v6350_v18  ;;  %v2922_v53 = vadd.f32 %v7297_v5, %v8398_v34 }
0x106a   :  { %v2996_v35 = vsel %vm115_vm2, %v2908_v4, -inf  ;;  %v3005_v27 = vsel %vm115_vm2, %v2910_v21, -inf  ;;  %v3014_v54 = vsel %vm115_vm2, %v2912_v39, -inf  ;;  %v3023_v26 = vsel %vm115_vm2, %v2914_v24, -inf }
0x106b   :  { %v2997_v20 = vmax.f32 %v2995_v12, %v2996_v35  ;;  %v3006_v30 = vmax.f32 %v3004_v14, %v3005_v27  ;;  %v3015_v38 = vmax.f32 %v3013_v58, %v3014_v54  ;;  %v3024_v56 = vmax.f32 %v3022_v32, %v3023_v26 }
0x106c   :  { %v3032_v0 = vsel %vm115_vm2, %v2916_v9, -inf  ;;  %v3041_v61 = vsel %vm115_vm2, %v2918_v44, -inf  ;;  %v3049_v3 = vsel %vm115_vm2, %v2919_v8, -inf  ;;  %v3050_v21 = vsel %vm115_vm2, %v2920_v37, -inf }
0x106d   :  { %v2998_v47 = vrot.slane %v2997_v20, 4  ;;  %v3007_v36 = vrot.slane %v3006_v30, 4  ;;  %v3016_v23 = vrot.slane %v3015_v38, 4  ;;  %v3025_v55 = vrot.slane %v3024_v56, 4 }
0x106e   :  { %v3033_v28 = vmax.f32 %v3031_v45, %v3032_v0  ;;  %v3042_v4 = vmax.f32 %v3040_v22, %v3041_v61  ;;  %v3058_v12 = vsel %vm115_vm2, %v2921_v63, -inf  ;;  %v3051_v9 = vmax.f32 %v3049_v3, %v3050_v21 }
0x106f   :  { %v2999_v14 = vmax.f32 %v2997_v20, %v2998_v47  ;;  %v3008_v58 = vmax.f32 %v3006_v30, %v3007_v36  ;;  %v3017_v32 = vmax.f32 %v3015_v38, %v3016_v23  ;;  %v3026_v39 = vmax.f32 %v3024_v56, %v3025_v55 }
0x1070   :  { %v3034_v24 = vrot.slane %v3033_v28, 4  ;;  %v3043_v57 = vrot.slane %v3042_v4, 4  ;;  %v3059_v44 = vsel %vm115_vm2, %v2922_v53, -inf  ;;  %v3052_v0 = vrot.slane %v3051_v9, 4 }
0x1071   :  { %v3000_v8 = vrot.slane %v2999_v14, 2  ;;  %v3009_v35 = vrot.slane %v3008_v58, 2  ;;  %v3018_v27 = vrot.slane %v3017_v32, 2  ;;  %v3027_v54 = vrot.slane %v3026_v39, 2 }
0x1072   :  { %v3035_v26 = vmax.f32 %v3033_v28, %v3034_v24  ;;  %v3044_v45 = vmax.f32 %v3042_v4, %v3043_v57  ;;  %v3060_v22 = vmax.f32 %v3058_v12, %v3059_v44  ;;  %v3053_v56 = vmax.f32 %v3051_v9, %v3052_v0 }
0x1073   :  { %v3001_v37 = vmax.f32 %v2999_v14, %v3000_v8  ;;  %v3010_v61 = vmax.f32 %v3008_v58, %v3009_v35  ;;  %v3019_v63 = vmax.f32 %v3017_v32, %v3018_v27  ;;  %v3028_v20 = vmax.f32 %v3026_v39, %v3027_v54 }
0x1074   :  { %v3036_v30 = vrot.slane %v3035_v26, 2  ;;  %v3045_v38 = vrot.slane %v3044_v45, 2  ;;  %v3061_v47 = vrot.slane %v3060_v22, 4  ;;  %v3054_v62 = vrot.slane %v3053_v56, 2 }
0x1075   :  { %v3002_v36 = vrot.slane %v3001_v37, 1  ;;  %v3011_v3 = vrot.slane %v3010_v61, 1  ;;  %v3020_v23 = vrot.slane %v3019_v63, 1  ;;  %v3029_v53 = vrot.slane %v3028_v20, 1 }
0x1076   :  { %v3037_v55 = vmax.f32 %v3035_v26, %v3036_v30  ;;  %v3046_v21 = vmax.f32 %v3044_v45, %v3045_v38  ;;  %v3062_v49 = vmax.f32 %v3060_v22, %v3061_v47  ;;  %v3055_v32 = vmax.f32 %v3053_v56, %v3054_v62  ;;  %v8400_v38 = vld [vmem:[#allocation25_spill] sm:$0xff]  ;;  %v8401_v47 = vld [vmem:[#allocation23_spill] sm:$0xff] }
0x1077   :  { %v3003_v28 = vmax.f32 %v3001_v37, %v3002_v36  ;;  %v3012_v4 = vmax.f32 %v3010_v61, %v3011_v3  ;;  %v3021_v24 = vmax.f32 %v3019_v63, %v3020_v23  ;;  %v3030_v12 = vmax.f32 %v3028_v20, %v3029_v53  ;;  %v8399_v20 = vld [vmem:[#allocation22_spill] sm:$0xff]  ;;  %v8402_v3 = vld [vmem:[#allocation27_spill] sm:$0xff] }
0x1078   :  { %v3038_v14 = vrot.slane %v3037_v55, 1  ;;  %v3047_v58 = vrot.slane %v3046_v21, 1  ;;  %v3063_v39 = vrot.slane %v3062_v49, 2  ;;  %v2891_v9 = vadd.f32 %v7282_v11, %v6199_v31 }
0x1079   :  { %v3090_v57 = vsel %vm709_vm3, %v3012_v4, %v3003_v28  ;;  %v2892_v44 = vadd.f32 %v7297_v5, %v6219_v19  ;;  %v2893_v8 = vadd.f32 %v7282_v11, %v6202_v1  ;;  %v3056_v54 = vrot.slane %v3055_v32, 1  ;;  %v8403_v28 = vld [vmem:[#allocation26_spill] sm:$0xff] }
0x107a   :  { %v3039_v35 = vmax.f32 %v3037_v55, %v3038_v14  ;;  %v3048_v27 = vmax.f32 %v3046_v21, %v3047_v58  ;;  %v3064_v26 = vmax.f32 %v3062_v49, %v3063_v39  ;;  %v3091_v45 = vsel %vm711_vm4, %v3021_v24, %v3090_v57  ;;  %v8404_v24 = vld [vmem:[#allocation29_spill] sm:$0xff]  ;;  %v8406_v57 = vld [vmem:[#allocation30_spill] sm:$0xff] }
0x107b   :  { %v2894_v62 = vadd.f32 %v7297_v5, %v6229_v29  ;;  %v2895_v0 = vadd.f32 %v7282_v11, %v6212_v15  ;;  %v2896_v22 = vadd.f32 %v7297_v5, %v8384_v42  ;;  %v3057_v37 = vmax.f32 %v3055_v32, %v3056_v54  ;;  %v8405_v32 = vld [vmem:[#allocation28_spill] sm:$0xff]  ;;  %v8407_v54 = vld [vmem:[#allocation31_spill] sm:$0xff] }
0x107c   :  { %v3065_v61 = vrot.slane %v3064_v26, 1  ;;  %v3092_v63 = vsel %vm713_vm6, %v3030_v12, %v3091_v45  ;;  %v2897_v30 = vadd.f32 %v7282_v11, %v8399_v20  ;;  %v2898_v56 = vadd.f32 %v7297_v5, %v8400_v38 }
0x107d   :  { %v3093_v49 = vsel %vm715_vm7, %v3039_v35, %v3092_v63  ;;  %v2899_v36 = vadd.f32 %v7282_v11, %v8401_v47  ;;  %v2900_v23 = vadd.f32 %v7297_v5, %v8402_v3  ;;  %v2901_v4 = vadd.f32 %v7282_v11, %v8403_v28 }
0x107e   :  { %v4792_v53 = vpop.f32.mrb[16].mxu1  ;;  %v3066_v55 = vmax.f32 %v3064_v26, %v3065_v61  ;;  %v3094_v21 = vsel %vm717_vm8, %v3048_v27, %v3093_v49  ;;  %v2902_v12 = vadd.f32 %v7297_v5, %v8404_v24  ;;  %v2903_v39 = vadd.f32 %v7282_v11, %v8405_v32  ;;  %v8408_v61 = vld [vmem:[#allocation32_spill] sm:$0xff] }
0x107f   :  { %v4793_v14 = vpop.f32.mrb[17].mxu1  ;;  %v3095_v58 = vsel %vm719_vm9, %v3057_v37, %v3094_v21  ;;  %v2904_v35 = vadd.f32 %v7297_v5, %v8406_v57  ;;  %v2905_v26 = vadd.f32 %v7282_v11, %v8407_v54  ;;  %v2906_v63 = vadd.f32 %v7297_v5, %v8408_v61 }
0x1080   :  { %v7371_v45 = vadd.f32 %v4793_v14, %v4792_v53  ;;  %v3096_v27 = vsel %vm721_vm10, %v3066_v55, %v3095_v58  ;;  %v2923_v49 = vsel %vm115_vm2, %v2891_v9, -inf  ;;  %v2924_v37 = vsel %vm115_vm2, %v2892_v44, -inf }
0x1081   :  { %3099 = vrot.lane.b32.xlu0 %v3096_v27, %s5814_s28  ;;  %v2932_v21 = vsel %vm115_vm2, %v2893_v8, -inf  ;;  %v2933_v57 = vsel %vm115_vm2, %v2894_v62, -inf  ;;  %v2941_v32 = vsel %vm115_vm2, %v2895_v0, -inf  ;;  %v2925_v54 = vmax.f32 %v2923_v49, %v2924_v37 }
0x1082   :  { %v2934_v53 = vmax.f32 %v2932_v21, %v2933_v57  ;;  %v2942_v14 = vsel %vm115_vm2, %v2896_v22, -inf  ;;  %v2950_v55 = vsel %vm115_vm2, %v2897_v30, -inf  ;;  %v4795_v58 = vpop.f32.mrb[18].mxu1  ;;  %v2951_v9 = vsel %vm115_vm2, %v2898_v56, -inf }
0x1083   :  { %v2943_v61 = vmax.f32 %v2941_v32, %v2942_v14  ;;  %v2959_v27 = vsel %vm115_vm2, %v2899_v36, -inf  ;;  %v2960_v44 = vsel %vm115_vm2, %v2900_v23, -inf  ;;  %v4796_v24 = vpop.f32.mrb[19].mxu1  ;;  %v2926_v8 = vrot.slane %v2925_v54, 4 }
0x1084   :  { %v2935_v28 = vrot.slane %v2934_v53, 4  ;;  %v2952_v62 = vmax.f32 %v2950_v55, %v2951_v9  ;;  %v2961_v3 = vmax.f32 %v2959_v27, %v2960_v44  ;;  %v2968_v57 = vsel %vm115_vm2, %v2901_v4, -inf }
0x1085   :  { %v2944_v0 = vrot.slane %v2943_v61, 4  ;;  %v2969_v22 = vsel %vm115_vm2, %v2902_v12, -inf  ;;  %v2977_v30 = vsel %vm115_vm2, %v2903_v39, -inf  ;;  %v2927_v49 = vmax.f32 %v2925_v54, %v2926_v8 }
0x1086   :  { %v2936_v32 = vmax.f32 %v2934_v53, %v2935_v28  ;;  %v2953_v37 = vrot.slane %v2952_v62, 4  ;;  %v2962_v56 = vrot.slane %v2961_v3, 4  ;;  %v2970_v36 = vmax.f32 %v2968_v57, %v2969_v22 }
0x1087   :  { %v2945_v21 = vmax.f32 %v2943_v61, %v2944_v0  ;;  %v2978_v23 = vsel %vm115_vm2, %v2904_v35, -inf  ;;  %v2986_v14 = vsel %vm115_vm2, %v2905_v26, -inf  ;;  %v2928_v47 = vrot.slane %v2927_v49, 2 }
0x1088   :  { %v2937_v55 = vrot.slane %v2936_v32, 2  ;;  %v2954_v9 = vmax.f32 %v2952_v62, %v2953_v37  ;;  %v2963_v27 = vmax.f32 %v2961_v3, %v2962_v56  ;;  %v2971_v4 = vrot.slane %v2970_v36, 4 }
0x1089   :  { %v2946_v44 = vrot.slane %v2945_v21, 2  ;;  %v2979_v38 = vmax.f32 %v2977_v30, %v2978_v23  ;;  %v2987_v12 = vsel %vm115_vm2, %v2906_v63, -inf  ;;  %v2929_v39 = vmax.f32 %v2927_v49, %v2928_v47 }
0x108a   :  { %v2938_v54 = vmax.f32 %v2936_v32, %v2937_v55  ;;  %v2955_v28 = vrot.slane %v2954_v9, 2  ;;  %v2964_v53 = vrot.slane %v2963_v27, 2  ;;  %v2972_v61 = vmax.f32 %v2970_v36, %v2971_v4 }
0x108b   :  { %v2947_v8 = vmax.f32 %v2945_v21, %v2946_v44  ;;  %v2980_v0 = vrot.slane %v2979_v38, 4  ;;  %v2988_v57 = vmax.f32 %v2986_v14, %v2987_v12  ;;  %v2930_v35 = vrot.slane %v2929_v39, 1 }
0x108c   :  { %v2939_v22 = vrot.slane %v2938_v54, 1  ;;  %v2956_v26 = vmax.f32 %v2954_v9, %v2955_v28  ;;  %v2965_v20 = vmax.f32 %v2963_v27, %v2964_v53  ;;  %v2973_v62 = vrot.slane %v2972_v61, 2 }
0x108d   :  { %v2948_v42 = vrot.slane %v2947_v8, 1  ;;  %v2981_v3 = vmax.f32 %v2979_v38, %v2980_v0  ;;  %v2989_v37 = vrot.slane %v2988_v57, 4  ;;  %v2931_v56 = vmax.f32 %v2929_v39, %v2930_v35  ;;  %v2887_v0 = vpop.permute.xlu0 %2886 }
0x108e   :  { %v2940_v30 = vmax.f32 %v2938_v54, %v2939_v22  ;;  %v2957_v23 = vrot.slane %v2956_v26, 1  ;;  %v2966_v63 = vrot.slane %v2965_v20, 1  ;;  %v2974_v49 = vmax.f32 %v2972_v61, %v2973_v62 }
0x108f   :  { %v2949_v47 = vmax.f32 %v2947_v8, %v2948_v42  ;;  %v2982_v32 = vrot.slane %v2981_v3, 2  ;;  %v2990_v55 = vmax.f32 %v2988_v57, %v2989_v37  ;;  %v7394_v44 = vadd.f32 %v4796_v24, %v4795_v58 }
0x1090   :  { %v2958_v21 = vmax.f32 %v2956_v26, %v2957_v23  ;;  %v2967_v36 = vmax.f32 %v2965_v20, %v2966_v63  ;;  %v3083_v14 = vsel %vm709_vm3, %v2940_v30, %v2931_v56  ;;  %v2975_v9 = vrot.slane %v2974_v49, 1 }
0x1091   :  { %v2983_v27 = vmax.f32 %v2981_v3, %v2982_v32  ;;  %v2991_v4 = vrot.slane %v2990_v55, 2  ;;  %v3084_v38 = vsel %vm711_vm4, %v2949_v47, %v3083_v14  ;;  %v2890_v57 = vadd.f32 %v2887_v0, %v7297_v5  ;;  %v3166_v3 = vld [vmem:[#allocation3 + $0x10] sm:$0xff]  ;;  %v3165_v47 = vld [vmem:[#allocation3 + $0x8] sm:$0xff] }
0x1092   :  { %v3085_v12 = vsel %vm713_vm6, %v2958_v21, %v3084_v38  ;;  %v2976_v39 = vmax.f32 %v2974_v49, %v2975_v9  ;;  %v2889_v37 = vadd.f32 %v2887_v0, %v7282_v11  ;;  %v8409_v14 = vld [vmem:[#allocation34_spill] sm:$0xff] }
0x1093   :  { %v2984_v54 = vrot.slane %v2983_v27, 1  ;;  %v2992_v28 = vmax.f32 %v2990_v55, %v2991_v4  ;;  %v3086_v42 = vsel %vm715_vm7, %v2967_v36, %v3085_v12 }
0x1094   :  { %v3087_v20 = vsel %vm717_vm8, %v2976_v39, %v3086_v42 }
0x1095   :  { %v2985_v53 = vmax.f32 %v2983_v27, %v2984_v54  ;;  %v2993_v8 = vrot.slane %v2992_v28, 1 }
0x1097   :  { %v2994_v61 = vmax.f32 %v2992_v28, %v2993_v8  ;;  %v3088_v24 = vsel %vm719_vm9, %v2985_v53, %v3087_v20 }
0x1099   :  { %v3089_v58 = vsel %vm721_vm10, %v2994_v61, %v3088_v24 }
0x109a   :  { %3097 = vrot.lane.b32.xlu1 %v3089_v58, %s5814_s28 }
0x10f3   :  { %v3100_v35 = vpop.permute.xlu0 %3099 }
0x10f4   :  { %v3104_v22 = vadd.f32 %v3100_v35, %v2890_v57  ;;  %v3333_v57 = vld [vmem:[%s8302_s3 + $0x680] sm:$0xff]  ;;  %v3334_v35 = vld [vmem:[%s8302_s3 + $0x688] sm:$0xff] }
0x10f6   :  { %v3106_v26 = vmul.f32 0.01, %v3104_v22 }
0x10f8   :  { %v3108_v62 = vmax.f32 %v3104_v22, %v3106_v26  ;;  %v3317_v22 = vld [vmem:[%s8302_s3 + $0x600] sm:$0xff]  ;;  %v5502_v26 = vpack.c.bf16 %v3334_v35, %v3333_v57  ;;  %v3324_v35 = vld [vmem:[%s8302_s3 + $0x638] sm:$0xff] }
0x10fa   :  { %3113 = vrot.lane.b32.xlu0 %v3108_v62, %s5814_s28 }
0x10fe   :  { %3171 = vrot.lane.b32.xlu0 %v3166_v3, %s5814_s28  ;;  %v3335_v3 = vld [vmem:[%s8302_s3 + $0x690] sm:$0xff] }
0x110c   :  { %v3098_v56 = vpop.permute.xlu1 %3097 }
0x110d   :  { %v3103_v30 = vadd.f32 %v3098_v56, %v2889_v37  ;;  %v3336_v37 = vld [vmem:[%s8302_s3 + $0x698] sm:$0xff] }
0x110f   :  { %v3105_v23 = vmul.f32 0.01, %v3103_v30 }
0x1111   :  { %v3107_v63 = vmax.f32 %v3103_v30, %v3105_v23  ;;  %v5506_v30 = vpack.c.bf16 %v3336_v37, %v3335_v3  ;;  %v3319_v23 = vld [vmem:[%s8302_s3 + $0x610] sm:$0xff]  ;;  %v3342_v3 = vld [vmem:[%s8302_s3 + $0x6c8] sm:$0xff] }
0x1113   :  { %3111 = vrot.lane.b32.xlu1 %v3107_v63, %s5814_s28 }
0x1117   :  { %3169 = vrot.lane.b32.xlu1 %v3165_v47, %s5814_s28  ;;  %v3337_v47 = vld [vmem:[%s8302_s3 + $0x6a0] sm:$0xff] }
0x116c   :  { %v3114_v5 = vpop.permute.xlu0 %3113 }
0x116d   :  { %v3120_v49 = vsel %vm115_vm2, %v3114_v5, 0.0  ;;  %v3338_v5 = vld [vmem:[%s8302_s3 + $0x6a8] sm:$0xff] }
0x116e   :  { %3121 = vadd.xlane.f32.xlu0 %v3120_v49  ;;  %v3349_v49 = vld [vmem:[%s8302_s3 + $0x700] sm:$0xff] }
0x1170   :  { %v3172_v32 = vpop.permute.xlu0 %3171 }
0x1171   :  { %3176 = vmatprep.subr.mxu0 %v3172_v32 }
0x1185   :  { %v3112_v55 = vpop.permute.xlu1 %3111 }
0x1186   :  { %v3117_v21 = vsel %vm115_vm2, %v3112_v55, 0.0 }
0x1187   :  { %3118 = vadd.xlane.f32.xlu1 %v3117_v21 }
0x1189   :  { %v3170_v11 = vpop.permute.xlu1 %3169 }
0x118a   :  { %v3173_v36 = vsel %vm115_vm2, %v3170_v11, %v3172_v32  ;;  %v3350_v32 = vld [vmem:[%s8302_s3 + $0x708] sm:$0xff]  ;;  %v3321_v11 = vld [vmem:[%s8302_s3 + $0x620] sm:$0xff] }
0x118b   :  { %3177 = vmatpush1.msra.mxu0 %v3173_v36  ;;  %v5534_v21 = vpack.c.bf16 %v3350_v32, %v3349_v49  ;;  %v5510_v36 = vpack.c.bf16 %v3338_v5, %v3337_v47  ;;  %v3343_v47 = vld [vmem:[%s8302_s3 + $0x6d0] sm:$0xff]  ;;  %v3344_v5 = vld [vmem:[%s8302_s3 + $0x6d8] sm:$0xff] }
0x118c   :  { %4589 = vmatmul.mubr.msk.f32.vlgmr.msra.gmra.mrb[22].mxu0 %vm39_vm0, %v8409_v14  ;;  %5503 = vmatprep.subr.bf16.mxu0 %v5502_v26  ;;  %v3356_v26 = vld [vmem:[%s8302_s3 + $0x738] sm:$0xff]  ;;  %v5522_v32 = vpack.c.bf16 %v3344_v5, %v3343_v47 }
0x118d   :  { %3246 = vmatprep.mubr.f32.mxu0 %v8383_v33  ;;  %5535 = vmatprep.subr.bf16.mxu1 %v5534_v21 }
0x118e   :  { %5537 = vmatpush3.bf16.msra.mxu1 %v5534_v21  ;;  %v3328_v21 = vld [vmem:[%s8302_s3 + $0x658] sm:$0xff] }
0x1190   :  { %4590 = vmatmul.mubr.msk.f32.gmra.mrb[24].mxu0 %vm39_vm0, %v6412_v16 }
0x11fb   :  { %v3122_v9 = vpop.xlane.xlu0 %3121 }
0x11fc   :  { %v3124_v27 = vmul.f32 0.015625, %v3122_v9  ;;  %v3322_v9 = vld [vmem:[%s8302_s3 + $0x628] sm:$0xff] }
0x11fe   :  { %v7417_v4 = vsub.f32 %v3108_v62, %v3124_v27  ;;  %v3318_v62 = vld [vmem:[%s8302_s3 + $0x608] sm:$0xff]  ;;  %v3351_v27 = vld [vmem:[%s8302_s3 + $0x710] sm:$0xff] }
0x11ff   :  { %v5504_v56 = vpack.c.bf16 %v3318_v62, %v3317_v22  ;;  %v3355_v22 = vld [vmem:[%s8302_s3 + $0x730] sm:$0xff]  ;;  %v3341_v62 = vld [vmem:[%s8302_s3 + $0x6c0] sm:$0xff] }
0x1200   :  { %v3128_v38 = vmul.f32 %v7417_v4, %v7417_v4 }
0x1201   :  { %5505 = vmatpush3.bf16.msra.mxu0 %v5504_v56  ;;  %v5546_v56 = vpack.c.bf16 %v3356_v26, %v3355_v22 }
0x1202   :  { %3133 = vrot.lane.b32.xlu1 %v3128_v38, %s5814_s28  ;;  %5507 = vmatprep.subr.bf16.mxu0 %v5506_v30  ;;  %v3352_v38 = vld [vmem:[%s8302_s3 + $0x718] sm:$0xff]  ;;  %v5518_v30 = vpack.c.bf16 %v3342_v3, %v3341_v62  ;;  %v8413_v62 = vld [vmem:[#allocation16_spill] sm:$0xff] }
0x1203   :  { %v2463_v3 = vadd.f32 %v7054_v52, %v8413_v62 }
0x1214   :  { %v3119_v12 = vpop.xlane.xlu1 %3118 }
0x1215   :  { %v3123_v39 = vmul.f32 0.015625, %v3119_v12  ;;  %v3339_v12 = vld [vmem:[%s8302_s3 + $0x6b0] sm:$0xff] }
0x1217   :  { %v7422_v54 = vsub.f32 %v3107_v63, %v3123_v39  ;;  %v3320_v63 = vld [vmem:[%s8302_s3 + $0x618] sm:$0xff] }
0x1218   :  { %v5508_v55 = vpack.c.bf16 %v3320_v63, %v3319_v23  ;;  %v3340_v39 = vld [vmem:[%s8302_s3 + $0x6b8] sm:$0xff]  ;;  %v3325_v23 = vld [vmem:[%s8302_s3 + $0x640] sm:$0xff]  ;;  %v3326_v63 = vld [vmem:[%s8302_s3 + $0x648] sm:$0xff] }
0x1219   :  { %v3127_v28 = vmul.f32 %v7422_v54, %v7422_v54  ;;  %v5514_v57 = vpack.c.bf16 %v3340_v39, %v3339_v12  ;;  %v5520_v49 = vpack.c.bf16 %v3326_v63, %v3325_v23  ;;  %v8411_v39 = vld [vmem:[#allocation15_spill] sm:$0xff] }
0x121a   :  { %5509 = vmatpush3.bf16.msra.mxu0 %v5508_v55  ;;  %v3327_v55 = vld [vmem:[%s8302_s3 + $0x650] sm:$0xff]  ;;  %v8414_v23 = vld [vmem:[#allocation19_spill] sm:$0xff] }
0x121b   :  { %3131 = vrot.lane.b32.xlu0 %v3127_v28, %s5814_s28  ;;  %v5538_v28 = vpack.c.bf16 %v3352_v38, %v3351_v27  ;;  %5511 = vmatprep.subr.bf16.mxu0 %v5510_v36  ;;  %v8410_v38 = vld [vmem:[#allocation14_spill] sm:$0xff]  ;;  %v2464_v63 = vadd.f32 %v7054_v52, %v8414_v23 }
0x121c   :  { %v2460_v12 = vadd.f32 %v7054_v52, %v8410_v38 }
0x121d   :  { %5539 = vmatprep.subr.bf16.mxu1 %v5538_v28 }
0x121e   :  { %5541 = vmatpush3.bf16.msra.mxu1 %v5538_v28  ;;  %v2461_v28 = vadd.f32 %v7054_v52, %v8411_v39  ;;  %v8416_v39 = vld [vmem:[#allocation7_spill] sm:$0xff] }
0x125f   :  { %v3242_v42 = vpop.f32.mrb[22].mxu0 }
0x1260   :  { %v7427_v53 = vpop.f32.mrb[23].mxu0 }
0x1263   :  { %v7429_v8 = vpop.f32.mrb[24].mxu0 }
0x1264   :  { %v7431_v20 = vpop.f32.mrb[25].mxu0 }
0x1274   :  { %v3134_v61 = vpop.permute.xlu1 %3133 }
0x1275   :  { %v3140_v24 = vsel %vm115_vm2, %v3134_v61, 0.0  ;;  %v3354_v61 = vld [vmem:[%s8302_s3 + $0x728] sm:$0xff] }
0x1276   :  { %3141 = vadd.xlane.f32.xlu0 %v3140_v24  ;;  %v5512_v24 = vpack.c.bf16 %v3322_v9, %v3321_v11  ;;  %v5524_v11 = vpack.c.bf16 %v3328_v21, %v3327_v55 }
0x1278   :  { %5513 = vmatpush3.bf16.msra.mxu0 %v5512_v24  ;;  %v2468_v24 = vsel %vm115_vm2, %v2460_v12, -inf  ;;  %v5783_v12 = vld [vmem:[%s8301_s2] sm:$0xff] }
0x1279   :  { %5515 = vmatprep.subr.bf16.mxu0 %v5514_v57 }
0x128d   :  { %v3132_v58 = vpop.permute.xlu0 %3131 }
0x128e   :  { %v3137_v0 = vsel %vm115_vm2, %v3132_v58, 0.0  ;;  %v3323_v58 = vld [vmem:[%s8302_s3 + $0x630] sm:$0xff] }
0x128f   :  { %3138 = vadd.xlane.f32.xlu1 %v3137_v0  ;;  %v5516_v37 = vpack.c.bf16 %v3324_v35, %v3323_v58  ;;  %v2475_v58 = vsel %vm115_vm2, %v2461_v28, -inf  ;;  %v2469_v35 = vrot.slane %v2468_v24, 4  ;;  %v2454_v28 = vrot.slane %v5783_v12, %v8416_v39 }
0x1290   :  { %v2476_v22 = vrot.slane %v2475_v58, 4 }
0x1291   :  { %5517 = vmatpush3.bf16.msra.mxu0 %v5516_v37  ;;  %v2470_v47 = vmax.f32 %v2468_v24, %v2469_v35  ;;  %v8418_v24 = vld [vmem:[#allocation20_spill] sm:$0xff] }
0x1292   :  { %5519 = vmatprep.subr.bf16.mxu0 %v5518_v30  ;;  %v2477_v5 = vmax.f32 %v2475_v58, %v2476_v22  ;;  %v2467_v58 = vadd.f32 %v7054_v52, %v8418_v24 }
0x1293   :  { %v2471_v21 = vrot.slane %v2470_v47, 2 }
0x1294   :  { %v2517_v23 = vsel %vm115_vm2, %v2467_v58, -inf }
0x1295   :  { %5521 = vmatpush3.bf16.msra.mxu0 %v5520_v49  ;;  %v2489_v49 = vsel %vm115_vm2, %v2463_v3, -inf }
0x1296   :  { %5523 = vmatprep.subr.bf16.mxu0 %v5522_v32 }
0x1299   :  { %5525 = vmatpush3.bf16.msra.mxu0 %v5524_v11  ;;  %v2478_v11 = vrot.slane %v2477_v5, 2 }
0x129b   :  { %v2479_v62 = vmax.f32 %v2477_v5, %v2478_v11  ;;  %v3345_v5 = vld [vmem:[%s8302_s3 + $0x6e0] sm:$0xff] }
0x12a0   :  { %3257 = vrot.lane.b32.xlu1 %v3242_v42, %s5814_s28  ;;  %v3353_v42 = vld [vmem:[%s8302_s3 + $0x720] sm:$0xff] }
0x12a1   :  { %v5542_v0 = vpack.c.bf16 %v3354_v61, %v3353_v42  ;;  %v8412_v42 = vld [vmem:[#allocation17_spill] sm:$0xff] }
0x12a2   :  { %v2462_v61 = vadd.f32 %v7054_v52, %v8412_v42  ;;  %v8417_v42 = vld [vmem:[#allocation21_spill] sm:$0xff] }
0x12a3   :  { %5543 = vmatprep.subr.bf16.mxu1 %v5542_v0 }
0x12a4   :  { %5545 = vmatpush3.bf16.msra.mxu1 %v5542_v0  ;;  %v2482_v26 = vsel %vm115_vm2, %v2462_v61, -inf  ;;  %v2466_v61 = vadd.f32 %v7054_v52, %v8417_v42  ;;  %v3329_v42 = vld [vmem:[%s8302_s3 + $0x660] sm:$0xff] }
0x12a5   :  { %5547 = vmatprep.subr.bf16.mxu1 %v5546_v56 }
0x12a8   :  { %5549 = vmatpush3.bf16.msra.mxu1 %v5546_v56  ;;  %v2483_v56 = vrot.slane %v2482_v26, 4 }
0x12aa   :  { %v2484_v55 = vmax.f32 %v2482_v26, %v2483_v56  ;;  %v2472_v26 = vmax.f32 %v2470_v47, %v2471_v21 }
0x1303   :  { %v3142_v36 = vpop.xlane.xlu0 %3141 }
0x1304   :  { %v3144_v9 = vmul.f32 0.015625, %v3142_v36  ;;  %v2490_v36 = vrot.slane %v2489_v49, 4 }
0x1306   :  { %v3146_v27 = vadd.f32 1e-05, %v3144_v9  ;;  %v2496_v9 = vsel %vm115_vm2, %v2464_v63, -inf  ;;  %v2473_v63 = vrot.slane %v2472_v26, 1 }
0x1308   :  { %5766 = vrsqrt.f32 %v3146_v27  ;;  %v2474_v21 = vmax.f32 %v2472_v26, %v2473_v63  ;;  %v3348_v26 = vld [vmem:[%s8302_s3 + $0x6f8] sm:$0xff]  ;;  %v3331_v63 = vld [vmem:[%s8302_s3 + $0x670] sm:$0xff] }
0x1312   :  { %v5767_v0 = vpop.eup %5766 }
0x1313   :  { %v3150_v57 = vmul.f32 %v5767_v0, %v7417_v4  ;;  %v8415_v4 = vld [vmem:[#allocation18_spill] sm:$0xff]  ;;  %v2485_v0 = vrot.slane %v2484_v55, 2 }
0x1314   :  { %v2465_v32 = vadd.f32 %v7054_v52, %v8415_v4  ;;  %v2480_v4 = vrot.slane %v2479_v62, 1 }
0x1315   :  { %v3152_v37 = vmul.f32 %v3150_v57, %v6512_v46  ;;  %v2497_v57 = vrot.slane %v2496_v9, 4  ;;  %v2486_v56 = vmax.f32 %v2484_v55, %v2485_v0  ;;  %v3357_v55 = vld [vmem:[%s8302_s3 + $0x740] sm:$0xff] }
0x1316   :  { %v2503_v35 = vsel %vm115_vm2, %v2465_v32, -inf  ;;  %v2518_v32 = vrot.slane %v2517_v23, 4  ;;  %v2481_v11 = vmax.f32 %v2479_v62, %v2480_v4  ;;  %v3359_v62 = vld [vmem:[%s8302_s3 + $0x750] sm:$0xff]  ;;  %v3332_v4 = vld [vmem:[%s8302_s3 + $0x678] sm:$0xff] }
0x1317   :  { %v3154_v30 = vadd.f32 %v3152_v37, %v6514_v43  ;;  %v2504_v3 = vrot.slane %v2503_v35, 4  ;;  %v2510_v37 = vsel %vm115_vm2, %v2466_v61, -inf  ;;  %v3330_v61 = vld [vmem:[%s8302_s3 + $0x668] sm:$0xff] }
0x1318   :  { %v2511_v12 = vrot.slane %v2510_v37, 4  ;;  %v5528_v0 = vpack.c.bf16 %v3330_v61, %v3329_v42  ;;  %v4012_v61 = vld [vmem:[%s8303_s4 + $0x118] sm:$0xff] }
0x1319   :  { %3159 = vrot.lane.b32.xlu1 %v3154_v30, %s5814_s28  ;;  %v2498_v30 = vmax.f32 %v2496_v9, %v2497_v57  ;;  %v2505_v39 = vmax.f32 %v2503_v35, %v2504_v3  ;;  %v2519_v35 = vmax.f32 %v2517_v23, %v2518_v32  ;;  %v3360_v23 = vld [vmem:[%s8302_s3 + $0x758] sm:$0xff]  ;;  %v5532_v32 = vpack.c.bf16 %v3332_v4, %v3331_v63  ;;  %v3363_v63 = vld [vmem:[%s8302_s3 + $0x770] sm:$0xff] }
0x131a   :  { %v2512_v24 = vmax.f32 %v2510_v37, %v2511_v12 }
0x131b   :  { %v2499_v47 = vrot.slane %v2498_v30, 2  ;;  %v2506_v57 = vrot.slane %v2505_v39, 2 }
0x131c   :  { %v3139_v27 = vpop.xlane.xlu1 %3138 }
0x131d   :  { %v3143_v38 = vmul.f32 0.015625, %v3139_v27  ;;  %3259 = vrot.lane.b32.xlu1 %v7427_v53, %s5814_s28  ;;  %v2491_v53 = vmax.f32 %v2489_v49, %v2490_v36  ;;  %v3346_v49 = vld [vmem:[%s8302_s3 + $0x6e8] sm:$0xff]  ;;  %v2500_v3 = vmax.f32 %v2498_v30, %v2499_v47  ;;  %v5554_v30 = vpack.c.bf16 %v3360_v23, %v3359_v62 }
0x131e   :  { %v5526_v9 = vpack.c.bf16 %v3346_v49, %v3345_v5  ;;  %v2513_v47 = vrot.slane %v2512_v24, 2  ;;  %v2507_v5 = vmax.f32 %v2505_v39, %v2506_v57 }
0x131f   :  { %v3145_v22 = vadd.f32 1e-05, %v3143_v38  ;;  %v2492_v27 = vrot.slane %v2491_v53, 2  ;;  %v2487_v38 = vrot.slane %v2486_v56, 1 }
0x1320   :  { %5527 = vmatprep.subr.bf16.mxu0 %v5526_v9 }
0x1321   :  { %5768 = vrsqrt.f32 %v3145_v22  ;;  %2456 = vrot.lane.b32.xlu1 %v2454_v28, %s5814_s28  ;;  %v2493_v36 = vmax.f32 %v2491_v53, %v2492_v27  ;;  %v3358_v28 = vld [vmem:[%s8302_s3 + $0x748] sm:$0xff]  ;;  %v3347_v22 = vld [vmem:[%s8302_s3 + $0x6f0] sm:$0xff]  ;;  %v2488_v53 = vmax.f32 %v2486_v56, %v2487_v38  ;;  %5529 = vmatpush3.bf16.msra.mxu0 %v5528_v0  ;;  %v2532_v56 = vsel %vm709_vm3, %v2481_v11, %v2474_v21 }
0x1322   :  { %v5550_v58 = vpack.c.bf16 %v3358_v28, %v3357_v55  ;;  %v5530_v37 = vpack.c.bf16 %v3348_v26, %v3347_v22  ;;  %v2501_v55 = vrot.slane %v2500_v3, 1  ;;  %v3361_v28 = vld [vmem:[%s8302_s3 + $0x760] sm:$0xff]  ;;  %v3362_v21 = vld [vmem:[%s8302_s3 + $0x768] sm:$0xff]  ;;  %v2520_v11 = vrot.slane %v2519_v35, 2 }
0x1323   :  { %v2494_v12 = vrot.slane %v2493_v36, 1  ;;  %v2533_v9 = vsel %vm711_vm4, %v2488_v53, %v2532_v56  ;;  %v5558_v42 = vpack.c.bf16 %v3362_v21, %v3361_v28  ;;  %v2514_v0 = vmax.f32 %v2512_v24, %v2513_v47  ;;  %v3364_v24 = vld [vmem:[%s8302_s3 + $0x778] sm:$0xff]  ;;  %v4014_v28 = vld [vmem:[%s8303_s4 + $0x128] sm:$0xff] }
0x1324   :  { %5551 = vmatprep.subr.bf16.mxu1 %v5550_v58  ;;  %5531 = vmatprep.subr.bf16.mxu0 %v5530_v37  ;;  %v2508_v22 = vrot.slane %v2507_v5, 1  ;;  %v2502_v62 = vmax.f32 %v2500_v3, %v2501_v55  ;;  %v5562_v4 = vpack.c.bf16 %v3364_v24, %v3363_v63  ;;  %v3996_v55 = vld [vmem:[%s8303_s4 + $0x98] sm:$0xff]  ;;  %v3999_v24 = vld [vmem:[%s8303_s4 + $0xb0] sm:$0xff] }
0x1325   :  { %5553 = vmatpush3.bf16.msra.mxu1 %v5550_v58  ;;  %5533 = vmatpush3.bf16.msra.mxu0 %v5532_v32  ;;  %v2495_v39 = vmax.f32 %v2493_v36, %v2494_v12  ;;  %v2521_v36 = vmax.f32 %v2519_v35, %v2520_v11  ;;  %v2515_v53 = vrot.slane %v2514_v0, 1  ;;  %v3258_v32 = vpop.permute.xlu1 %3257 }
0x1326   :  { %5555 = vmatprep.subr.bf16.mxu1 %v5554_v30  ;;  %v2509_v23 = vmax.f32 %v2507_v5, %v2508_v22  ;;  %v4015_v22 = vld [vmem:[%s8303_s4 + $0x130] sm:$0xff] }
0x1327   :  { %v2534_v26 = vsel %vm713_vm6, %v2495_v39, %v2533_v9  ;;  %v2522_v3 = vrot.slane %v2521_v36, 1  ;;  %v4013_v9 = vld [vmem:[%s8303_s4 + $0x120] sm:$0xff] }
0x1328   :  { %v2535_v37 = vsel %vm715_vm7, %v2502_v62, %v2534_v26  ;;  %v4016_v26 = vld [vmem:[%s8303_s4 + $0x138] sm:$0xff] }
0x1329   :  { %5557 = vmatpush3.bf16.msra.mxu1 %v5554_v30  ;;  %v2536_v35 = vsel %vm717_vm8, %v2509_v23, %v2535_v37  ;;  %v2523_v56 = vmax.f32 %v2521_v36, %v2522_v3  ;;  %v5574_v63 = vpack.c.bf16 %v4016_v26, %v4015_v22  ;;  %v4017_v3 = vld [vmem:[%s8303_s4 + $0x140] sm:$0xff] }
0x132a   :  { %5559 = vmatprep.subr.bf16.mxu1 %v5558_v42 }
0x132b   :  { %v5769_v27 = vpop.eup %5768 }
0x132c   :  { %v3149_v38 = vmul.f32 %v5769_v27, %v7422_v54  ;;  %v4011_v54 = vld [vmem:[%s8303_s4 + $0x110] sm:$0xff]  ;;  %v2516_v27 = vmax.f32 %v2514_v0, %v2515_v53  ;;  %v3998_v0 = vld [vmem:[%s8303_s4 + $0xa8] sm:$0xff] }
0x132d   :  { %v5566_v57 = vpack.c.bf16 %v4012_v61, %v4011_v54  ;;  %5561 = vmatpush3.bf16.msra.mxu1 %v5558_v42  ;;  %v5570_v61 = vpack.c.bf16 %v4014_v28, %v4013_v9  ;;  %v4004_v9 = vld [vmem:[%s8303_s4 + $0xd8] sm:$0xff]  ;;  %v4021_v28 = vld [vmem:[%s8303_s4 + $0x160] sm:$0xff] }
0x132e   :  { %v3151_v49 = vmul.f32 %v3149_v38, %v6512_v46  ;;  %5563 = vmatprep.subr.bf16.mxu1 %v5562_v4  ;;  %v2537_v12 = vsel %vm719_vm9, %v2516_v27, %v2536_v35  ;;  %v4018_v35 = vld [vmem:[%s8303_s4 + $0x148] sm:$0xff] }
0x132f   :  { %5567 = vmatprep.subr.bf16.mxu0 %v5566_v57  ;;  %v2538_v30 = vsel %vm721_vm10, %v2523_v56, %v2537_v12  ;;  %v7664_v57 = vld [vmem:[#allocation2 + $0x10] sm:$0xff]  ;;  %v3980_v12 = vld [vmem:[#allocation2 + $0x8] sm:$0xff] }
0x1330   :  { %v3153_v58 = vadd.f32 %v3151_v49, %v6514_v43  ;;  %v3995_v49 = vld [vmem:[%s8303_s4 + $0x90] sm:$0xff] }
0x1331   :  { %5565 = vmatpush3.bf16.msra.mxu1 %v5562_v4  ;;  %v5568_v39 = vpack.c.bf16 %v3996_v55, %v3995_v49  ;;  %v7684_v4 = vld [vmem:[#allocation2 + $0x50] sm:$0xff] }
0x1332   :  { %3157 = vrot.lane.b32.xlu0 %v3153_v58, %s5814_s28  ;;  %v3997_v58 = vld [vmem:[%s8303_s4 + $0xa0] sm:$0xff]  ;;  %v4003_v55 = vld [vmem:[%s8303_s4 + $0xd0] sm:$0xff] }
0x1333   :  { %v5572_v37 = vpack.c.bf16 %v3998_v0, %v3997_v58  ;;  %v4023_v58 = vld [vmem:[%s8303_s4 + $0x170] sm:$0xff]  ;;  %v4024_v0 = vld [vmem:[%s8303_s4 + $0x178] sm:$0xff] }
0x1334   :  { %v5590_v26 = vpack.c.bf16 %v4024_v0, %v4023_v58 }
0x1336   :  { %3261 = vrot.lane.b32.xlu0 %v7429_v8, %s5814_s28 }
0x133a   :  { %3263 = vrot.lane.b32.xlu0 %v7431_v20, %s5814_s28 }
0x133e   :  { %2539 = vrot.lane.b32.xlu0 %v2538_v30, %s5814_s28 }
0x138b   :  { %v3160_v38 = vpop.permute.xlu1 %3159 }
0x138c   :  { %3164 = vst.msk [vmem:[#allocation2 + $0x58] sm:$0xff] %vm115_vm2, %v3160_v38  ;;  %v4001_v38 = vld [vmem:[%s8303_s4 + $0xc0] sm:$0xff] }
0x138f   :  { %v3260_v8 = vpop.permute.xlu1 %3259 }
0x1390   :  { %v3265_v47 = vsel %vm115_vm2, %v3258_v32, %v3260_v8  ;;  %v4002_v8 = vld [vmem:[%s8303_s4 + $0xc8] sm:$0xff] }
0x1391   :  { %3272 = vst [vmem:[#allocation2 + $0x20] sm:$0xff] %v3265_v47  ;;  %5190 = vmatprep.mubr.f32.mxu1 %v3265_v47  ;;  %v4019_v47 = vld [vmem:[%s8303_s4 + $0x150] sm:$0xff] }
0x1393   :  { %v2457_v54 = vpop.permute.xlu1 %2456 }
0x1394   :  { %v2459_v62 = vadd.f32 %v2457_v54, %v7054_v52  ;;  %v4000_v52 = vld [vmem:[%s8303_s4 + $0xb8] sm:$0xff]  ;;  %v5584_v54 = vpack.c.bf16 %v4004_v9, %v4003_v55 }
0x1395   :  { %v5576_v56 = vpack.c.bf16 %v4000_v52, %v3999_v24  ;;  %v4009_v52 = vld [vmem:[%s8303_s4 + $0x100] sm:$0xff] }
0x13a4   :  { %v3158_v5 = vpop.permute.xlu0 %3157 }
0x13a5   :  { %3163 = vst.msk [vmem:[#allocation2 + $0x18] sm:$0xff] %vm115_vm2, %v3158_v5  ;;  %v4020_v5 = vld [vmem:[%s8303_s4 + $0x158] sm:$0xff] }
0x13a6   :  { %3271 = vst.msk [vmem:[#allocation2 + $0x18] sm:$0xff] %vm760_vm11, %v3258_v32  ;;  %v5578_v32 = vpack.c.bf16 %v4018_v35, %v4017_v3  ;;  %v5582_v49 = vpack.c.bf16 %v4020_v5, %v4019_v47  ;;  %v4010_v3 = vld [vmem:[%s8303_s4 + $0x108] sm:$0xff]  ;;  %v8419_v47 = vld [vmem:[#allocation10_spill] sm:$0xff] }
0x13a7   :  { %v5596_v35 = vpack.c.bf16 %v4010_v3, %v4009_v52 }
0x13a8   :  { %v3262_v20 = vpop.permute.xlu0 %3261 }
0x13a9   :  { %3273 = vst.msk [vmem:[#allocation2 + $0x58] sm:$0xff] %vm760_vm11, %v3262_v20 }
0x13ac   :  { %v3264_v21 = vpop.permute.xlu0 %3263 }
0x13ad   :  { %v3266_v11 = vsel %vm115_vm2, %v3262_v20, %v3264_v21  ;;  %v7655_v42 = vld [vmem:[#allocation2 + $0x18] sm:$0xff]  ;;  %v5580_v20 = vpack.c.bf16 %v4002_v8, %v4001_v38  ;;  %v4022_v21 = vld [vmem:[%s8303_s4 + $0x168] sm:$0xff] }
0x13ae   :  { %3274 = vst [vmem:[#allocation2 + $0x60] sm:$0xff] %v3266_v11  ;;  %3504 = vmatprep.mubr.f32.mxu0 %v7655_v42  ;;  %5191 = vmatmul.mubr.f32.vlgmr.msra.gmra.mrb[20].mxu1 %v3266_v11  ;;  %v4005_v11 = vld [vmem:[%s8303_s4 + $0xe0] sm:$0xff]  ;;  %v7755_v8 = vld [vmem:[%s8301_s2 + $0x8] sm:$0xff] }
0x13af   :  { %3505 = vmatmul.mubr.f32.vlgmr.msra.gmra.mrb[26].mxu0 %v7664_v57  ;;  %3940 = vmatprep.mubr.f32.mxu1 %v8383_v33  ;;  %v3593_v5 = vrot.slane %v7755_v8, %v8419_v47 }
0x13b0   :  { %5569 = vmatpush3.bf16.msra.mxu0 %v5568_v39  ;;  %v2540_v36 = vpop.permute.xlu0 %2539  ;;  %v7675_v53 = vld [vmem:[#allocation2 + $0x58] sm:$0xff]  ;;  %v5586_v39 = vpack.c.bf16 %v4022_v21, %v4021_v28 }
0x13b1   :  { %v2542_v23 = vadd.f32 %v2540_v36, %v2459_v62  ;;  %3509 = vmatprep.mubr.f32.mxu0 %v7675_v53  ;;  %5571 = vmatprep.subr.bf16.mxu0 %v5570_v61  ;;  %v4006_v61 = vld [vmem:[%s8303_s4 + $0xe8] sm:$0xff]  ;;  %v4007_v62 = vld [vmem:[%s8303_s4 + $0xf0] sm:$0xff]  ;;  %v4008_v36 = vld [vmem:[%s8303_s4 + $0xf8] sm:$0xff] }
0x13b2   :  { %v5588_v22 = vpack.c.bf16 %v4006_v61, %v4005_v11 }
0x13b3   :  { %v2543_v27 = vmul.f32 0.01, %v2542_v23  ;;  %3510 = vmatmul.mubr.f32.gmra.mrb[28].mxu0 %v7684_v4 }
0x13b4   :  { %5573 = vmatpush3.bf16.msra.mxu0 %v5572_v37  ;;  %4189 = vmatprep.mubr.f32.mxu0 %v3980_v12  ;;  %v4025_v37 = vld [vmem:[%s8303_s4 + $0x180] sm:$0xff]  ;;  %v3988_v12 = vld [vmem:[#allocation2 + $0x48] sm:$0xff] }
0x13b5   :  { %v7693_v30 = vmax.f32 %v2542_v23, %v2543_v27  ;;  %5575 = vmatprep.subr.bf16.mxu0 %v5574_v63  ;;  %v4026_v23 = vld [vmem:[%s8303_s4 + $0x188] sm:$0xff]  ;;  %v5592_v63 = vpack.c.bf16 %v4008_v36, %v4007_v62  ;;  %v3979_v27 = vld [vmem:[#allocation2] sm:$0xff] }
0x13b6   :  { %v5594_v24 = vpack.c.bf16 %v4026_v23, %v4025_v37 }
0x13b7   :  { %2546 = vrot.lane.b32.xlu1 %v7693_v30, %s5814_s28 }
0x13b8   :  { %5577 = vmatpush3.bf16.msra.mxu0 %v5576_v56  ;;  %v3987_v56 = vld [vmem:[#allocation2 + $0x40] sm:$0xff] }
0x13b9   :  { %5579 = vmatprep.subr.bf16.mxu0 %v5578_v32 }
0x13bc   :  { %5581 = vmatpush3.bf16.msra.mxu0 %v5580_v20 }
0x13bd   :  { %5583 = vmatprep.subr.bf16.mxu0 %v5582_v49 }
0x13c0   :  { %5585 = vmatpush3.bf16.msra.mxu0 %v5584_v54 }
0x13c1   :  { %5587 = vmatprep.subr.bf16.mxu0 %v5586_v39 }
0x13c4   :  { %5589 = vmatpush3.bf16.msra.mxu0 %v5588_v22 }
0x13c5   :  { %5591 = vmatprep.subr.bf16.mxu0 %v5590_v26 }
0x13c8   :  { %5593 = vmatpush3.bf16.msra.mxu0 %v5592_v63 }
0x13c9   :  { %5595 = vmatprep.subr.bf16.mxu0 %v5594_v24 }
0x13cc   :  { %5597 = vmatpush3.bf16.msra.mxu0 %v5596_v35 }
0x13cf   :  { %4190 = vmatmul.mubr.f32.vlgmr.msra.gmra.mrb[30].mxu0 %v3979_v27 }
0x13d0   :  { %4194 = vmatprep.mubr.f32.mxu0 %v3988_v12 }
0x13d3   :  { %4195 = vmatmul.mubr.f32.gmra.mrb[32].mxu0 %v3987_v56 }
0x1429   :  { %v2547_v32 = vpop.permute.xlu1 %2546 }
0x142a   :  { %v2549_v38 = vsel %vm115_vm2, %v2547_v32, 0.0 }
0x142b   :  { %2550 = vadd.xlane.f32.xlu0 %v2549_v38 }
0x1441   :  { %3595 = vrot.lane.b32.xlu0 %v3593_v5, %s5814_s28 }
0x1481   :  { %v5192_v20 = vpop.f32.mrb[20].mxu1 }
0x1482   :  { %v4830_v49 = vpop.f32.mrb[26].mxu0  ;;  %v3581_v55 = vpop.f32.mrb[21].mxu1 }
0x1483   :  { %v4831_v9 = vpop.f32.mrb[27].mxu0 }
0x1484   :  { %v4832_v28 = vadd.f32 %v4831_v9, %v4830_v49 }
0x1486   :  { %v4833_v21 = vpop.f32.mrb[28].mxu0  ;;  %v3507_v54 = vadd.f32 %v4832_v28, %v7371_v45 }
0x1487   :  { %v4834_v39 = vpop.f32.mrb[29].mxu0 }
0x1488   :  { %v4835_v11 = vadd.f32 %v4834_v39, %v4833_v21  ;;  %v7761_v61 = vadd.f32 %v3581_v55, %v3507_v54 }
0x148a   :  { %v3512_v58 = vadd.f32 %v4835_v11, %v7394_v44  ;;  %v3616_v0 = vadd.f32 %v7761_v61, %v6204_v10  ;;  %v3618_v22 = vadd.f32 %v7761_v61, %v6210_v13  ;;  %v3620_v26 = vadd.f32 %v7761_v61, %v6214_v6 }
0x148b   :  { %v3622_v62 = vadd.f32 %v7761_v61, %v6237_v48  ;;  %v3624_v45 = vadd.f32 %v7761_v61, %v6265_v51  ;;  %v3626_v36 = vadd.f32 %v7761_v61, %v6297_v25  ;;  %v3628_v44 = vadd.f32 %v7761_v61, %v6328_v40 }
0x148c   :  { %v7778_v37 = vadd.f32 %v5192_v20, %v3512_v58  ;;  %v3630_v10 = vadd.f32 %v7761_v61, %v6359_v17  ;;  %v3704_v13 = vsel %vm115_vm2, %v3616_v0, -inf  ;;  %v3713_v6 = vsel %vm115_vm2, %v3618_v22, -inf }
0x148d   :  { %v3722_v48 = vsel %vm115_vm2, %v3620_v26, -inf  ;;  %v3731_v23 = vsel %vm115_vm2, %v3622_v62, -inf  ;;  %v3740_v51 = vsel %vm115_vm2, %v3624_v45, -inf  ;;  %v3749_v25 = vsel %vm115_vm2, %v3626_v36, -inf }
0x148e   :  { %v3617_v40 = vadd.f32 %v7778_v37, %v6239_v50  ;;  %v3619_v63 = vadd.f32 %v7778_v37, %v6247_v60  ;;  %v3621_v17 = vadd.f32 %v7778_v37, %v6267_v59  ;;  %v3623_v24 = vadd.f32 %v7778_v37, %v6288_v41 }
0x148f   :  { %v3625_v52 = vadd.f32 %v7778_v37, %v6308_v7  ;;  %v3627_v3 = vadd.f32 %v7778_v37, %v6330_v2  ;;  %v3629_v35 = vadd.f32 %v7778_v37, %v6350_v18  ;;  %v3631_v50 = vadd.f32 %v7778_v37, %v8398_v34 }
0x1490   :  { %v3705_v60 = vsel %vm115_vm2, %v3617_v40, -inf  ;;  %v3714_v27 = vsel %vm115_vm2, %v3619_v63, -inf  ;;  %v3723_v59 = vsel %vm115_vm2, %v3621_v17, -inf  ;;  %v3732_v41 = vsel %vm115_vm2, %v3623_v24, -inf }
0x1491   :  { %v3706_v12 = vmax.f32 %v3704_v13, %v3705_v60  ;;  %v3715_v56 = vmax.f32 %v3713_v6, %v3714_v27  ;;  %v3724_v7 = vmax.f32 %v3722_v48, %v3723_v59  ;;  %v3733_v32 = vmax.f32 %v3731_v23, %v3732_v41 }
0x1492   :  { %v3741_v2 = vsel %vm115_vm2, %v3625_v52, -inf  ;;  %v3750_v38 = vsel %vm115_vm2, %v3627_v3, -inf  ;;  %v3758_v18 = vsel %vm115_vm2, %v3628_v44, -inf  ;;  %v3759_v34 = vsel %vm115_vm2, %v3629_v35, -inf }
0x1493   :  { %v3707_v47 = vrot.slane %v3706_v12, 4  ;;  %v3716_v5 = vrot.slane %v3715_v56, 4  ;;  %v3725_v20 = vrot.slane %v3724_v7, 4  ;;  %v3734_v49 = vrot.slane %v3733_v32, 4 }
0x1494   :  { %v3742_v55 = vmax.f32 %v3740_v51, %v3741_v2  ;;  %v3751_v9 = vmax.f32 %v3749_v25, %v3750_v38  ;;  %v3760_v28 = vmax.f32 %v3758_v18, %v3759_v34  ;;  %v3767_v21 = vsel %vm115_vm2, %v3630_v10, -inf }
0x1495   :  { %v3708_v54 = vmax.f32 %v3706_v12, %v3707_v47  ;;  %v3717_v39 = vmax.f32 %v3715_v56, %v3716_v5  ;;  %v3726_v11 = vmax.f32 %v3724_v7, %v3725_v20  ;;  %v3735_v58 = vmax.f32 %v3733_v32, %v3734_v49 }
0x1496   :  { %v3743_v0 = vrot.slane %v3742_v55, 4  ;;  %v3752_v22 = vrot.slane %v3751_v9, 4  ;;  %v3761_v26 = vrot.slane %v3760_v28, 4  ;;  %v3768_v62 = vsel %vm115_vm2, %v3631_v50, -inf }
0x1497   :  { %v3709_v45 = vrot.slane %v3708_v54, 2  ;;  %v3718_v36 = vrot.slane %v3717_v39, 2  ;;  %v3727_v44 = vrot.slane %v3726_v11, 2  ;;  %v3736_v13 = vrot.slane %v3735_v58, 2 }
0x1498   :  { %v3744_v6 = vmax.f32 %v3742_v55, %v3743_v0  ;;  %v3753_v48 = vmax.f32 %v3751_v9, %v3752_v22  ;;  %v3762_v23 = vmax.f32 %v3760_v28, %v3761_v26  ;;  %v3769_v51 = vmax.f32 %v3767_v21, %v3768_v62  ;;  %v8420_v62 = vld [vmem:[#allocation24_spill] sm:$0xff] }
0x1499   :  { %v3710_v25 = vmax.f32 %v3708_v54, %v3709_v45  ;;  %v3719_v40 = vmax.f32 %v3717_v39, %v3718_v36  ;;  %v3728_v10 = vmax.f32 %v3726_v11, %v3727_v44  ;;  %v3737_v63 = vmax.f32 %v3735_v58, %v3736_v13  ;;  %v8421_v36 = vld [vmem:[#allocation22_spill] sm:$0xff]  ;;  %v8422_v13 = vld [vmem:[#allocation25_spill] sm:$0xff] }
0x149a   :  { %v3745_v17 = vrot.slane %v3744_v6, 2  ;;  %v3754_v24 = vrot.slane %v3753_v48, 2  ;;  %v3763_v52 = vrot.slane %v3762_v23, 2  ;;  %v3770_v3 = vrot.slane %v3769_v51, 4 }
0x149b   :  { %v3711_v35 = vrot.slane %v3710_v25, 1  ;;  %v3720_v60 = vrot.slane %v3719_v40, 1  ;;  %v3729_v27 = vrot.slane %v3728_v10, 1  ;;  %v3738_v50 = vrot.slane %v3737_v63, 1 }
0x149c   :  { %v3746_v59 = vmax.f32 %v3744_v6, %v3745_v17  ;;  %v3755_v41 = vmax.f32 %v3753_v48, %v3754_v24  ;;  %v3764_v12 = vmax.f32 %v3762_v23, %v3763_v52  ;;  %v3771_v56 = vmax.f32 %v3769_v51, %v3770_v3  ;;  %v8426_v24 = vld [vmem:[#allocation29_spill] sm:$0xff]  ;;  %v8427_v3 = vld [vmem:[#allocation28_spill] sm:$0xff] }
0x149d   :  { %v3712_v7 = vmax.f32 %v3710_v25, %v3711_v35  ;;  %v3721_v32 = vmax.f32 %v3719_v40, %v3720_v60  ;;  %v3730_v2 = vmax.f32 %v3728_v10, %v3729_v27  ;;  %v3739_v5 = vmax.f32 %v3737_v63, %v3738_v50  ;;  %v8424_v25 = vld [vmem:[#allocation27_spill] sm:$0xff]  ;;  %v8425_v63 = vld [vmem:[#allocation26_spill] sm:$0xff] }
0x149e   :  { %v3747_v38 = vrot.slane %v3746_v59, 1  ;;  %v3756_v18 = vrot.slane %v3755_v41, 1  ;;  %v3765_v34 = vrot.slane %v3764_v12, 1  ;;  %v3772_v47 = vrot.slane %v3771_v56, 2  ;;  %v8428_v50 = vld [vmem:[#allocation30_spill] sm:$0xff] }
0x149f   :  { %v3799_v20 = vsel %vm709_vm3, %v3721_v32, %v3712_v7  ;;  %v3600_v49 = vadd.f32 %v7761_v61, %v6199_v31  ;;  %v3601_v28 = vadd.f32 %v7778_v37, %v6219_v19  ;;  %v3602_v21 = vadd.f32 %v7761_v61, %v6202_v1 }
0x14a0   :  { %v3748_v55 = vmax.f32 %v3746_v59, %v3747_v38  ;;  %v3773_v9 = vmax.f32 %v3771_v56, %v3772_v47  ;;  %v3757_v54 = vmax.f32 %v3755_v41, %v3756_v18  ;;  %v3766_v39 = vmax.f32 %v3764_v12, %v3765_v34  ;;  %v8429_v41 = vld [vmem:[#allocation31_spill] sm:$0xff] }
0x14a1   :  { %v3800_v11 = vsel %vm711_vm4, %v3730_v2, %v3799_v20  ;;  %v3603_v58 = vadd.f32 %v7778_v37, %v6229_v29  ;;  %v3604_v31 = vadd.f32 %v7761_v61, %v6212_v15  ;;  %v3605_v19 = vadd.f32 %v7778_v37, %v8420_v62  ;;  %v8423_v29 = vld [vmem:[#allocation23_spill] sm:$0xff] }
0x14a2   :  { %v4886_v0 = vpop.f32.mrb[30].mxu0  ;;  %v3774_v22 = vrot.slane %v3773_v9, 1  ;;  %v3801_v26 = vsel %vm713_vm6, %v3739_v5, %v3800_v11  ;;  %v3606_v44 = vadd.f32 %v7761_v61, %v8421_v36  ;;  %v3607_v6 = vadd.f32 %v7778_v37, %v8422_v13 }
0x14a3   :  { %v4887_v45 = vpop.f32.mrb[31].mxu0  ;;  %v3802_v1 = vsel %vm715_vm7, %v3748_v55, %v3801_v26  ;;  %v3608_v48 = vadd.f32 %v7761_v61, %v8423_v29  ;;  %v3609_v40 = vadd.f32 %v7778_v37, %v8424_v25  ;;  %v3610_v17 = vadd.f32 %v7761_v61, %v8425_v63  ;;  %v8430_v55 = vld [vmem:[#allocation32_spill] sm:$0xff] }
0x14a4   :  { %v7836_v23 = vadd.f32 %v4887_v45, %v4886_v0  ;;  %v3775_v51 = vmax.f32 %v3773_v9, %v3774_v22  ;;  %v3803_v15 = vsel %vm717_vm8, %v3757_v54, %v3802_v1  ;;  %v3611_v52 = vadd.f32 %v7778_v37, %v8426_v24 }
0x14a5   :  { %v3804_v10 = vsel %vm719_vm9, %v3766_v39, %v3803_v15  ;;  %v3612_v35 = vadd.f32 %v7761_v61, %v8427_v3  ;;  %v3613_v59 = vadd.f32 %v7778_v37, %v8428_v50  ;;  %v3614_v12 = vadd.f32 %v7761_v61, %v8429_v41 }
0x14a6   :  { %v4889_v60 = vpop.f32.mrb[32].mxu0  ;;  %v3805_v27 = vsel %vm721_vm10, %v3775_v51, %v3804_v10  ;;  %v3632_v56 = vsel %vm115_vm2, %v3600_v49, -inf  ;;  %v3633_v32 = vsel %vm115_vm2, %v3601_v28, -inf  ;;  %v3641_v2 = vsel %vm115_vm2, %v3602_v21, -inf }
0x14a7   :  { %v4890_v7 = vpop.f32.mrb[33].mxu0  ;;  %3808 = vrot.lane.b32.xlu0 %v3805_v27, %s5814_s28  ;;  %v3642_v38 = vsel %vm115_vm2, %v3603_v58, -inf  ;;  %v3650_v18 = vsel %vm115_vm2, %v3604_v31, -inf  ;;  %v3634_v47 = vmax.f32 %v3632_v56, %v3633_v32  ;;  %v3651_v20 = vsel %vm115_vm2, %v3605_v19, -inf }
0x14a8   :  { %v7859_v34 = vadd.f32 %v4890_v7, %v4889_v60  ;;  %v3643_v5 = vmax.f32 %v3641_v2, %v3642_v38  ;;  %v3615_v49 = vadd.f32 %v7778_v37, %v8430_v55  ;;  %v3652_v9 = vmax.f32 %v3650_v18, %v3651_v20 }
0x14a9   :  { %v3659_v54 = vsel %vm115_vm2, %v3606_v44, -inf  ;;  %v3660_v28 = vsel %vm115_vm2, %v3607_v6, -inf  ;;  %v3635_v39 = vrot.slane %v3634_v47, 4  ;;  %v3668_v58 = vsel %vm115_vm2, %v3608_v48, -inf }
0x14aa   :  { %v3644_v21 = vrot.slane %v3643_v5, 4  ;;  %v3661_v11 = vmax.f32 %v3659_v54, %v3660_v28  ;;  %v3653_v0 = vrot.slane %v3652_v9, 4  ;;  %v3669_v22 = vsel %vm115_vm2, %v3609_v40, -inf }
0x14ab   :  { %v3677_v26 = vsel %vm115_vm2, %v3610_v17, -inf  ;;  %v3678_v31 = vsel %vm115_vm2, %v3611_v52, -inf  ;;  %v3636_v62 = vmax.f32 %v3634_v47, %v3635_v39  ;;  %v3670_v1 = vmax.f32 %v3668_v58, %v3669_v22 }
0x14ac   :  { %v3645_v19 = vmax.f32 %v3643_v5, %v3644_v21  ;;  %v3662_v45 = vrot.slane %v3661_v11, 4  ;;  %v3654_v36 = vmax.f32 %v3652_v9, %v3653_v0  ;;  %v3679_v44 = vmax.f32 %v3677_v26, %v3678_v31 }
0x14ad   :  { %v3686_v13 = vsel %vm115_vm2, %v3612_v35, -inf  ;;  %v3687_v6 = vsel %vm115_vm2, %v3613_v59, -inf  ;;  %v3637_v29 = vrot.slane %v3636_v62, 2  ;;  %v3671_v15 = vrot.slane %v3670_v1, 4 }
0x14ae   :  { %v3646_v51 = vrot.slane %v3645_v19, 2  ;;  %v3663_v48 = vmax.f32 %v3661_v11, %v3662_v45  ;;  %v3655_v25 = vrot.slane %v3654_v36, 2  ;;  %v3680_v40 = vrot.slane %v3679_v44, 4 }
0x14af   :  { %v3688_v10 = vmax.f32 %v3686_v13, %v3687_v6  ;;  %v3695_v63 = vsel %vm115_vm2, %v3614_v12, -inf  ;;  %v3638_v17 = vmax.f32 %v3636_v62, %v3637_v29  ;;  %v3672_v3 = vmax.f32 %v3670_v1, %v3671_v15 }
0x14b0   :  { %v3647_v24 = vmax.f32 %v3645_v19, %v3646_v51  ;;  %v3664_v52 = vrot.slane %v3663_v48, 2  ;;  %v3656_v60 = vmax.f32 %v3654_v36, %v3655_v25  ;;  %v3681_v27 = vmax.f32 %v3679_v44, %v3680_v40 }
0x14b1   :  { %v3689_v50 = vrot.slane %v3688_v10, 4  ;;  %v3696_v35 = vsel %vm115_vm2, %v3615_v49, -inf  ;;  %v3639_v41 = vrot.slane %v3638_v17, 1  ;;  %v3673_v7 = vrot.slane %v3672_v3, 2 }
0x14b2   :  { %v3648_v59 = vrot.slane %v3647_v24, 1  ;;  %v3665_v56 = vmax.f32 %v3663_v48, %v3664_v52  ;;  %v3657_v32 = vrot.slane %v3656_v60, 1  ;;  %v3682_v2 = vrot.slane %v3681_v27, 2 }
0x14b3   :  { %v3690_v38 = vmax.f32 %v3688_v10, %v3689_v50  ;;  %v3697_v18 = vmax.f32 %v3695_v63, %v3696_v35  ;;  %v3640_v47 = vmax.f32 %v3638_v17, %v3639_v41  ;;  %v3674_v20 = vmax.f32 %v3672_v3, %v3673_v7  ;;  %v8431_v50 = vld [vmem:[#allocation35_spill] sm:$0xff] }
0x14b4   :  { %v3649_v5 = vmax.f32 %v3647_v24, %v3648_v59  ;;  %v3666_v12 = vrot.slane %v3665_v56, 1  ;;  %v3658_v55 = vmax.f32 %v3656_v60, %v3657_v32  ;;  %v3683_v9 = vmax.f32 %v3681_v27, %v3682_v2 }
0x14b5   :  { %v3691_v54 = vrot.slane %v3690_v38, 2  ;;  %v3698_v28 = vrot.slane %v3697_v18, 4  ;;  %v3675_v21 = vrot.slane %v3674_v20, 1 }
0x14b6   :  { %v3667_v39 = vmax.f32 %v3665_v56, %v3666_v12  ;;  %v3792_v49 = vsel %vm709_vm3, %v3649_v5, %v3640_v47  ;;  %v3684_v11 = vrot.slane %v3683_v9, 1 }
0x14b7   :  { %v3692_v58 = vmax.f32 %v3690_v38, %v3691_v54  ;;  %v3699_v0 = vmax.f32 %v3697_v18, %v3698_v28  ;;  %v3793_v22 = vsel %vm711_vm4, %v3658_v55, %v3792_v49  ;;  %v3676_v31 = vmax.f32 %v3674_v20, %v3675_v21  ;;  %v8432_v18 = vld [vmem:[#allocation11_spill] sm:$0xff]  ;;  %v4043_v49 = vld [vmem:[%s8303_s4 + $0x210] sm:$0xff] }
0x14b8   :  { %v2551_v26 = vpop.xlane.xlu0 %2550  ;;  %v3794_v62 = vsel %vm713_vm6, %v3667_v39, %v3793_v22  ;;  %v3685_v45 = vmax.f32 %v3683_v9, %v3684_v11  ;;  %v4044_v11 = vld [vmem:[%s8303_s4 + $0x218] sm:$0xff]  ;;  %v4045_v22 = vld [vmem:[%s8303_s4 + $0x220] sm:$0xff] }
0x14b9   :  { %v2552_v19 = vmul.f32 0.015625, %v2551_v26  ;;  %v3693_v1 = vrot.slane %v3692_v58, 1  ;;  %v3700_v36 = vrot.slane %v3699_v0, 2  ;;  %v3795_v44 = vsel %vm715_vm7, %v3676_v31, %v3794_v62  ;;  %v4046_v26 = vld [vmem:[%s8303_s4 + $0x228] sm:$0xff] }
0x14ba   :  { %v3796_v29 = vsel %vm717_vm8, %v3685_v45, %v3795_v44  ;;  %v5598_v31 = vpack.c.bf16 %v4044_v11, %v4043_v49  ;;  %v5602_v45 = vpack.c.bf16 %v4046_v26, %v4045_v22  ;;  %v4047_v44 = vld [vmem:[%s8303_s4 + $0x230] sm:$0xff] }
0x14bb   :  { %v2553_v13 = vsub.f32 %v7693_v30, %v2552_v19  ;;  %v3701_v6 = vmax.f32 %v3699_v0, %v3700_v36  ;;  %v3694_v51 = vmax.f32 %v3692_v58, %v3693_v1  ;;  %v4027_v58 = vld [vmem:[%s8303_s4 + $0x190] sm:$0xff]  ;;  %v4028_v0 = vld [vmem:[%s8303_s4 + $0x198] sm:$0xff]  ;;  %v4029_v1 = vld [vmem:[%s8303_s4 + $0x1a0] sm:$0xff] }
0x14bc   :  { %v3596_v24 = vpop.permute.xlu0 %3595  ;;  %v5600_v62 = vpack.c.bf16 %v4028_v0, %v4027_v58  ;;  %v4030_v36 = vld [vmem:[%s8303_s4 + $0x1a8] sm:$0xff] }
0x14bd   :  { %v2554_v48 = vmul.f32 %v2553_v13, %v2553_v13  ;;  %v3702_v15 = vrot.slane %v3701_v6, 1  ;;  %v3797_v25 = vsel %vm719_vm9, %v3694_v51, %v3796_v29  ;;  %v3599_v30 = vadd.f32 %v3596_v24, %v7778_v37  ;;  %v4031_v51 = vld [vmem:[%s8303_s4 + $0x1b0] sm:$0xff] }
0x14be   :  { %v3598_v59 = vadd.f32 %v3596_v24, %v7761_v61  ;;  %v4035_v24 = vld [vmem:[%s8303_s4 + $0x1d0] sm:$0xff] }
0x14bf   :  { %2556 = vrot.lane.b32.xlu1 %v2554_v48, %s5814_s28  ;;  %v3703_v40 = vmax.f32 %v3701_v6, %v3702_v15  ;;  %v5604_v6 = vpack.c.bf16 %v4030_v36, %v4029_v1  ;;  %v4032_v48 = vld [vmem:[%s8303_s4 + $0x1b8] sm:$0xff]  ;;  %v4049_v15 = vld [vmem:[%s8303_s4 + $0x240] sm:$0xff] }
0x14c1   :  { %v3798_v10 = vsel %vm721_vm10, %v3703_v40, %v3797_v25  ;;  %v4033_v40 = vld [vmem:[%s8303_s4 + $0x1c0] sm:$0xff] }
0x1519   :  { %v3809_v52 = vpop.permute.xlu0 %3808 }
0x151a   :  { %v3813_v3 = vadd.f32 %v3809_v52, %v3599_v30  ;;  %v4036_v52 = vld [vmem:[%s8303_s4 + $0x1d8] sm:$0xff]  ;;  %v4053_v30 = vld [vmem:[%s8303_s4 + $0x260] sm:$0xff] }
0x151c   :  { %v3815_v60 = vmul.f32 0.01, %v3813_v3 }
0x151e   :  { %v7886_v27 = vmax.f32 %v3813_v3, %v3815_v60  ;;  %v4054_v3 = vld [vmem:[%s8303_s4 + $0x268] sm:$0xff]  ;;  %v5616_v60 = vpack.c.bf16 %v4036_v52, %v4035_v24  ;;  %v4099_v24 = vld [vmem:[%s8303_s4 + $0x3d0] sm:$0xff]  ;;  %v4100_v52 = vld [vmem:[%s8303_s4 + $0x3d8] sm:$0xff] }
0x1531   :  { %v2557_v63 = vpop.permute.xlu1 %2556 }
0x1532   :  { %v2559_v17 = vsel %vm115_vm2, %v2557_v63, 0.0  ;;  %v4051_v63 = vld [vmem:[%s8303_s4 + $0x250] sm:$0xff] }
0x1533   :  { %2560 = vadd.xlane.f32.xlu1 %v2559_v17 }
0x1544   :  { %3806 = vrot.lane.b32.xlu1 %v3798_v10, %s5814_s28  ;;  %v4034_v10 = vld [vmem:[%s8303_s4 + $0x1c8] sm:$0xff] }
0x1548   :  { %3822 = vrot.lane.b32.xlu1 %v7886_v27, %s5814_s28 }
0x154c   :  { %2670 = vrot.lane.b32.xlu1 %v8431_v50, %s5814_s28  ;;  %v5618_v50 = vpack.c.bf16 %v4054_v3, %v4053_v30  ;;  %v5675_v30 = vpack.c.bf16 %v4100_v52, %v4099_v24  ;;  %v4101_v3 = vld [vmem:[%s8303_s4 + $0x3e0] sm:$0xff]  ;;  %v4067_v52 = vld [vmem:[%s8303_s4 + $0x2d0] sm:$0xff] }
0x15c0   :  { %v2561_v35 = vpop.xlane.xlu1 %2560 }
0x15c1   :  { %v2562_v41 = vmul.f32 0.015625, %v2561_v35  ;;  %v4037_v35 = vld [vmem:[%s8303_s4 + $0x1e0] sm:$0xff] }
0x15c3   :  { %v2563_v56 = vadd.f32 1e-05, %v2562_v41  ;;  %v4038_v41 = vld [vmem:[%s8303_s4 + $0x1e8] sm:$0xff] }
0x15c4   :  { %v3807_v7 = vpop.permute.xlu1 %3806 }
0x15c5   :  { %5770 = vrsqrt.f32 %v2563_v56  ;;  %v3812_v37 = vadd.f32 %v3807_v7, %v3598_v59  ;;  %v4055_v59 = vld [vmem:[%s8303_s4 + $0x270] sm:$0xff]  ;;  %v4056_v56 = vld [vmem:[%s8303_s4 + $0x278] sm:$0xff]  ;;  %v5620_v7 = vpack.c.bf16 %v4038_v41, %v4037_v35 }
0x15c6   :  { %v4103_v35 = vld [vmem:[%s8303_s4 + $0x3f0] sm:$0xff]  ;;  %v4104_v41 = vld [vmem:[%s8303_s4 + $0x3f8] sm:$0xff] }
0x15c7   :  { %v3814_v32 = vmul.f32 0.01, %v3812_v37 }
0x15c8   :  { %v3823_v61 = vpop.permute.xlu1 %3822 }
0x15c9   :  { %v7893_v2 = vmax.f32 %v3812_v37, %v3814_v32  ;;  %v3829_v20 = vsel %vm115_vm2, %v3823_v61, 0.0  ;;  %v5622_v37 = vpack.c.bf16 %v4056_v56, %v4055_v59  ;;  %v4039_v32 = vld [vmem:[%s8303_s4 + $0x1f0] sm:$0xff]  ;;  %v4041_v61 = vld [vmem:[%s8303_s4 + $0x200] sm:$0xff]  ;;  %v5681_v59 = vpack.c.bf16 %v4104_v41, %v4103_v35 }
0x15ca   :  { %v4105_v56 = vld [vmem:[%s8303_s4 + $0x400] sm:$0xff] }
0x15cb   :  { %3820 = vrot.lane.b32.xlu0 %v7893_v2, %s5814_s28  ;;  %v4069_v41 = vld [vmem:[%s8303_s4 + $0x2e0] sm:$0xff] }
0x15cc   :  { %v2671_v54 = vpop.permute.xlu1 %2670 }
0x15cf   :  { %v5771_v38 = vpop.eup %5770  ;;  %2668 = vrot.lane.b32.xlu0 %v8432_v18, %s5814_s28  ;;  %v4057_v18 = vld [vmem:[%s8303_s4 + $0x280] sm:$0xff] }
0x15d0   :  { %v2565_v47 = vmul.f32 %v5771_v38, %v2553_v13  ;;  %v4048_v13 = vld [vmem:[%s8303_s4 + $0x238] sm:$0xff] }
0x15d1   :  { %v5606_v29 = vpack.c.bf16 %v4048_v13, %v4047_v44  ;;  %v4040_v38 = vld [vmem:[%s8303_s4 + $0x1f8] sm:$0xff] }
0x15d2   :  { %v2566_v5 = vmul.f32 %v2565_v47, %v6512_v46  ;;  %v4058_v47 = vld [vmem:[%s8303_s4 + $0x288] sm:$0xff] }
0x15d4   :  { %v2567_v12 = vadd.f32 %v2566_v5, %v6514_v43  ;;  %v5624_v5 = vpack.c.bf16 %v4040_v38, %v4039_v32  ;;  %v4107_v38 = vld [vmem:[%s8303_s4 + $0x410] sm:$0xff] }
0x15d6   :  { %2569 = vrot.lane.b32.xlu0 %v2567_v12, %s5814_s28  ;;  %v5626_v12 = vpack.c.bf16 %v4058_v47, %v4057_v18  ;;  %v4108_v18 = vld [vmem:[%s8303_s4 + $0x418] sm:$0xff] }
0x15f5   :  { %3830 = vadd.xlane.f32.xlu0 %v3829_v20  ;;  %v4042_v20 = vld [vmem:[%s8303_s4 + $0x208] sm:$0xff] }
0x163d   :  { %v3821_v55 = vpop.permute.xlu0 %3820 }
0x163e   :  { %v3826_v9 = vsel %vm115_vm2, %v3821_v55, 0.0  ;;  %v5628_v55 = vpack.c.bf16 %v4042_v20, %v4041_v61  ;;  %v4109_v61 = vld [vmem:[%s8303_s4 + $0x420] sm:$0xff]  ;;  %v4110_v20 = vld [vmem:[%s8303_s4 + $0x428] sm:$0xff] }
0x163f   :  { %3827 = vadd.xlane.f32.xlu1 %v3826_v9  ;;  %v8433_v9 = vmov 0.0|0.0  }
0x1641   :  { %v2669_v28 = vpop.permute.xlu0 %2668 }
0x1642   :  { %v2672_v39 = vsel %vm115_vm2, %v2669_v28, %v2671_v54 }
0x1643   :  { %3876 = vmatprep.subr.mxu1 %v2672_v39 }
0x1648   :  { %v2570_v21 = vpop.permute.xlu0 %2569 }
0x1649   :  { %2572 = vst.msk [vmem:[#allocation3 + $0x18] sm:$0xff] %vm115_vm2, %v2570_v21 }
0x164a   :  { %2675 = vst.msk [vmem:[#allocation3 + $0x18] sm:$0xff] %vm760_vm11, %v2669_v28 }
0x1651   :  { %v3874_v19 = vld [vmem:[#allocation3 + $0x18] sm:$0xff] }
0x1652   :  { %3877 = vmatpush1.msra.mxu1 %v3874_v19 }
0x1653   :  { %4591 = vmatmul.mubr.msk.f32.vlgmr.msra.gmra.mrb[22].mxu1 %vm39_vm0, %v8409_v14  ;;  %5599 = vmatprep.subr.bf16.mxu1 %v5598_v31  ;;  %v4050_v14 = vld [vmem:[%s8303_s4 + $0x248] sm:$0xff]  ;;  %v8434_v31 = vld [vmem:[#allocation12_spill] sm:$0xff] }
0x1654   :  { %5601 = vmatpush3.bf16.msra.mxu1 %v5600_v62  ;;  %3946 = vmatprep.mubr.f32.mxu1 %v8383_v33  ;;  %v5608_v33 = vpack.c.bf16 %v4032_v48, %v4031_v51  ;;  %v5610_v25 = vpack.c.bf16 %v4050_v14, %v4049_v15 }
0x1655   :  { %5603 = vmatprep.subr.bf16.mxu1 %v5602_v45 }
0x1657   :  { %4592 = vmatmul.mubr.msk.f32.gmra.mrb[24].mxu1 %vm39_vm0, %v6412_v16  ;;  %v4052_v16 = vld [vmem:[%s8303_s4 + $0x258] sm:$0xff] }
0x1658   :  { %5605 = vmatpush3.bf16.msra.mxu1 %v5604_v6  ;;  %4264 = vmatprep.mubr.f32.mxu1 %v7655_v42  ;;  %v5612_v42 = vpack.c.bf16 %v4034_v10, %v4033_v40  ;;  %v5614_v17 = vpack.c.bf16 %v4052_v16, %v4051_v63  ;;  %v4096_v10 = vld [vmem:[%s8303_s4 + $0x3b8] sm:$0xff]  ;;  %v4097_v16 = vld [vmem:[%s8303_s4 + $0x3c0] sm:$0xff] }
0x1659   :  { %5607 = vmatprep.subr.bf16.mxu1 %v5606_v29 }
0x165c   :  { %5609 = vmatpush3.bf16.msra.mxu1 %v5608_v33  ;;  %v4094_v33 = vld [vmem:[%s8303_s4 + $0x3a8] sm:$0xff] }
0x165d   :  { %5611 = vmatprep.subr.bf16.mxu1 %v5610_v25  ;;  %v4095_v25 = vld [vmem:[%s8303_s4 + $0x3b0] sm:$0xff] }
0x165e   :  { %v5669_v63 = vpack.c.bf16 %v4096_v10, %v4095_v25  ;;  %v4065_v10 = vld [vmem:[%s8303_s4 + $0x2c0] sm:$0xff] }
0x1660   :  { %5613 = vmatpush3.bf16.msra.mxu1 %v5612_v42  ;;  %v4098_v42 = vld [vmem:[%s8303_s4 + $0x3c8] sm:$0xff] }
0x1661   :  { %5615 = vmatprep.subr.bf16.mxu1 %v5614_v17  ;;  %v5672_v17 = vpack.c.bf16 %v4098_v42, %v4097_v16  ;;  %v4083_v16 = vld [vmem:[%s8303_s4 + $0x350] sm:$0xff]  ;;  %v4084_v42 = vld [vmem:[%s8303_s4 + $0x358] sm:$0xff] }
0x1662   :  { %v5646_v24 = vpack.c.bf16 %v4084_v42, %v4083_v16 }
0x1664   :  { %5617 = vmatpush3.bf16.msra.mxu1 %v5616_v60  ;;  %v4102_v60 = vld [vmem:[%s8303_s4 + $0x3e8] sm:$0xff] }
0x1665   :  { %5619 = vmatprep.subr.bf16.mxu1 %v5618_v50  ;;  %v5678_v50 = vpack.c.bf16 %v4102_v60, %v4101_v3  ;;  %v4085_v3 = vld [vmem:[%s8303_s4 + $0x360] sm:$0xff]  ;;  %v4086_v60 = vld [vmem:[%s8303_s4 + $0x368] sm:$0xff] }
0x1666   :  { %v5650_v35 = vpack.c.bf16 %v4086_v60, %v4085_v3 }
0x1668   :  { %5621 = vmatpush3.bf16.msra.mxu1 %v5620_v7  ;;  %v4106_v7 = vld [vmem:[%s8303_s4 + $0x408] sm:$0xff] }
0x1669   :  { %5623 = vmatprep.subr.bf16.mxu1 %v5622_v37  ;;  %v5684_v37 = vpack.c.bf16 %v4106_v7, %v4105_v56 }
0x166c   :  { %5625 = vmatpush3.bf16.msra.mxu1 %v5624_v5 }
0x166d   :  { %5627 = vmatprep.subr.bf16.mxu1 %v5626_v12  ;;  %v5687_v12 = vpack.c.bf16 %v4108_v18, %v4107_v38  ;;  %v4087_v38 = vld [vmem:[%s8303_s4 + $0x370] sm:$0xff]  ;;  %v4088_v18 = vld [vmem:[%s8303_s4 + $0x378] sm:$0xff] }
0x1670   :  { %5629 = vmatpush3.bf16.msra.mxu1 %v5628_v55  ;;  %v5690_v55 = vpack.c.bf16 %v4110_v20, %v4109_v61  ;;  %v4089_v20 = vld [vmem:[%s8303_s4 + $0x380] sm:$0xff] }
0x1671   :  { %5662 = vmatprep.subr.bf16.mxu1 %v8433_v9 }
0x1673   :  { %4265 = vmatmul.mubr.f32.vlgmr.msra.gmra.mrb[26].mxu1 %v7664_v57 }
0x1674   :  { %4269 = vmatprep.mubr.f32.mxu1 %v7675_v53 }
0x1677   :  { %4270 = vmatmul.mubr.f32.gmra.mrb[28].mxu1 %v7684_v4 }
0x1682   :  { %v3831_v54 = vpop.xlane.xlu0 %3830 }
0x1683   :  { %v3833_v28 = vmul.f32 0.015625, %v3831_v54  ;;  %v4111_v54 = vld [vmem:[%s8303_s4 + $0x430] sm:$0xff] }
0x1685   :  { %v8014_v39 = vsub.f32 %v7886_v27, %v3833_v28  ;;  %v4112_v28 = vld [vmem:[%s8303_s4 + $0x438] sm:$0xff] }
0x1687   :  { %v3837_v21 = vmul.f32 %v8014_v39, %v8014_v39 }
0x1689   :  { %3842 = vrot.lane.b32.xlu1 %v3837_v21, %s5814_s28  ;;  %v4113_v21 = vld [vmem:[%s8303_s4 + $0x440] sm:$0xff] }
0x16cc   :  { %v3828_v49 = vpop.xlane.xlu1 %3827 }
0x16cd   :  { %v3832_v11 = vmul.f32 0.015625, %v3828_v49 }
0x16cf   :  { %v8020_v58 = vsub.f32 %v7893_v2, %v3832_v11  ;;  %v4118_v2 = vrot.slane %v7755_v8, %v8434_v31  ;;  %v4091_v8 = vld [vmem:[%s8303_s4 + $0x390] sm:$0xff]  ;;  %v5693_v11 = vpack.c.bf16 %v4112_v28, %v4111_v54  ;;  %v4073_v54 = vld [vmem:[%s8303_s4 + $0x300] sm:$0xff] }
0x16d1   :  { %v3836_v57 = vmul.f32 %v8020_v58, %v8020_v58  ;;  %v4192_v36 = vadd.f32 %v7836_v23, %v4118_v2  ;;  %v4197_v51 = vadd.f32 %v7859_v34, %v4118_v2  ;;  %v4092_v23 = vld [vmem:[%s8303_s4 + $0x398] sm:$0xff]  ;;  %v4093_v34 = vld [vmem:[%s8303_s4 + $0x3a0] sm:$0xff]  ;;  %v4075_v2 = vld [vmem:[%s8303_s4 + $0x310] sm:$0xff] }
0x16d2   :  { %v5663_v14 = vpack.c.bf16 %v4092_v23, %v4091_v8  ;;  %v5666_v40 = vpack.c.bf16 %v4094_v33, %v4093_v34  ;;  %v4064_v34 = vld [vmem:[%s8303_s4 + $0x2b8] sm:$0xff]  ;;  %v4081_v33 = vld [vmem:[%s8303_s4 + $0x340] sm:$0xff] }
0x16d3   :  { %3840 = vrot.lane.b32.xlu0 %v3836_v57, %s5814_s28  ;;  %v4114_v57 = vld [vmem:[%s8303_s4 + $0x448] sm:$0xff] }
0x16d4   :  { %5664 = vmatpush1.bf16.msra.mxu1 %v5663_v14  ;;  %v4063_v14 = vld [vmem:[%s8303_s4 + $0x2b0] sm:$0xff] }
0x16d5   :  { %5665 = vmatprep.subr.bf16.mxu1 %v8433_v9  ;;  %v5640_v25 = vpack.c.bf16 %v4064_v34, %v4063_v14 }
0x16d8   :  { %5667 = vmatpush1.bf16.msra.mxu1 %v5666_v40 }
0x16d9   :  { %5668 = vmatprep.subr.bf16.mxu1 %v8433_v9 }
0x16dc   :  { %5670 = vmatpush1.bf16.msra.mxu1 %v5669_v63  ;;  %v4066_v63 = vld [vmem:[%s8303_s4 + $0x2c8] sm:$0xff] }
0x16dd   :  { %5671 = vmatprep.subr.bf16.mxu1 %v8433_v9 }
0x16e0   :  { %5673 = vmatpush1.bf16.msra.mxu1 %v5672_v17  ;;  %v5644_v17 = vpack.c.bf16 %v4066_v63, %v4065_v10 }
0x16e1   :  { %5674 = vmatprep.subr.bf16.mxu1 %v8433_v9 }
0x16e4   :  { %5676 = vmatpush1.bf16.msra.mxu1 %v5675_v30  ;;  %v4068_v30 = vld [vmem:[%s8303_s4 + $0x2d8] sm:$0xff] }
0x16e5   :  { %5677 = vmatprep.subr.bf16.mxu1 %v8433_v9 }
0x16e8   :  { %5679 = vmatpush1.bf16.msra.mxu1 %v5678_v50  ;;  %v5648_v50 = vpack.c.bf16 %v4068_v30, %v4067_v52 }
0x16e9   :  { %5680 = vmatprep.subr.bf16.mxu1 %v8433_v9 }
0x16ec   :  { %5682 = vmatpush1.bf16.msra.mxu1 %v5681_v59  ;;  %v4070_v59 = vld [vmem:[%s8303_s4 + $0x2e8] sm:$0xff] }
0x16ed   :  { %5683 = vmatprep.subr.bf16.mxu1 %v8433_v9  ;;  %v5652_v56 = vpack.c.bf16 %v4070_v59, %v4069_v41 }
0x16f0   :  { %5685 = vmatpush1.bf16.msra.mxu1 %v5684_v37 }
0x16f1   :  { %5686 = vmatprep.subr.bf16.mxu1 %v8433_v9 }
0x16f4   :  { %5688 = vmatpush1.bf16.msra.mxu1 %v5687_v12  ;;  %v4072_v12 = vld [vmem:[%s8303_s4 + $0x2f8] sm:$0xff] }
0x16f5   :  { %5689 = vmatprep.subr.bf16.mxu1 %v8433_v9 }
0x16f8   :  { %5691 = vmatpush1.bf16.msra.mxu1 %v5690_v55  ;;  %v4090_v55 = vld [vmem:[%s8303_s4 + $0x388] sm:$0xff] }
0x16f9   :  { %5692 = vmatprep.subr.bf16.mxu1 %v8433_v9  ;;  %v5658_v28 = vpack.c.bf16 %v4090_v55, %v4089_v20  ;;  %v4466_v20 = vld [vmem:[%s8303_s4 + $0x488] sm:$0xff] }
0x16fb   :  { %v3843_v53 = vpop.permute.xlu1 %3842 }
0x16fc   :  { %v3849_v4 = vsel %vm115_vm2, %v3843_v53, 0.0  ;;  %5694 = vmatpush1.bf16.msra.mxu1 %v5693_v11 }
0x16fd   :  { %3850 = vadd.xlane.f32.xlu0 %v3849_v4  ;;  %v5696_v4 = vpack.c.bf16 %v4114_v57, %v4113_v21  ;;  %5695 = vmatprep.subr.bf16.mxu1 %v8433_v9  ;;  %v4060_v9 = vld [vmem:[%s8303_s4 + $0x298] sm:$0xff]  ;;  %v4074_v21 = vld [vmem:[%s8303_s4 + $0x308] sm:$0xff] }
0x16fe   :  { %v5660_v11 = vpack.c.bf16 %v4074_v21, %v4073_v54 }
0x1700   :  { %5697 = vmatpush1.bf16.msra.mxu1 %v5696_v4 }
0x1726   :  { %v3942_v27 = vpop.f32.mrb[22].mxu1 }
0x1727   :  { %v8026_v0 = vpop.f32.mrb[23].mxu1 }
0x172a   :  { %v8028_v22 = vpop.f32.mrb[24].mxu1 }
0x172b   :  { %v8030_v26 = vpop.f32.mrb[25].mxu1 }
0x1745   :  { %v3841_v62 = vpop.permute.xlu0 %3840 }
0x1746   :  { %v3846_v19 = vsel %vm115_vm2, %v3841_v62, 0.0  ;;  %v4924_v45 = vpop.f32.mrb[26].mxu1  ;;  %v4076_v62 = vld [vmem:[%s8303_s4 + $0x318] sm:$0xff] }
0x1747   :  { %v4925_v1 = vpop.f32.mrb[27].mxu1  ;;  %3847 = vadd.xlane.f32.xlu1 %v3846_v19  ;;  %v5630_v19 = vpack.c.bf16 %v4076_v62, %v4075_v2 }
0x1748   :  { %v4926_v44 = vadd.f32 %v4925_v1, %v4924_v45  ;;  %v4077_v45 = vld [vmem:[%s8303_s4 + $0x320] sm:$0xff]  ;;  %v4078_v1 = vld [vmem:[%s8303_s4 + $0x328] sm:$0xff] }
0x1749   :  { %5631 = vmatprep.subr.bf16.mxu0 %v5630_v19  ;;  %v3983_v19 = vld [vmem:[#allocation2 + $0x20] sm:$0xff] }
0x174a   :  { %v8036_v13 = vadd.f32 %v4926_v44, %v4192_v36  ;;  %v4927_v6 = vpop.f32.mrb[28].mxu1  ;;  %v5634_v44 = vpack.c.bf16 %v4078_v1, %v4077_v45  ;;  %v3991_v45 = vld [vmem:[#allocation2 + $0x60] sm:$0xff] }
0x174b   :  { %v4928_v29 = vpop.f32.mrb[29].mxu1 }
0x174c   :  { %v4929_v48 = vadd.f32 %v4928_v29, %v4927_v6  ;;  %v4061_v6 = vld [vmem:[%s8303_s4 + $0x2a0] sm:$0xff]  ;;  %v4062_v29 = vld [vmem:[%s8303_s4 + $0x2a8] sm:$0xff] }
0x174d   :  { %v5636_v8 = vpack.c.bf16 %v4062_v29, %v4061_v6 }
0x174e   :  { %v8039_v15 = vadd.f32 %v4929_v48, %v4197_v51  ;;  %v4079_v51 = vld [vmem:[%s8303_s4 + $0x330] sm:$0xff]  ;;  %v4080_v48 = vld [vmem:[%s8303_s4 + $0x338] sm:$0xff] }
0x174f   :  { %v5638_v23 = vpack.c.bf16 %v4080_v48, %v4079_v51 }
0x1758   :  { %3957 = vrot.lane.b32.xlu1 %v3942_v27, %s5814_s28 }
0x178a   :  { %v3851_v32 = vpop.xlane.xlu0 %3850 }
0x178b   :  { %v3853_v47 = vmul.f32 0.015625, %v3851_v32 }
0x178d   :  { %v3855_v5 = vadd.f32 1e-05, %v3853_v47  ;;  %v4071_v47 = vld [vmem:[%s8303_s4 + $0x2f0] sm:$0xff] }
0x178e   :  { %v5656_v61 = vpack.c.bf16 %v4072_v12, %v4071_v47  ;;  %v4463_v47 = vld [vmem:[%s8303_s4 + $0x470] sm:$0xff] }
0x178f   :  { %5772 = vrsqrt.f32 %v3855_v5  ;;  %v5654_v5 = vpack.c.bf16 %v4088_v18, %v4087_v38  ;;  %v4462_v38 = vld [vmem:[%s8303_s4 + $0x468] sm:$0xff] }
0x1799   :  { %v5773_v49 = vpop.eup %5772 }
0x179a   :  { %v3859_v53 = vmul.f32 %v5773_v49, %v8014_v39  ;;  %v4059_v39 = vld [vmem:[%s8303_s4 + $0x290] sm:$0xff] }
0x179b   :  { %v5632_v36 = vpack.c.bf16 %v4060_v9, %v4059_v39 }
0x179c   :  { %v3861_v27 = vmul.f32 %v3859_v53, %v6512_v46 }
0x179d   :  { %5633 = vmatpush3.bf16.msra.mxu0 %v5632_v36 }
0x179e   :  { %v3863_v31 = vadd.f32 %v3861_v27, %v6514_v43  ;;  %5635 = vmatprep.subr.bf16.mxu0 %v5634_v44 }
0x17a0   :  { %3868 = vrot.lane.b32.xlu1 %v3863_v31, %s5814_s28 }
0x17a1   :  { %5637 = vmatpush3.bf16.msra.mxu0 %v5636_v8 }
0x17a2   :  { %5639 = vmatprep.subr.bf16.mxu0 %v5638_v23 }
0x17a4   :  { %3959 = vrot.lane.b32.xlu1 %v8026_v0, %s5814_s28  ;;  %v4082_v0 = vld [vmem:[%s8303_s4 + $0x348] sm:$0xff] }
0x17a5   :  { %v5642_v40 = vpack.c.bf16 %v4082_v0, %v4081_v33  ;;  %5641 = vmatpush3.bf16.msra.mxu0 %v5640_v25 }
0x17a7   :  { %5643 = vmatprep.subr.bf16.mxu0 %v5642_v40 }
0x17a9   :  { %5645 = vmatpush3.bf16.msra.mxu0 %v5644_v17 }
0x17aa   :  { %5647 = vmatprep.subr.bf16.mxu0 %v5646_v24 }
0x17ad   :  { %5649 = vmatpush3.bf16.msra.mxu0 %v5648_v50 }
0x17ae   :  { %5651 = vmatprep.subr.bf16.mxu0 %v5650_v35 }
0x17b1   :  { %5653 = vmatpush3.bf16.msra.mxu0 %v5652_v56  ;;  %v4459_v56 = vld [vmem:[%s8303_s4 + $0x450] sm:$0xff] }
0x17b2   :  { %5655 = vmatprep.subr.bf16.mxu0 %v5654_v5  ;;  %v4464_v5 = vld [vmem:[%s8303_s4 + $0x478] sm:$0xff] }
0x17b3   :  { %v5706_v12 = vpack.c.bf16 %v4464_v5, %v4463_v47 }
0x17b5   :  { %5657 = vmatpush3.bf16.msra.mxu0 %v5656_v61  ;;  %v4465_v61 = vld [vmem:[%s8303_s4 + $0x480] sm:$0xff] }
0x17b6   :  { %5659 = vmatprep.subr.bf16.mxu0 %v5658_v28  ;;  %v5710_v55 = vpack.c.bf16 %v4466_v20, %v4465_v61 }
0x17b9   :  { %5661 = vmatpush3.bf16.msra.mxu0 %v5660_v11 }
0x17d4   :  { %v3848_v7 = vpop.xlane.xlu1 %3847 }
0x17d5   :  { %v3852_v37 = vmul.f32 0.015625, %v3848_v7  ;;  %v4460_v7 = vld [vmem:[%s8303_s4 + $0x458] sm:$0xff] }
0x17d7   :  { %v3854_v32 = vadd.f32 1e-05, %v3852_v37  ;;  %v4461_v37 = vld [vmem:[%s8303_s4 + $0x460] sm:$0xff] }
0x17d8   :  { %v3958_v27 = vpop.permute.xlu1 %3957  ;;  %v5702_v18 = vpack.c.bf16 %v4462_v38, %v4461_v37 }
0x17d9   :  { %5774 = vrsqrt.f32 %v3854_v32  ;;  %v5698_v32 = vpack.c.bf16 %v4460_v7, %v4459_v56 }
0x17db   :  { %5699 = vmatprep.subr.bf16.mxu0 %v5698_v32 }
0x17e3   :  { %v5775_v49 = vpop.eup %5774 }
0x17e4   :  { %v3858_v57 = vmul.f32 %v5775_v49, %v8020_v58 }
0x17e6   :  { %v3860_v53 = vmul.f32 %v3858_v57, %v6512_v46 }
0x17e8   :  { %v3862_v4 = vadd.f32 %v3860_v53, %v6514_v43 }
0x17ea   :  { %3866 = vrot.lane.b32.xlu0 %v3862_v4, %s5814_s28 }
0x17ee   :  { %3961 = vrot.lane.b32.xlu0 %v8028_v22, %s5814_s28 }
0x17f2   :  { %3963 = vrot.lane.b32.xlu0 %v8030_v26, %s5814_s28 }
0x1812   :  { %v3869_v31 = vpop.permute.xlu1 %3868 }
0x1813   :  { %3873 = vst.msk [vmem:[#allocation2 + $0x68] sm:$0xff] %vm115_vm2, %v3869_v31 }
0x1816   :  { %v3960_v2 = vpop.permute.xlu1 %3959 }
0x1817   :  { %v3965_v58 = vsel %vm115_vm2, %v3958_v27, %v3960_v2  ;;  %3975 = vst.msk [vmem:[#allocation2 + $0x38] sm:$0xff] %vm115_vm2, %v3960_v2 }
0x181e   :  { %v3986_v46 = vld [vmem:[#allocation2 + $0x38] sm:$0xff] }
0x181f   :  { %4593 = vmatprep.mubr.msk.f32.mxu1 %vm115_vm2, %v3986_v46  ;;  %v8436_v46 = vld [vmem:[#allocation9_spill] sm:$0xff] }
0x1820   :  { %4415 = vmatmul.mubr.f32.vlgmr.msra.gmra.mrb[30].mxu1 %v3965_v58 }
0x185c   :  { %v3867_v43 = vpop.permute.xlu0 %3866 }
0x185d   :  { %3872 = vst.msk [vmem:[#allocation2 + $0x28] sm:$0xff] %vm115_vm2, %v3867_v43 }
0x185e   :  { %3973 = vst.msk [vmem:[#allocation2 + $0x28] sm:$0xff] %vm760_vm11, %v3958_v27  ;;  %v8435_v27 = vld [vmem:[#allocation8_spill] sm:$0xff] }
0x1860   :  { %v3962_v22 = vpop.permute.xlu0 %3961 }
0x1861   :  { %3976 = vst.msk [vmem:[#allocation2 + $0x68] sm:$0xff] %vm760_vm11, %v3962_v22 }
0x1864   :  { %v3964_v26 = vpop.permute.xlu0 %3963 }
0x1865   :  { %v3966_v62 = vsel %vm115_vm2, %v3962_v22, %v3964_v26  ;;  %3978 = vst.msk [vmem:[#allocation2 + $0x78] sm:$0xff] %vm115_vm2, %v3964_v26  ;;  %v3984_v39 = vld [vmem:[#allocation2 + $0x28] sm:$0xff] }
0x1866   :  { %4339 = vmatprep.mubr.f32.mxu0 %v3984_v39  ;;  %v8437_v39 = vld [vmem:[#allocation13_spill] sm:$0xff] }
0x1867   :  { %4340 = vmatmul.mubr.f32.vlgmr.msra.gmra.mrb[34].mxu0 %v3983_v19 }
0x1868   :  { %v3992_v9 = vld [vmem:[#allocation2 + $0x68] sm:$0xff]  ;;  %5701 = vmatpush3.bf16.msra.mxu0 %v5698_v32 }
0x1869   :  { %4344 = vmatprep.mubr.f32.mxu0 %v3992_v9  ;;  %5703 = vmatprep.subr.bf16.mxu0 %v5702_v18 }
0x186b   :  { %4345 = vmatmul.mubr.f32.gmra.mrb[36].mxu0 %v3991_v45 }
0x186c   :  { %v3994_v1 = vld [vmem:[#allocation2 + $0x78] sm:$0xff]  ;;  %5705 = vmatpush3.bf16.msra.mxu0 %v5702_v18 }
0x186d   :  { %4594 = vmatprep.mubr.msk.f32.mxu1 %vm115_vm2, %v3994_v1  ;;  %5707 = vmatprep.subr.bf16.mxu0 %v5706_v12 }
0x186e   :  { %4420 = vmatmul.mubr.f32.gmra.mrb[32].mxu1 %v3966_v62  ;;  %v5785_v62 = vld [vmem:[%s8301_s2 + $0x8] sm:$0xff] }
0x186f   :  { %v4470_v19 = vrot.slane %v5785_v62, %v8437_v39 }
0x1870   :  { %5709 = vmatpush3.bf16.msra.mxu0 %v5706_v12 }
0x1871   :  { %5711 = vmatprep.subr.bf16.mxu0 %v5710_v55 }
0x1874   :  { %5713 = vmatpush3.bf16.msra.mxu0 %v5710_v55 }
0x18f3   :  { %v4416_v36 = vpop.f32.mrb[30].mxu1 }
0x18f4   :  { %v4418_v44 = vpop.f32.mrb[31].mxu1 }
0x193a   :  { %v4962_v6 = vpop.f32.mrb[34].mxu0 }
0x193b   :  { %v4963_v29 = vpop.f32.mrb[35].mxu0 }
0x193c   :  { %v4964_v51 = vadd.f32 %v4963_v29, %v4962_v6 }
0x193e   :  { %v4342_v48 = vadd.f32 %v4964_v51, %v8036_v13  ;;  %v4965_v8 = vpop.f32.mrb[36].mxu0 }
0x193f   :  { %v4966_v23 = vpop.f32.mrb[37].mxu0 }
0x1940   :  { %v4417_v14 = vadd.f32 %v4416_v36, %v4342_v48  ;;  %v4967_v34 = vadd.f32 %v4966_v23, %v4965_v8 }
0x1941   :  { %v4421_v33 = vpop.f32.mrb[32].mxu1 }
0x1942   :  { %v4347_v0 = vadd.f32 %v4967_v34, %v8039_v15  ;;  %v4423_v25 = vpop.f32.mrb[33].mxu1  ;;  %v4425_v40 = vmul.f32 0.01, %v4417_v14 }
0x1944   :  { %v4422_v10 = vadd.f32 %v4421_v33, %v4347_v0  ;;  %v4427_v63 = vmax.f32 %v4417_v14, %v4425_v40 }
0x1946   :  { %v4426_v16 = vmul.f32 0.01, %v4422_v10  ;;  %v4429_v42 = vsel %vm115_vm2, %v4427_v63, 0.0 }
0x1947   :  { %4430 = vadd.xlane.f32.xlu1 %v4429_v42 }
0x1948   :  { %v4428_v17 = vmax.f32 %v4422_v10, %v4426_v16 }
0x194a   :  { %v4432_v24 = vsel %vm115_vm2, %v4428_v17, 0.0 }
0x194b   :  { %4433 = vadd.xlane.f32.xlu0 %v4432_v24 }
0x19d4   :  { %v4431_v13 = vpop.xlane.xlu1 %4430 }
0x19d5   :  { %v4435_v52 = vmul.f32 0.015625, %v4431_v13 }
0x19d7   :  { %v4437_v30 = vsub.f32 %v4427_v63, %v4435_v52 }
0x19d8   :  { %v4434_v3 = vpop.xlane.xlu0 %4433 }
0x19d9   :  { %v4436_v60 = vmul.f32 0.015625, %v4434_v3  ;;  %v4439_v50 = vmul.f32 %v4437_v30, %v4437_v30 }
0x19db   :  { %v4438_v35 = vsub.f32 %v4428_v17, %v4436_v60  ;;  %v4441_v15 = vsel %vm115_vm2, %v4439_v50, 0.0 }
0x19dc   :  { %4442 = vadd.xlane.f32.xlu0 %v4441_v15 }
0x19dd   :  { %v4440_v41 = vmul.f32 %v4438_v35, %v4438_v35 }
0x19df   :  { %v4444_v59 = vsel %vm115_vm2, %v4440_v41, 0.0 }
0x19e0   :  { %4445 = vadd.xlane.f32.xlu1 %v4444_v59 }
0x1a69   :  { %v4443_v54 = vpop.xlane.xlu0 %4442 }
0x1a6a   :  { %v4447_v28 = vmul.f32 0.015625, %v4443_v54 }
0x1a6c   :  { %v4449_v21 = vadd.f32 1e-05, %v4447_v28 }
0x1a6d   :  { %v4446_v49 = vpop.xlane.xlu1 %4445 }
0x1a6e   :  { %5776 = vrsqrt.f32 %v4449_v21  ;;  %v4448_v11 = vmul.f32 0.015625, %v4446_v49 }
0x1a70   :  { %v4450_v57 = vadd.f32 1e-05, %v4448_v11 }
0x1a72   :  { %5778 = vrsqrt.f32 %v4450_v57 }
0x1a78   :  { %v5777_v53 = vpop.eup %5776 }
0x1a79   :  { %v4453_v4 = vmul.f32 %v5777_v53, %v4437_v30 }
0x1a7b   :  { %v4455_v31 = vmul.f32 %v4453_v4, %v8435_v27 }
0x1a7c   :  { %v5779_v2 = vpop.eup %5778 }
0x1a7d   :  { %v4454_v58 = vmul.f32 %v5779_v2, %v4438_v35  ;;  %v4457_v43 = vadd.f32 %v4455_v31, %v8436_v46 }
0x1a7f   :  { %v4456_v22 = vmul.f32 %v4454_v58, %v8435_v27  ;;  %5209 = vmatprep.mubr.msk.f32.mxu0 %vm115_vm2, %v4457_v43 }
0x1a81   :  { %v4458_v26 = vadd.f32 %v4456_v22, %v8436_v46 }
0x1a83   :  { %5210 = vmatmul.mubr.msk.f32.vlgmr.msra.gmra.mrb[38].mxu0 %vm115_vm2, %v4458_v26 }
0x1b56   :  { %v5211_v9 = vpop.f32.mrb[38].mxu0 }
0x1b57   :  { %v4549_v45 = vadd.f32 %v5211_v9, %v4470_v19  ;;  %v4543_v1 = vpop.f32.mrb[39].mxu0 }
0x1b58   :  { %v4544_v36 = vadd.f32 %v4543_v1, %v4470_v19 }
0x1b59   :  { %4553 = vst.msk [vmem:[#allocation4 + $0x8] sm:$0xff] %vm115_vm2, %v4549_v45 }
0x1b5a   :  { %4552 = vst.msk [vmem:[#allocation4] sm:$0xff] %vm115_vm2, %v4544_v36 }
0x1b5b   :  { %5797 = shalt.err (!%p5794_p4)
}
0x1b5c   :  { %s5798_s0 = scalar_lea.hbm %s8304_s5, 256 }
0x1b5d   :  { %p5799_p5 = scmp.ne.s32.totalorder %s8304_s5, %s5798_s0  ;;  %p5802_p6 = scmp.lt.u32.totalorder %s5798_s0, %s8304_s5 }
0x1b5f   :  { %p5804_p7 = pnand %p5802_p6, %p5799_p5 }
0x1b61   :  { %5807 = shalt.err (!%p5804_p7)
}
0x1b62   :  { %s5816_s30 = smov 128   ;;  %s5817_s6 = smov 8  }
0x1b63   :  { %4565 = dma.vmem_to_hbm [thread:$0]  %s4560_s22, 256, %s8304_s5, [#allocation5], %s5816_s30, %s5816_s30, %s5817_s6  }
0x1b64   :  { %5808 = dma.done.wait [#allocation5], 256  }
0x1b65   :  { %5809 = vsyncadd [#allocation5], 4294967040 }
0x1b66   :  { %4569 = vsyncpa [#allocation5], 1 }

</bundles_post_ra>
